<compile_context>
chip_gen: v6e
topology: v6e:2x2x1
jax: 0.10.0
libtpu: 0.0.40
codegen_flags: <defaults>
</compile_context>

<pallas_src>
import functools

import jax
import jax.numpy as jnp
from jax import lax
from jax.experimental import pallas as pl
from jax.experimental.pallas import tpu as pltpu

COMPUTE_DTYPE = jnp.bfloat16   # MXU operand / inter-layer activation dtype
LANE = 128                     # lane width  (last-dim alignment)
SUBLANE = 8                    # sublane width (second-to-last-dim alignment)


def _round_up(x, m):
    return ((x + m - 1) // m) * m


def _vmem_cap_bytes():
    try:
        return int(pltpu.get_tpu_info().vmem_capacity_bytes)
    except Exception:  # no TPU info available -> be conservative (v7x = 64 MiB)
        return 64 * 1024 * 1024


def _layer_vmem_bytes(tc, B, F, H, x_itemsize, last_only, x_bufs=2):
    """Rough resident-VMEM estimate for one fused GRU-layer kernel."""
    G = 3 * H
    x_block = tc * B * F * x_itemsize * x_bufs          # streamed input chunk
    weights = (F * G + H * G) * 2                       # bf16, Buffered(1)
    biases = (G + H) * 4
    gi_scr = tc * B * G * 4                             # f32 chunk gates scratch
    h_scr = B * H * 4                                   # f32 hidden state
    out = (B * H * 4 * 2) if last_only else (tc * B * H * 2 * 2)
    return x_block + weights + biases + gi_scr + h_scr + out


def _choose_time_chunk(T, B, H, f_in, n_layers, cap):
    """Largest time chunk whose working set fits VMEM (prefer exact divisors)."""
    usable = cap - (16 << 20)                           # generation-aware budget
    f_list = [f_in] + [H] * max(n_layers - 1, 0)

    def fits(tc):
        for li, F in enumerate(f_list):
            last_only = li == n_layers - 1
            if _layer_vmem_bytes(tc, B, F, H, 2, last_only) > usable:
                return False
        return True

    cands = [c for c in (64, 32, 16, 8, 4, 2, 1) if c <= max(T, 1)] or [1]
    for c in cands:                  # exact divisor -> no padded timesteps
        if T % c == 0 and fits(c):
            return c
    for c in cands:                  # otherwise pad T up and mask in-kernel
        if fits(c):
            return c
    # TODO(synk): for H so large even tc=1 overflows VMEM (v7x, H>~2k), stage
    # W_ih/W_hh in column tiles via pl.ANY + make_async_copy instead.
    return 1


# --------------------- fused projection + recurrence kernel ------------------
def _make_layer_kernel(H, B, tc, seq_len, last_only):
    need_mask = (seq_len % tc) != 0      # padded trailing timesteps present?

    def kernel(x_ref, wih_ref, whh_ref, bih_ref, bhn_ref, out_ref, h_scr, gi_scr):
        c = pl.program_id(0)

        @pl.when(c == 0)
        def _():                         # h0 = zeros, as in the PyTorch forward
            h_scr[...] = jnp.zeros_like(h_scr)

        # Chunk input projection: one lane-dense (tc*B, F) x (F, 3H) MXU matmul.
        # gi = X_chunk @ W_ih^T + (b_ih  [+ b_hh folded in for the r, z gates]).
        gi_scr[...] = (
            jnp.dot(x_ref[...].astype(wih_ref.dtype), wih_ref[...],
                    preferred_element_type=jnp.float32)
            + bih_ref[...].astype(jnp.float32))

        whh = whh_ref[...]                                        # (H, 3H) bf16
        bhn = jnp.broadcast_to(bhn_ref[...].astype(jnp.float32), (B, H))  # hoisted

        def step(t, h):
            row = pl.multiple_of(t * B, B)
            gi = gi_scr[pl.ds(row, B), :]                         # (B, 3H) f32
            hd = jnp.dot(h.astype(whh.dtype), whh,
                         preferred_element_type=jnp.float32)      # (B, 3H) f32
            r = jax.nn.sigmoid(gi[:, 0:H] + hd[:, 0:H])
            z = jax.nn.sigmoid(gi[:, H:2 * H] + hd[:, H:2 * H])
            n = jnp.tanh(gi[:, 2 * H:3 * H] + r * (hd[:, 2 * H:3 * H] + bhn))
            h_new = n + z * (h - n)                  # == (1 - z) * n + z * h
            if need_mask:                            # freeze h past seq_len
                h_new = jnp.where(c * tc + t < seq_len, h_new, h)
            if not last_only:
                out_ref[pl.ds(row, B), :] = h_new.astype(out_ref.dtype)
            return h_new

        h_final = lax.fori_loop(0, tc, step, h_scr[...], unroll=True)
        h_scr[...] = h_final
        if last_only:                    # resident (B, H) block: only h_T -> HBM
            out_ref[...] = h_final.astype(out_ref.dtype)

    return kernel


def gru_layer(x2, lp, *, H, B, tc, seq_len, n_chunks, last_only):
    """x2: (n_chunks*tc*B, F) time-major flattened layer input (bf16)."""
    M, F = x2.shape
    G = 3 * H

    if last_only:
        out_shape = jax.ShapeDtypeStruct((B, H), jnp.float32)
        out_spec = pl.BlockSpec((B, H), lambda c: (0, 0))
    else:
        out_shape = jax.ShapeDtypeStruct((M, H), COMPUTE_DTYPE)
        out_spec = pl.BlockSpec((tc * B, H), lambda c: (c, 0))

    est = _layer_vmem_bytes(tc, B, F, H, x2.dtype.itemsize, last_only)
    cap = _vmem_cap_bytes()
    if est <= (12 << 20):            # fits every generation's scoped default
        vmem_limit = None
    else:                            # raise it, keeping headroom below physical
        vmem_limit = int(min(cap - (8 << 20), max(est + (8 << 20), 32 << 20)))

    const = pl.Buffered(1)           # constant operands: no useless double buffer
    return pl.pallas_call(
        _make_layer_kernel(H, B, tc, seq_len, last_only),
        out_shape=out_shape,
        grid_spec=pltpu.PrefetchScalarGridSpec(
            num_scalar_prefetch=0,
            grid=(n_chunks,),        # sequential recurrence over time chunks
            in_specs=[
                pl.BlockSpec((tc * B, F), lambda c: (c, 0)),
                pl.BlockSpec((F, G), lambda c: (0, 0), pipeline_mode=const),
                pl.BlockSpec((H, G), lambda c: (0, 0), pipeline_mode=const),
                pl.BlockSpec((1, G), lambda c: (0, 0), pipeline_mode=const),
                pl.BlockSpec((1, H), lambda c: (0, 0), pipeline_mode=const),
            ],
            out_specs=out_spec,
            scratch_shapes=[
                pltpu.VMEM((B, H), jnp.float32),        # persistent hidden state
                pltpu.VMEM((tc * B, G), jnp.float32),   # chunk gates_i
            ],
        ),
        compiler_params=pltpu.CompilerParams(
            dimension_semantics=("arbitrary",),
            vmem_limit_bytes=vmem_limit),
        # TODO(synk): on v7x, add a leading batch-block grid axis marked
        # "parallel" to split the recurrence across the two TensorCores.
    )(x2, lp["wih"], lp["whh"], lp["bias"], lp["bhn"])


# --------------------------------- final FC ----------------------------------
def _fc_kernel(h_ref, w_ref, b_ref, o_ref):
    o_ref[...] = (jnp.dot(h_ref[...].astype(w_ref.dtype), w_ref[...],
                          preferred_element_type=jnp.float32)
                  + b_ref[...]).astype(o_ref.dtype)


def linear(h, w, b):
    """h: (B, H) f32, w: (H, O) bf16 (pre-transposed), b: (1, O) f32."""
    B, H = h.shape
    O = w.shape[1]
    return pl.pallas_call(
        _fc_kernel,
        out_shape=jax.ShapeDtypeStruct((B, O), jnp.float32),
        grid=(1,),
        in_specs=[pl.BlockSpec((B, H), lambda i: (0, 0)),
                  pl.BlockSpec((H, O), lambda i: (0, 0)),
                  pl.BlockSpec((1, O), lambda i: (0, 0))],
        out_specs=pl.BlockSpec((B, O), lambda i: (0, 0)),
    )(h, w, b)


# ---------------------------------- forward ----------------------------------
def gru_forward(x_btf, params, *, hidden_dim, output_dim):
    """Equivalent of GRU.forward: x_btf is batch_first (B, T, input_dim)."""
    B, T, F = x_btf.shape
    layers = params["gru"]
    n_layers = len(layers)
    Hp = _round_up(hidden_dim, LANE)        # lane-padded hidden size
    Bp = _round_up(B, SUBLANE)              # sublane-padded batch

    tc = _choose_time_chunk(T, Bp, Hp, F, n_layers, _vmem_cap_bytes())
    n_chunks = pl.cdiv(T, tc)
    T_pad = n_chunks * tc

    # Time-major, zero-padded, flattened to a lane-dense (T_pad*Bp, F) bf16 slab.
    x = jnp.transpose(x_btf, (1, 0, 2))
    x = jnp.pad(x, ((0, T_pad - T), (0, Bp - B), (0, 0)))
    x = x.reshape(T_pad * Bp, F).astype(COMPUTE_DTYPE)

    for li, lp in enumerate(layers):
        last_only = li == n_layers - 1      # only h_T of the top layer is used
        x = gru_layer(x, lp, H=Hp, B=Bp, tc=tc, seq_len=T,
                      n_chunks=n_chunks, last_only=last_only)

    out = linear(x, params["fc_w"], params["fc_b"])     # (Bp, Op)
    return out[:B, :output_dim]


# ------------------------------ parameter setup -------------------------------
def init_params(key, input_dim, hidden_dim, num_layers, output_dim):
    """PyTorch-style U(-1/sqrt(H), 1/sqrt(H)) init, pre-packed & lane-padded."""
    H = hidden_dim
    Hp = _round_up(H, LANE)
    Op = _round_up(output_dim, LANE)
    k = 1.0 / jnp.sqrt(jnp.float32(H))
    gru = []
    for layer in range(num_layers):
        in_dim = input_dim if layer == 0 else H
        in_dim_p = input_dim if layer == 0 else Hp
        key, k1, k2, k3, k4 = jax.random.split(key, 5)
        w_ih = jax.random.uniform(k1, (3 * H, in_dim), jnp.float32, -k, k)
        w_hh = jax.random.uniform(k2, (3 * H, H), jnp.float32, -k, k)
        b_ih = jax.random.uniform(k3, (3 * H,), jnp.float32, -k, k)
        b_hh = jax.random.uniform(k4, (3 * H,), jnp.float32, -k, k)
        # Fold b_hh[r], b_hh[z] into the input-side bias (b_hn stays separate
        # because of the r-gating); pad each gate block to the lane boundary
        # with zeros (padded hidden units remain exactly zero forever).
        bias = b_ih.at[:2 * H].add(b_hh[:2 * H])
        wih_p = jnp.zeros((in_dim_p, 3 * Hp), jnp.float32)
        whh_p = jnp.zeros((Hp, 3 * Hp), jnp.float32)
        bias_p = jnp.zeros((1, 3 * Hp), jnp.float32)
        for g in range(3):
            wih_p = wih_p.at[:in_dim, g * Hp:g * Hp + H].set(w_ih[g * H:(g + 1) * H].T)
            whh_p = whh_p.at[:H, g * Hp:g * Hp + H].set(w_hh[g * H:(g + 1) * H].T)
            bias_p = bias_p.at[0, g * Hp:g * Hp + H].set(bias[g * H:(g + 1) * H])
        bhn_p = jnp.zeros((1, Hp), jnp.float32).at[0, :H].set(b_hh[2 * H:])
        gru.append(dict(
            wih=wih_p.astype(COMPUTE_DTYPE),    # (F_pad, 3*Hp) bf16
            whh=whh_p.astype(COMPUTE_DTYPE),    # (Hp,    3*Hp) bf16
            bias=bias_p,                        # (1, 3*Hp) f32
            bhn=bhn_p,                          # (1, Hp)   f32
        ))
    key, kf1, kf2 = jax.random.split(key, 3)
    fc_w = jax.random.uniform(kf1, (output_dim, H), jnp.float32, -k, k)
    fc_b = jax.random.uniform(kf2, (output_dim,), jnp.float32, -k, k)
    fc_w_p = jnp.zeros((Hp, Op), jnp.float32).at[:H, :output_dim].set(fc_w.T)
    fc_b_p = jnp.zeros((1, Op), jnp.float32).at[0, :output_dim].set(fc_b)
    return {"gru": gru,
            "fc_w": fc_w_p.astype(COMPUTE_DTYPE),   # pre-transposed, bf16
            "fc_b": fc_b_p}


if __name__ == "__main__":
    # Small shapes consistent with the module's forward.
    input_dim, hidden_dim, num_layers, output_dim = 4, 32, 2, 3
    batch, seq = 2, 8

    key = jax.random.PRNGKey(0)
    key, xkey = jax.random.split(key)
    x = jax.random.normal(xkey, (batch, seq, input_dim), jnp.float32)

    params = init_params(key, input_dim, hidden_dim, num_layers, output_dim)

    fwd = jax.jit(functools.partial(
        gru_forward, hidden_dim=hidden_dim, output_dim=output_dim))
    out = jax.block_until_ready(fwd(x, params))   # (batch, output_dim)
    assert out.shape == (batch, output_dim)
    assert bool(jnp.all(jnp.isfinite(out)))
    print("KERNEL_OK")
</pallas_src>

<mosaic_0001>
module attributes {stable_mosaic.version = 11 : i64} {
  func.func @kernel(%arg0: i32, %arg1: memref<64x4xbf16, #tpu.memory_space<vmem>>, %arg2: memref<4x384xbf16, #tpu.memory_space<vmem>>, %arg3: memref<128x384xbf16, #tpu.memory_space<vmem>>, %arg4: memref<1x384xf32, #tpu.memory_space<vmem>>, %arg5: memref<1x128xf32, #tpu.memory_space<vmem>>, %arg6: memref<64x128xbf16, #tpu.memory_space<vmem>>, %arg7: memref<8x128xf32, #tpu.memory_space<vmem>>, %arg8: memref<64x384xf32, #tpu.memory_space<vmem>>) attributes {dimension_semantics = [#tpu.dimension_semantics<arbitrary>], iteration_bounds = array<i64: 1>, scalar_prefetch = 0 : i64, scratch_operands = 2 : i64, tpu.core_type = #tpu.core_type<tc>, window_params = [{transform_indices = @transform_0, window_bounds = array<i64: 64, 4>}, {pipeline_mode = #tpu.pipeline_mode<synchronous>, transform_indices = @transform_1, window_bounds = array<i64: 4, 384>}, {pipeline_mode = #tpu.pipeline_mode<synchronous>, transform_indices = @transform_2, window_bounds = array<i64: 128, 384>}, {pipeline_mode = #tpu.pipeline_mode<synchronous>, transform_indices = @transform_3, window_bounds = array<i64: 1, 384>}, {pipeline_mode = #tpu.pipeline_mode<synchronous>, transform_indices = @transform_4, window_bounds = array<i64: 1, 128>}, {transform_indices = @transform_5, window_bounds = array<i64: 64, 128>}]} {
    %c0_i32 = arith.constant 0 : i32
    %0 = arith.cmpi eq, %arg0, %c0_i32 : i32
    %1 = arith.extui %0 : i1 to i32
    %c0_i32_0 = arith.constant 0 : i32
    %2 = arith.cmpi ne, %1, %c0_i32_0 : i32
    scf.if %2 {
      %cst_65 = arith.constant 0.000000e+00 : f32
      %288 = vector.broadcast %cst_65 : f32 to vector<8x128xf32>
      %c0_66 = arith.constant 0 : index
      %c0_67 = arith.constant 0 : index
      %289 = vector.load %arg7[%c0_66, %c0_67] : memref<8x128xf32, #tpu.memory_space<vmem>>, vector<8x128xf32>
      tpu.vector_store %arg7[%c0_66, %c0_67], %288 {strides = array<i32>} : memref<8x128xf32, #tpu.memory_space<vmem>>, vector<8x128xf32>,
    } else {
    }
    %c0 = arith.constant 0 : index
    %c0_1 = arith.constant 0 : index
    %3 = vector.load %arg1[%c0, %c0_1] : memref<64x4xbf16, #tpu.memory_space<vmem>>, vector<64x4xbf16>
    %c0_2 = arith.constant 0 : index
    %c0_3 = arith.constant 0 : index
    %4 = vector.load %arg2[%c0_2, %c0_3] : memref<4x384xbf16, #tpu.memory_space<vmem>>, vector<4x384xbf16>
    %cst = arith.constant dense<0.000000e+00> : vector<64x384xf32>
    %5 = tpu.matmul %3, %4, %cst {dimension_numbers = #tpu.dot_dimension_numbers<[1], [0], [0], [1], [0, 0, 1, 1], [], []>} : vector<64x4xbf16>, vector<4x384xbf16>, vector<64x384xf32> -> vector<64x384xf32>
    %c0_4 = arith.constant 0 : index
    %c0_5 = arith.constant 0 : index
    %6 = vector.load %arg4[%c0_4, %c0_5] : memref<1x384xf32, #tpu.memory_space<vmem>>, vector<1x384xf32>
    %7 = vector.broadcast %6 : vector<1x384xf32> to vector<64x384xf32>
    %8 = arith.addf %5, %7 : vector<64x384xf32>
    %c0_6 = arith.constant 0 : index
    %c0_7 = arith.constant 0 : index
    %9 = vector.load %arg8[%c0_6, %c0_7] : memref<64x384xf32, #tpu.memory_space<vmem>>, vector<64x384xf32>
    tpu.vector_store %arg8[%c0_6, %c0_7], %8 {strides = array<i32>} : memref<64x384xf32, #tpu.memory_space<vmem>>, vector<64x384xf32>,
    %c0_8 = arith.constant 0 : index
    %c0_9 = arith.constant 0 : index
    %10 = vector.load %arg3[%c0_8, %c0_9] : memref<128x384xbf16, #tpu.memory_space<vmem>>, vector<128x384xbf16>
    %c0_10 = arith.constant 0 : index
    %c0_11 = arith.constant 0 : index
    %11 = vector.load %arg5[%c0_10, %c0_11] : memref<1x128xf32, #tpu.memory_space<vmem>>, vector<1x128xf32>
    %12 = vector.shape_cast %11 : vector<1x128xf32> to vector<1x128xf32>
    %13 = vector.broadcast %12 : vector<1x128xf32> to vector<8x128xf32>
    %c0_12 = arith.constant 0 : index
    %c0_13 = arith.constant 0 : index
    %14 = vector.load %arg7[%c0_12, %c0_13] : memref<8x128xf32, #tpu.memory_space<vmem>>, vector<8x128xf32>
    %c0_i32_14 = arith.constant 0 : i32
    %c8_i32 = arith.constant 8 : i32
    %15 = arith.muli %c0_i32_14, %c8_i32 : i32
    %16 = tpu.assume_multiple %15, 8 : i32
    %17 = arith.index_cast %16 : i32 to index
    %c0_15 = arith.constant 0 : index
    %18 = vector.load %arg8[%17, %c0_15] : memref<64x384xf32, #tpu.memory_space<vmem>>, vector<8x384xf32>
    %19 = arith.truncf %14 : vector<8x128xf32> to vector<8x128xbf16>
    %cst_16 = arith.constant dense<0.000000e+00> : vector<8x384xf32>
    %20 = tpu.matmul %19, %10, %cst_16 {dimension_numbers = #tpu.dot_dimension_numbers<[1], [0], [0], [1], [0, 0, 1, 1], [], []>} : vector<8x128xbf16>, vector<128x384xbf16>, vector<8x384xf32> -> vector<8x384xf32>
    %21 = vector.extract_strided_slice %18 {offsets = [0, 0], sizes = [8, 128], strides = [1, 1]} : vector<8x384xf32> to vector<8x128xf32>
    %22 = vector.extract_strided_slice %20 {offsets = [0, 0], sizes = [8, 128], strides = [1, 1]} : vector<8x384xf32> to vector<8x128xf32>
    %23 = arith.addf %21, %22 : vector<8x128xf32>
    %24 = arith.negf %23 : vector<8x128xf32>
    %25 = math.exp %24 : vector<8x128xf32>
    %cst_17 = arith.constant 1.000000e+00 : f32
    %26 = vector.broadcast %cst_17 : f32 to vector<8x128xf32>
    %27 = arith.addf %26, %25 : vector<8x128xf32>
    %28 = arith.divf %26, %27 : vector<8x128xf32>
    %29 = vector.extract_strided_slice %18 {offsets = [0, 128], sizes = [8, 128], strides = [1, 1]} : vector<8x384xf32> to vector<8x128xf32>
    %30 = vector.extract_strided_slice %20 {offsets = [0, 128], sizes = [8, 128], strides = [1, 1]} : vector<8x384xf32> to vector<8x128xf32>
    %31 = arith.addf %29, %30 : vector<8x128xf32>
    %32 = arith.negf %31 : vector<8x128xf32>
    %33 = math.exp %32 : vector<8x128xf32>
    %cst_18 = arith.constant 1.000000e+00 : f32
    %34 = vector.broadcast %cst_18 : f32 to vector<8x128xf32>
    %35 = arith.addf %34, %33 : vector<8x128xf32>
    %36 = arith.divf %34, %35 : vector<8x128xf32>
    %37 = vector.extract_strided_slice %18 {offsets = [0, 256], sizes = [8, 128], strides = [1, 1]} : vector<8x384xf32> to vector<8x128xf32>
    %38 = vector.extract_strided_slice %20 {offsets = [0, 256], sizes = [8, 128], strides = [1, 1]} : vector<8x384xf32> to vector<8x128xf32>
    %39 = arith.addf %38, %13 : vector<8x128xf32>
    %40 = arith.mulf %28, %39 : vector<8x128xf32>
    %41 = arith.addf %37, %40 : vector<8x128xf32>
    %42 = math.tanh %41 : vector<8x128xf32>
    %43 = arith.subf %14, %42 : vector<8x128xf32>
    %44 = arith.mulf %36, %43 : vector<8x128xf32>
    %45 = arith.addf %42, %44 : vector<8x128xf32>
    %46 = arith.truncf %45 : vector<8x128xf32> to vector<8x128xbf16>
    %47 = arith.index_cast %16 : i32 to index
    %c0_19 = arith.constant 0 : index
    %48 = vector.load %arg6[%47, %c0_19] : memref<64x128xbf16, #tpu.memory_space<vmem>>, vector<8x128xbf16>
    tpu.vector_store %arg6[%47, %c0_19], %46 {strides = array<i32>} : memref<64x128xbf16, #tpu.memory_space<vmem>>, vector<8x128xbf16>,
    %c1_i32 = arith.constant 1 : i32
    %c8_i32_20 = arith.constant 8 : i32
    %49 = arith.muli %c1_i32, %c8_i32_20 : i32
    %50 = tpu.assume_multiple %49, 8 : i32
    %51 = arith.index_cast %50 : i32 to index
    %c0_21 = arith.constant 0 : index
    %52 = vector.load %arg8[%51, %c0_21] : memref<64x384xf32, #tpu.memory_space<vmem>>, vector<8x384xf32>
    %53 = arith.truncf %45 : vector<8x128xf32> to vector<8x128xbf16>
    %cst_22 = arith.constant dense<0.000000e+00> : vector<8x384xf32>
    %54 = tpu.matmul %53, %10, %cst_22 {dimension_numbers = #tpu.dot_dimension_numbers<[1], [0], [0], [1], [0, 0, 1, 1], [], []>} : vector<8x128xbf16>, vector<128x384xbf16>, vector<8x384xf32> -> vector<8x384xf32>
    %55 = vector.extract_strided_slice %52 {offsets = [0, 0], sizes = [8, 128], strides = [1, 1]} : vector<8x384xf32> to vector<8x128xf32>
    %56 = vector.extract_strided_slice %54 {offsets = [0, 0], sizes = [8, 128], strides = [1, 1]} : vector<8x384xf32> to vector<8x128xf32>
    %57 = arith.addf %55, %56 : vector<8x128xf32>
    %58 = arith.negf %57 : vector<8x128xf32>
    %59 = math.exp %58 : vector<8x128xf32>
    %cst_23 = arith.constant 1.000000e+00 : f32
    %60 = vector.broadcast %cst_23 : f32 to vector<8x128xf32>
    %61 = arith.addf %60, %59 : vector<8x128xf32>
    %62 = arith.divf %60, %61 : vector<8x128xf32>
    %63 = vector.extract_strided_slice %52 {offsets = [0, 128], sizes = [8, 128], strides = [1, 1]} : vector<8x384xf32> to vector<8x128xf32>
    %64 = vector.extract_strided_slice %54 {offsets = [0, 128], sizes = [8, 128], strides = [1, 1]} : vector<8x384xf32> to vector<8x128xf32>
    %65 = arith.addf %63, %64 : vector<8x128xf32>
    %66 = arith.negf %65 : vector<8x128xf32>
    %67 = math.exp %66 : vector<8x128xf32>
    %cst_24 = arith.constant 1.000000e+00 : f32
    %68 = vector.broadcast %cst_24 : f32 to vector<8x128xf32>
    %69 = arith.addf %68, %67 : vector<8x128xf32>
    %70 = arith.divf %68, %69 : vector<8x128xf32>
    %71 = vector.extract_strided_slice %52 {offsets = [0, 256], sizes = [8, 128], strides = [1, 1]} : vector<8x384xf32> to vector<8x128xf32>
    %72 = vector.extract_strided_slice %54 {offsets = [0, 256], sizes = [8, 128], strides = [1, 1]} : vector<8x384xf32> to vector<8x128xf32>
    %73 = arith.addf %72, %13 : vector<8x128xf32>
    %74 = arith.mulf %62, %73 : vector<8x128xf32>
    %75 = arith.addf %71, %74 : vector<8x128xf32>
    %76 = math.tanh %75 : vector<8x128xf32>
    %77 = arith.subf %45, %76 : vector<8x128xf32>
    %78 = arith.mulf %70, %77 : vector<8x128xf32>
    %79 = arith.addf %76, %78 : vector<8x128xf32>
    %80 = arith.truncf %79 : vector<8x128xf32> to vector<8x128xbf16>
    %81 = arith.index_cast %50 : i32 to index
    %c0_25 = arith.constant 0 : index
    %82 = vector.load %arg6[%81, %c0_25] : memref<64x128xbf16, #tpu.memory_space<vmem>>, vector<8x128xbf16>
    tpu.vector_store %arg6[%81, %c0_25], %80 {strides = array<i32>} : memref<64x128xbf16, #tpu.memory_space<vmem>>, vector<8x128xbf16>,
    %c2_i32 = arith.constant 2 : i32
    %c8_i32_26 = arith.constant 8 : i32
    %83 = arith.muli %c2_i32, %c8_i32_26 : i32
    %84 = tpu.assume_multiple %83, 8 : i32
    %85 = arith.index_cast %84 : i32 to index
    %c0_27 = arith.constant 0 : index
    %86 = vector.load %arg8[%85, %c0_27] : memref<64x384xf32, #tpu.memory_space<vmem>>, vector<8x384xf32>
    %87 = arith.truncf %79 : vector<8x128xf32> to vector<8x128xbf16>
    %cst_28 = arith.constant dense<0.000000e+00> : vector<8x384xf32>
    %88 = tpu.matmul %87, %10, %cst_28 {dimension_numbers = #tpu.dot_dimension_numbers<[1], [0], [0], [1], [0, 0, 1, 1], [], []>} : vector<8x128xbf16>, vector<128x384xbf16>, vector<8x384xf32> -> vector<8x384xf32>
    %89 = vector.extract_strided_slice %86 {offsets = [0, 0], sizes = [8, 128], strides = [1, 1]} : vector<8x384xf32> to vector<8x128xf32>
    %90 = vector.extract_strided_slice %88 {offsets = [0, 0], sizes = [8, 128], strides = [1, 1]} : vector<8x384xf32> to vector<8x128xf32>
    %91 = arith.addf %89, %90 : vector<8x128xf32>
    %92 = arith.negf %91 : vector<8x128xf32>
    %93 = math.exp %92 : vector<8x128xf32>
    %cst_29 = arith.constant 1.000000e+00 : f32
    %94 = vector.broadcast %cst_29 : f32 to vector<8x128xf32>
    %95 = arith.addf %94, %93 : vector<8x128xf32>
    %96 = arith.divf %94, %95 : vector<8x128xf32>
    %97 = vector.extract_strided_slice %86 {offsets = [0, 128], sizes = [8, 128], strides = [1, 1]} : vector<8x384xf32> to vector<8x128xf32>
    %98 = vector.extract_strided_slice %88 {offsets = [0, 128], sizes = [8, 128], strides = [1, 1]} : vector<8x384xf32> to vector<8x128xf32>
    %99 = arith.addf %97, %98 : vector<8x128xf32>
    %100 = arith.negf %99 : vector<8x128xf32>
    %101 = math.exp %100 : vector<8x128xf32>
    %cst_30 = arith.constant 1.000000e+00 : f32
    %102 = vector.broadcast %cst_30 : f32 to vector<8x128xf32>
    %103 = arith.addf %102, %101 : vector<8x128xf32>
    %104 = arith.divf %102, %103 : vector<8x128xf32>
    %105 = vector.extract_strided_slice %86 {offsets = [0, 256], sizes = [8, 128], strides = [1, 1]} : vector<8x384xf32> to vector<8x128xf32>
    %106 = vector.extract_strided_slice %88 {offsets = [0, 256], sizes = [8, 128], strides = [1, 1]} : vector<8x384xf32> to vector<8x128xf32>
    %107 = arith.addf %106, %13 : vector<8x128xf32>
    %108 = arith.mulf %96, %107 : vector<8x128xf32>
    %109 = arith.addf %105, %108 : vector<8x128xf32>
    %110 = math.tanh %109 : vector<8x128xf32>
    %111 = arith.subf %79, %110 : vector<8x128xf32>
    %112 = arith.mulf %104, %111 : vector<8x128xf32>
    %113 = arith.addf %110, %112 : vector<8x128xf32>
    %114 = arith.truncf %113 : vector<8x128xf32> to vector<8x128xbf16>
    %115 = arith.index_cast %84 : i32 to index
    %c0_31 = arith.constant 0 : index
    %116 = vector.load %arg6[%115, %c0_31] : memref<64x128xbf16, #tpu.memory_space<vmem>>, vector<8x128xbf16>
    tpu.vector_store %arg6[%115, %c0_31], %114 {strides = array<i32>} : memref<64x128xbf16, #tpu.memory_space<vmem>>, vector<8x128xbf16>,
    %c3_i32 = arith.constant 3 : i32
    %c8_i32_32 = arith.constant 8 : i32
    %117 = arith.muli %c3_i32, %c8_i32_32 : i32
    %118 = tpu.assume_multiple %117, 8 : i32
    %119 = arith.index_cast %118 : i32 to index
    %c0_33 = arith.constant 0 : index
    %120 = vector.load %arg8[%119, %c0_33] : memref<64x384xf32, #tpu.memory_space<vmem>>, vector<8x384xf32>
    %121 = arith.truncf %113 : vector<8x128xf32> to vector<8x128xbf16>
    %cst_34 = arith.constant dense<0.000000e+00> : vector<8x384xf32>
    %122 = tpu.matmul %121, %10, %cst_34 {dimension_numbers = #tpu.dot_dimension_numbers<[1], [0], [0], [1], [0, 0, 1, 1], [], []>} : vector<8x128xbf16>, vector<128x384xbf16>, vector<8x384xf32> -> vector<8x384xf32>
    %123 = vector.extract_strided_slice %120 {offsets = [0, 0], sizes = [8, 128], strides = [1, 1]} : vector<8x384xf32> to vector<8x128xf32>
    %124 = vector.extract_strided_slice %122 {offsets = [0, 0], sizes = [8, 128], strides = [1, 1]} : vector<8x384xf32> to vector<8x128xf32>
    %125 = arith.addf %123, %124 : vector<8x128xf32>
    %126 = arith.negf %125 : vector<8x128xf32>
    %127 = math.exp %126 : vector<8x128xf32>
    %cst_35 = arith.constant 1.000000e+00 : f32
    %128 = vector.broadcast %cst_35 : f32 to vector<8x128xf32>
    %129 = arith.addf %128, %127 : vector<8x128xf32>
    %130 = arith.divf %128, %129 : vector<8x128xf32>
    %131 = vector.extract_strided_slice %120 {offsets = [0, 128], sizes = [8, 128], strides = [1, 1]} : vector<8x384xf32> to vector<8x128xf32>
    %132 = vector.extract_strided_slice %122 {offsets = [0, 128], sizes = [8, 128], strides = [1, 1]} : vector<8x384xf32> to vector<8x128xf32>
    %133 = arith.addf %131, %132 : vector<8x128xf32>
    %134 = arith.negf %133 : vector<8x128xf32>
    %135 = math.exp %134 : vector<8x128xf32>
    %cst_36 = arith.constant 1.000000e+00 : f32
    %136 = vector.broadcast %cst_36 : f32 to vector<8x128xf32>
    %137 = arith.addf %136, %135 : vector<8x128xf32>
    %138 = arith.divf %136, %137 : vector<8x128xf32>
    %139 = vector.extract_strided_slice %120 {offsets = [0, 256], sizes = [8, 128], strides = [1, 1]} : vector<8x384xf32> to vector<8x128xf32>
    %140 = vector.extract_strided_slice %122 {offsets = [0, 256], sizes = [8, 128], strides = [1, 1]} : vector<8x384xf32> to vector<8x128xf32>
    %141 = arith.addf %140, %13 : vector<8x128xf32>
    %142 = arith.mulf %130, %141 : vector<8x128xf32>
    %143 = arith.addf %139, %142 : vector<8x128xf32>
    %144 = math.tanh %143 : vector<8x128xf32>
    %145 = arith.subf %113, %144 : vector<8x128xf32>
    %146 = arith.mulf %138, %145 : vector<8x128xf32>
    %147 = arith.addf %144, %146 : vector<8x128xf32>
    %148 = arith.truncf %147 : vector<8x128xf32> to vector<8x128xbf16>
    %149 = arith.index_cast %118 : i32 to index
    %c0_37 = arith.constant 0 : index
    %150 = vector.load %arg6[%149, %c0_37] : memref<64x128xbf16, #tpu.memory_space<vmem>>, vector<8x128xbf16>
    tpu.vector_store %arg6[%149, %c0_37], %148 {strides = array<i32>} : memref<64x128xbf16, #tpu.memory_space<vmem>>, vector<8x128xbf16>,
    %c4_i32 = arith.constant 4 : i32
    %c8_i32_38 = arith.constant 8 : i32
    %151 = arith.muli %c4_i32, %c8_i32_38 : i32
    %152 = tpu.assume_multiple %151, 8 : i32
    %153 = arith.index_cast %152 : i32 to index
    %c0_39 = arith.constant 0 : index
    %154 = vector.load %arg8[%153, %c0_39] : memref<64x384xf32, #tpu.memory_space<vmem>>, vector<8x384xf32>
    %155 = arith.truncf %147 : vector<8x128xf32> to vector<8x128xbf16>
    %cst_40 = arith.constant dense<0.000000e+00> : vector<8x384xf32>
    %156 = tpu.matmul %155, %10, %cst_40 {dimension_numbers = #tpu.dot_dimension_numbers<[1], [0], [0], [1], [0, 0, 1, 1], [], []>} : vector<8x128xbf16>, vector<128x384xbf16>, vector<8x384xf32> -> vector<8x384xf32>
    %157 = vector.extract_strided_slice %154 {offsets = [0, 0], sizes = [8, 128], strides = [1, 1]} : vector<8x384xf32> to vector<8x128xf32>
    %158 = vector.extract_strided_slice %156 {offsets = [0, 0], sizes = [8, 128], strides = [1, 1]} : vector<8x384xf32> to vector<8x128xf32>
    %159 = arith.addf %157, %158 : vector<8x128xf32>
    %160 = arith.negf %159 : vector<8x128xf32>
    %161 = math.exp %160 : vector<8x128xf32>
    %cst_41 = arith.constant 1.000000e+00 : f32
    %162 = vector.broadcast %cst_41 : f32 to vector<8x128xf32>
    %163 = arith.addf %162, %161 : vector<8x128xf32>
    %164 = arith.divf %162, %163 : vector<8x128xf32>
    %165 = vector.extract_strided_slice %154 {offsets = [0, 128], sizes = [8, 128], strides = [1, 1]} : vector<8x384xf32> to vector<8x128xf32>
    %166 = vector.extract_strided_slice %156 {offsets = [0, 128], sizes = [8, 128], strides = [1, 1]} : vector<8x384xf32> to vector<8x128xf32>
    %167 = arith.addf %165, %166 : vector<8x128xf32>
    %168 = arith.negf %167 : vector<8x128xf32>
    %169 = math.exp %168 : vector<8x128xf32>
    %cst_42 = arith.constant 1.000000e+00 : f32
    %170 = vector.broadcast %cst_42 : f32 to vector<8x128xf32>
    %171 = arith.addf %170, %169 : vector<8x128xf32>
    %172 = arith.divf %170, %171 : vector<8x128xf32>
    %173 = vector.extract_strided_slice %154 {offsets = [0, 256], sizes = [8, 128], strides = [1, 1]} : vector<8x384xf32> to vector<8x128xf32>
    %174 = vector.extract_strided_slice %156 {offsets = [0, 256], sizes = [8, 128], strides = [1, 1]} : vector<8x384xf32> to vector<8x128xf32>
    %175 = arith.addf %174, %13 : vector<8x128xf32>
    %176 = arith.mulf %164, %175 : vector<8x128xf32>
    %177 = arith.addf %173, %176 : vector<8x128xf32>
    %178 = math.tanh %177 : vector<8x128xf32>
    %179 = arith.subf %147, %178 : vector<8x128xf32>
    %180 = arith.mulf %172, %179 : vector<8x128xf32>
    %181 = arith.addf %178, %180 : vector<8x128xf32>
    %182 = arith.truncf %181 : vector<8x128xf32> to vector<8x128xbf16>
    %183 = arith.index_cast %152 : i32 to index
    %c0_43 = arith.constant 0 : index
    %184 = vector.load %arg6[%183, %c0_43] : memref<64x128xbf16, #tpu.memory_space<vmem>>, vector<8x128xbf16>
    tpu.vector_store %arg6[%183, %c0_43], %182 {strides = array<i32>} : memref<64x128xbf16, #tpu.memory_space<vmem>>, vector<8x128xbf16>,
    %c5_i32 = arith.constant 5 : i32
    %c8_i32_44 = arith.constant 8 : i32
    %185 = arith.muli %c5_i32, %c8_i32_44 : i32
    %186 = tpu.assume_multiple %185, 8 : i32
    %187 = arith.index_cast %186 : i32 to index
    %c0_45 = arith.constant 0 : index
    %188 = vector.load %arg8[%187, %c0_45] : memref<64x384xf32, #tpu.memory_space<vmem>>, vector<8x384xf32>
    %189 = arith.truncf %181 : vector<8x128xf32> to vector<8x128xbf16>
    %cst_46 = arith.constant dense<0.000000e+00> : vector<8x384xf32>
    %190 = tpu.matmul %189, %10, %cst_46 {dimension_numbers = #tpu.dot_dimension_numbers<[1], [0], [0], [1], [0, 0, 1, 1], [], []>} : vector<8x128xbf16>, vector<128x384xbf16>, vector<8x384xf32> -> vector<8x384xf32>
    %191 = vector.extract_strided_slice %188 {offsets = [0, 0], sizes = [8, 128], strides = [1, 1]} : vector<8x384xf32> to vector<8x128xf32>
    %192 = vector.extract_strided_slice %190 {offsets = [0, 0], sizes = [8, 128], strides = [1, 1]} : vector<8x384xf32> to vector<8x128xf32>
    %193 = arith.addf %191, %192 : vector<8x128xf32>
    %194 = arith.negf %193 : vector<8x128xf32>
    %195 = math.exp %194 : vector<8x128xf32>
    %cst_47 = arith.constant 1.000000e+00 : f32
    %196 = vector.broadcast %cst_47 : f32 to vector<8x128xf32>
    %197 = arith.addf %196, %195 : vector<8x128xf32>
    %198 = arith.divf %196, %197 : vector<8x128xf32>
    %199 = vector.extract_strided_slice %188 {offsets = [0, 128], sizes = [8, 128], strides = [1, 1]} : vector<8x384xf32> to vector<8x128xf32>
    %200 = vector.extract_strided_slice %190 {offsets = [0, 128], sizes = [8, 128], strides = [1, 1]} : vector<8x384xf32> to vector<8x128xf32>
    %201 = arith.addf %199, %200 : vector<8x128xf32>
    %202 = arith.negf %201 : vector<8x128xf32>
    %203 = math.exp %202 : vector<8x128xf32>
    %cst_48 = arith.constant 1.000000e+00 : f32
    %204 = vector.broadcast %cst_48 : f32 to vector<8x128xf32>
    %205 = arith.addf %204, %203 : vector<8x128xf32>
    %206 = arith.divf %204, %205 : vector<8x128xf32>
    %207 = vector.extract_strided_slice %188 {offsets = [0, 256], sizes = [8, 128], strides = [1, 1]} : vector<8x384xf32> to vector<8x128xf32>
    %208 = vector.extract_strided_slice %190 {offsets = [0, 256], sizes = [8, 128], strides = [1, 1]} : vector<8x384xf32> to vector<8x128xf32>
    %209 = arith.addf %208, %13 : vector<8x128xf32>
    %210 = arith.mulf %198, %209 : vector<8x128xf32>
    %211 = arith.addf %207, %210 : vector<8x128xf32>
    %212 = math.tanh %211 : vector<8x128xf32>
    %213 = arith.subf %181, %212 : vector<8x128xf32>
    %214 = arith.mulf %206, %213 : vector<8x128xf32>
    %215 = arith.addf %212, %214 : vector<8x128xf32>
    %216 = arith.truncf %215 : vector<8x128xf32> to vector<8x128xbf16>
    %217 = arith.index_cast %186 : i32 to index
    %c0_49 = arith.constant 0 : index
    %218 = vector.load %arg6[%217, %c0_49] : memref<64x128xbf16, #tpu.memory_space<vmem>>, vector<8x128xbf16>
    tpu.vector_store %arg6[%217, %c0_49], %216 {strides = array<i32>} : memref<64x128xbf16, #tpu.memory_space<vmem>>, vector<8x128xbf16>,
    %c6_i32 = arith.constant 6 : i32
    %c8_i32_50 = arith.constant 8 : i32
    %219 = arith.muli %c6_i32, %c8_i32_50 : i32
    %220 = tpu.assume_multiple %219, 8 : i32
    %221 = arith.index_cast %220 : i32 to index
    %c0_51 = arith.constant 0 : index
    %222 = vector.load %arg8[%221, %c0_51] : memref<64x384xf32, #tpu.memory_space<vmem>>, vector<8x384xf32>
    %223 = arith.truncf %215 : vector<8x128xf32> to vector<8x128xbf16>
    %cst_52 = arith.constant dense<0.000000e+00> : vector<8x384xf32>
    %224 = tpu.matmul %223, %10, %cst_52 {dimension_numbers = #tpu.dot_dimension_numbers<[1], [0], [0], [1], [0, 0, 1, 1], [], []>} : vector<8x128xbf16>, vector<128x384xbf16>, vector<8x384xf32> -> vector<8x384xf32>
    %225 = vector.extract_strided_slice %222 {offsets = [0, 0], sizes = [8, 128], strides = [1, 1]} : vector<8x384xf32> to vector<8x128xf32>
    %226 = vector.extract_strided_slice %224 {offsets = [0, 0], sizes = [8, 128], strides = [1, 1]} : vector<8x384xf32> to vector<8x128xf32>
    %227 = arith.addf %225, %226 : vector<8x128xf32>
    %228 = arith.negf %227 : vector<8x128xf32>
    %229 = math.exp %228 : vector<8x128xf32>
    %cst_53 = arith.constant 1.000000e+00 : f32
    %230 = vector.broadcast %cst_53 : f32 to vector<8x128xf32>
    %231 = arith.addf %230, %229 : vector<8x128xf32>
    %232 = arith.divf %230, %231 : vector<8x128xf32>
    %233 = vector.extract_strided_slice %222 {offsets = [0, 128], sizes = [8, 128], strides = [1, 1]} : vector<8x384xf32> to vector<8x128xf32>
    %234 = vector.extract_strided_slice %224 {offsets = [0, 128], sizes = [8, 128], strides = [1, 1]} : vector<8x384xf32> to vector<8x128xf32>
    %235 = arith.addf %233, %234 : vector<8x128xf32>
    %236 = arith.negf %235 : vector<8x128xf32>
    %237 = math.exp %236 : vector<8x128xf32>
    %cst_54 = arith.constant 1.000000e+00 : f32
    %238 = vector.broadcast %cst_54 : f32 to vector<8x128xf32>
    %239 = arith.addf %238, %237 : vector<8x128xf32>
    %240 = arith.divf %238, %239 : vector<8x128xf32>
    %241 = vector.extract_strided_slice %222 {offsets = [0, 256], sizes = [8, 128], strides = [1, 1]} : vector<8x384xf32> to vector<8x128xf32>
    %242 = vector.extract_strided_slice %224 {offsets = [0, 256], sizes = [8, 128], strides = [1, 1]} : vector<8x384xf32> to vector<8x128xf32>
    %243 = arith.addf %242, %13 : vector<8x128xf32>
    %244 = arith.mulf %232, %243 : vector<8x128xf32>
    %245 = arith.addf %241, %244 : vector<8x128xf32>
    %246 = math.tanh %245 : vector<8x128xf32>
    %247 = arith.subf %215, %246 : vector<8x128xf32>
    %248 = arith.mulf %240, %247 : vector<8x128xf32>
    %249 = arith.addf %246, %248 : vector<8x128xf32>
    %250 = arith.truncf %249 : vector<8x128xf32> to vector<8x128xbf16>
    %251 = arith.index_cast %220 : i32 to index
    %c0_55 = arith.constant 0 : index
    %252 = vector.load %arg6[%251, %c0_55] : memref<64x128xbf16, #tpu.memory_space<vmem>>, vector<8x128xbf16>
    tpu.vector_store %arg6[%251, %c0_55], %250 {strides = array<i32>} : memref<64x128xbf16, #tpu.memory_space<vmem>>, vector<8x128xbf16>,
    %c7_i32 = arith.constant 7 : i32
    %c8_i32_56 = arith.constant 8 : i32
    %253 = arith.muli %c7_i32, %c8_i32_56 : i32
    %254 = tpu.assume_multiple %253, 8 : i32
    %255 = arith.index_cast %254 : i32 to index
    %c0_57 = arith.constant 0 : index
    %256 = vector.load %arg8[%255, %c0_57] : memref<64x384xf32, #tpu.memory_space<vmem>>, vector<8x384xf32>
    %257 = arith.truncf %249 : vector<8x128xf32> to vector<8x128xbf16>
    %cst_58 = arith.constant dense<0.000000e+00> : vector<8x384xf32>
    %258 = tpu.matmul %257, %10, %cst_58 {dimension_numbers = #tpu.dot_dimension_numbers<[1], [0], [0], [1], [0, 0, 1, 1], [], []>} : vector<8x128xbf16>, vector<128x384xbf16>, vector<8x384xf32> -> vector<8x384xf32>
    %259 = vector.extract_strided_slice %256 {offsets = [0, 0], sizes = [8, 128], strides = [1, 1]} : vector<8x384xf32> to vector<8x128xf32>
    %260 = vector.extract_strided_slice %258 {offsets = [0, 0], sizes = [8, 128], strides = [1, 1]} : vector<8x384xf32> to vector<8x128xf32>
    %261 = arith.addf %259, %260 : vector<8x128xf32>
    %262 = arith.negf %261 : vector<8x128xf32>
    %263 = math.exp %262 : vector<8x128xf32>
    %cst_59 = arith.constant 1.000000e+00 : f32
    %264 = vector.broadcast %cst_59 : f32 to vector<8x128xf32>
    %265 = arith.addf %264, %263 : vector<8x128xf32>
    %266 = arith.divf %264, %265 : vector<8x128xf32>
    %267 = vector.extract_strided_slice %256 {offsets = [0, 128], sizes = [8, 128], strides = [1, 1]} : vector<8x384xf32> to vector<8x128xf32>
    %268 = vector.extract_strided_slice %258 {offsets = [0, 128], sizes = [8, 128], strides = [1, 1]} : vector<8x384xf32> to vector<8x128xf32>
    %269 = arith.addf %267, %268 : vector<8x128xf32>
    %270 = arith.negf %269 : vector<8x128xf32>
    %271 = math.exp %270 : vector<8x128xf32>
    %cst_60 = arith.constant 1.000000e+00 : f32
    %272 = vector.broadcast %cst_60 : f32 to vector<8x128xf32>
    %273 = arith.addf %272, %271 : vector<8x128xf32>
    %274 = arith.divf %272, %273 : vector<8x128xf32>
    %275 = vector.extract_strided_slice %256 {offsets = [0, 256], sizes = [8, 128], strides = [1, 1]} : vector<8x384xf32> to vector<8x128xf32>
    %276 = vector.extract_strided_slice %258 {offsets = [0, 256], sizes = [8, 128], strides = [1, 1]} : vector<8x384xf32> to vector<8x128xf32>
    %277 = arith.addf %276, %13 : vector<8x128xf32>
    %278 = arith.mulf %266, %277 : vector<8x128xf32>
    %279 = arith.addf %275, %278 : vector<8x128xf32>
    %280 = math.tanh %279 : vector<8x128xf32>
    %281 = arith.subf %249, %280 : vector<8x128xf32>
    %282 = arith.mulf %274, %281 : vector<8x128xf32>
    %283 = arith.addf %280, %282 : vector<8x128xf32>
    %284 = arith.truncf %283 : vector<8x128xf32> to vector<8x128xbf16>
    %285 = arith.index_cast %254 : i32 to index
    %c0_61 = arith.constant 0 : index
    %286 = vector.load %arg6[%285, %c0_61] : memref<64x128xbf16, #tpu.memory_space<vmem>>, vector<8x128xbf16>
    tpu.vector_store %arg6[%285, %c0_61], %284 {strides = array<i32>} : memref<64x128xbf16, #tpu.memory_space<vmem>>, vector<8x128xbf16>,
    %c8_i32_62 = arith.constant 8 : i32
    %c0_63 = arith.constant 0 : index
    %c0_64 = arith.constant 0 : index
    %287 = vector.load %arg7[%c0_63, %c0_64] : memref<8x128xf32, #tpu.memory_space<vmem>>, vector<8x128xf32>
    tpu.vector_store %arg7[%c0_63, %c0_64], %283 {strides = array<i32>} : memref<8x128xf32, #tpu.memory_space<vmem>>, vector<8x128xf32>,
    return
  }
  func.func @transform_0(%arg0: i32) -> (i32, i32) {
    %c0_i32 = arith.constant 0 : i32
    %c0_i32_0 = arith.constant 0 : i32
    return %arg0, %c0_i32 : i32, i32
  }
  func.func @transform_1(%arg0: i32) -> (i32, i32) {
    %c0_i32 = arith.constant 0 : i32
    %c0_i32_0 = arith.constant 0 : i32
    %c0_i32_1 = arith.constant 0 : i32
    return %c0_i32, %c0_i32_0 : i32, i32
  }
  func.func @transform_2(%arg0: i32) -> (i32, i32) {
    %c0_i32 = arith.constant 0 : i32
    %c0_i32_0 = arith.constant 0 : i32
    %c0_i32_1 = arith.constant 0 : i32
    return %c0_i32, %c0_i32_0 : i32, i32
  }
  func.func @transform_3(%arg0: i32) -> (i32, i32) {
    %c0_i32 = arith.constant 0 : i32
    %c0_i32_0 = arith.constant 0 : i32
    %c0_i32_1 = arith.constant 0 : i32
    return %c0_i32, %c0_i32_0 : i32, i32
  }
  func.func @transform_4(%arg0: i32) -> (i32, i32) {
    %c0_i32 = arith.constant 0 : i32
    %c0_i32_0 = arith.constant 0 : i32
    %c0_i32_1 = arith.constant 0 : i32
    return %c0_i32, %c0_i32_0 : i32, i32
  }
  func.func @transform_5(%arg0: i32) -> (i32, i32) {
    %c0_i32 = arith.constant 0 : i32
    %c0_i32_0 = arith.constant 0 : i32
    return %arg0, %c0_i32 : i32, i32
  }
}

module attributes {stable_mosaic.version = 11 : i64} {
  func.func @_fc_kernel(%arg0: i32, %arg1: memref<8x128xf32, #tpu.memory_space<vmem>>, %arg2: memref<128x128xbf16, #tpu.memory_space<vmem>>, %arg3: memref<1x128xf32, #tpu.memory_space<vmem>>, %arg4: memref<8x128xf32, #tpu.memory_space<vmem>>) attributes {dimension_semantics = [#tpu.dimension_semantics<arbitrary>], iteration_bounds = array<i64: 1>, scalar_prefetch = 0 : i64, scratch_operands = 0 : i64, tpu.core_type = #tpu.core_type<tc>, window_params = [{pipeline_mode = #tpu.pipeline_mode<synchronous>, transform_indices = @transform_0, window_bounds = array<i64: 8, 128>}, {pipeline_mode = #tpu.pipeline_mode<synchronous>, transform_indices = @transform_1, window_bounds = array<i64: 128, 128>}, {pipeline_mode = #tpu.pipeline_mode<synchronous>, transform_indices = @transform_2, window_bounds = array<i64: 1, 128>}, {pipeline_mode = #tpu.pipeline_mode<synchronous>, transform_indices = @transform_3, window_bounds = array<i64: 8, 128>}]} {
    %c0 = arith.constant 0 : index
    %c0_0 = arith.constant 0 : index
    %0 = vector.load %arg1[%c0, %c0_0] : memref<8x128xf32, #tpu.memory_space<vmem>>, vector<8x128xf32>
    %1 = arith.truncf %0 : vector<8x128xf32> to vector<8x128xbf16>
    %c0_1 = arith.constant 0 : index
    %c0_2 = arith.constant 0 : index
    %2 = vector.load %arg2[%c0_1, %c0_2] : memref<128x128xbf16, #tpu.memory_space<vmem>>, vector<128x128xbf16>
    %cst = arith.constant dense<0.000000e+00> : vector<8x128xf32>
    %3 = tpu.matmul %1, %2, %cst {dimension_numbers = #tpu.dot_dimension_numbers<[1], [0], [0], [1], [0, 0, 1, 1], [], []>} : vector<8x128xbf16>, vector<128x128xbf16>, vector<8x128xf32> -> vector<8x128xf32>
    %c0_3 = arith.constant 0 : index
    %c0_4 = arith.constant 0 : index
    %4 = vector.load %arg3[%c0_3, %c0_4] : memref<1x128xf32, #tpu.memory_space<vmem>>, vector<1x128xf32>
    %5 = vector.broadcast %4 : vector<1x128xf32> to vector<8x128xf32>
    %6 = arith.addf %3, %5 : vector<8x128xf32>
    %c0_5 = arith.constant 0 : index
    %c0_6 = arith.constant 0 : index
    %7 = vector.load %arg4[%c0_5, %c0_6] : memref<8x128xf32, #tpu.memory_space<vmem>>, vector<8x128xf32>
    tpu.vector_store %arg4[%c0_5, %c0_6], %6 {strides = array<i32>} : memref<8x128xf32, #tpu.memory_space<vmem>>, vector<8x128xf32>,
    return
  }
  func.func @transform_0(%arg0: i32) -> (i32, i32) {
    %c0_i32 = arith.constant 0 : i32
    %c0_i32_0 = arith.constant 0 : i32
    %c0_i32_1 = arith.constant 0 : i32
    return %c0_i32, %c0_i32_0 : i32, i32
  }
  func.func @transform_1(%arg0: i32) -> (i32, i32) {
    %c0_i32 = arith.constant 0 : i32
    %c0_i32_0 = arith.constant 0 : i32
    %c0_i32_1 = arith.constant 0 : i32
    return %c0_i32, %c0_i32_0 : i32, i32
  }
  func.func @transform_2(%arg0: i32) -> (i32, i32) {
    %c0_i32 = arith.constant 0 : i32
    %c0_i32_0 = arith.constant 0 : i32
    %c0_i32_1 = arith.constant 0 : i32
    return %c0_i32, %c0_i32_0 : i32, i32
  }
  func.func @transform_3(%arg0: i32) -> (i32, i32) {
    %c0_i32 = arith.constant 0 : i32
    %c0_i32_0 = arith.constant 0 : i32
    %c0_i32_1 = arith.constant 0 : i32
    return %c0_i32, %c0_i32_0 : i32, i32
  }
}

module attributes {stable_mosaic.version = 11 : i64} {
  func.func @kernel(%arg0: i32, %arg1: memref<64x128xbf16, #tpu.memory_space<vmem>>, %arg2: memref<128x384xbf16, #tpu.memory_space<vmem>>, %arg3: memref<128x384xbf16, #tpu.memory_space<vmem>>, %arg4: memref<1x384xf32, #tpu.memory_space<vmem>>, %arg5: memref<1x128xf32, #tpu.memory_space<vmem>>, %arg6: memref<8x128xf32, #tpu.memory_space<vmem>>, %arg7: memref<8x128xf32, #tpu.memory_space<vmem>>, %arg8: memref<64x384xf32, #tpu.memory_space<vmem>>) attributes {dimension_semantics = [#tpu.dimension_semantics<arbitrary>], iteration_bounds = array<i64: 1>, scalar_prefetch = 0 : i64, scratch_operands = 2 : i64, tpu.core_type = #tpu.core_type<tc>, window_params = [{transform_indices = @transform_0, window_bounds = array<i64: 64, 128>}, {pipeline_mode = #tpu.pipeline_mode<synchronous>, transform_indices = @transform_1, window_bounds = array<i64: 128, 384>}, {pipeline_mode = #tpu.pipeline_mode<synchronous>, transform_indices = @transform_2, window_bounds = array<i64: 128, 384>}, {pipeline_mode = #tpu.pipeline_mode<synchronous>, transform_indices = @transform_3, window_bounds = array<i64: 1, 384>}, {pipeline_mode = #tpu.pipeline_mode<synchronous>, transform_indices = @transform_4, window_bounds = array<i64: 1, 128>}, {pipeline_mode = #tpu.pipeline_mode<synchronous>, transform_indices = @transform_5, window_bounds = array<i64: 8, 128>}]} {
    %c0_i32 = arith.constant 0 : i32
    %0 = arith.cmpi eq, %arg0, %c0_i32 : i32
    %1 = arith.extui %0 : i1 to i32
    %c0_i32_0 = arith.constant 0 : i32
    %2 = arith.cmpi ne, %1, %c0_i32_0 : i32
    scf.if %2 {
      %cst_59 = arith.constant 0.000000e+00 : f32
      %265 = vector.broadcast %cst_59 : f32 to vector<8x128xf32>
      %c0_60 = arith.constant 0 : index
      %c0_61 = arith.constant 0 : index
      %266 = vector.load %arg7[%c0_60, %c0_61] : memref<8x128xf32, #tpu.memory_space<vmem>>, vector<8x128xf32>
      tpu.vector_store %arg7[%c0_60, %c0_61], %265 {strides = array<i32>} : memref<8x128xf32, #tpu.memory_space<vmem>>, vector<8x128xf32>,
    } else {
    }
    %c0 = arith.constant 0 : index
    %c0_1 = arith.constant 0 : index
    %3 = vector.load %arg1[%c0, %c0_1] : memref<64x128xbf16, #tpu.memory_space<vmem>>, vector<64x128xbf16>
    %c0_2 = arith.constant 0 : index
    %c0_3 = arith.constant 0 : index
    %4 = vector.load %arg2[%c0_2, %c0_3] : memref<128x384xbf16, #tpu.memory_space<vmem>>, vector<128x384xbf16>
    %cst = arith.constant dense<0.000000e+00> : vector<64x384xf32>
    %5 = tpu.matmul %3, %4, %cst {dimension_numbers = #tpu.dot_dimension_numbers<[1], [0], [0], [1], [0, 0, 1, 1], [], []>} : vector<64x128xbf16>, vector<128x384xbf16>, vector<64x384xf32> -> vector<64x384xf32>
    %c0_4 = arith.constant 0 : index
    %c0_5 = arith.constant 0 : index
    %6 = vector.load %arg4[%c0_4, %c0_5] : memref<1x384xf32, #tpu.memory_space<vmem>>, vector<1x384xf32>
    %7 = vector.broadcast %6 : vector<1x384xf32> to vector<64x384xf32>
    %8 = arith.addf %5, %7 : vector<64x384xf32>
    %c0_6 = arith.constant 0 : index
    %c0_7 = arith.constant 0 : index
    %9 = vector.load %arg8[%c0_6, %c0_7] : memref<64x384xf32, #tpu.memory_space<vmem>>, vector<64x384xf32>
    tpu.vector_store %arg8[%c0_6, %c0_7], %8 {strides = array<i32>} : memref<64x384xf32, #tpu.memory_space<vmem>>, vector<64x384xf32>,
    %c0_8 = arith.constant 0 : index
    %c0_9 = arith.constant 0 : index
    %10 = vector.load %arg3[%c0_8, %c0_9] : memref<128x384xbf16, #tpu.memory_space<vmem>>, vector<128x384xbf16>
    %c0_10 = arith.constant 0 : index
    %c0_11 = arith.constant 0 : index
    %11 = vector.load %arg5[%c0_10, %c0_11] : memref<1x128xf32, #tpu.memory_space<vmem>>, vector<1x128xf32>
    %12 = vector.shape_cast %11 : vector<1x128xf32> to vector<1x128xf32>
    %13 = vector.broadcast %12 : vector<1x128xf32> to vector<8x128xf32>
    %c0_12 = arith.constant 0 : index
    %c0_13 = arith.constant 0 : index
    %14 = vector.load %arg7[%c0_12, %c0_13] : memref<8x128xf32, #tpu.memory_space<vmem>>, vector<8x128xf32>
    %c0_i32_14 = arith.constant 0 : i32
    %c8_i32 = arith.constant 8 : i32
    %15 = arith.muli %c0_i32_14, %c8_i32 : i32
    %16 = tpu.assume_multiple %15, 8 : i32
    %17 = arith.index_cast %16 : i32 to index
    %c0_15 = arith.constant 0 : index
    %18 = vector.load %arg8[%17, %c0_15] : memref<64x384xf32, #tpu.memory_space<vmem>>, vector<8x384xf32>
    %19 = arith.truncf %14 : vector<8x128xf32> to vector<8x128xbf16>
    %cst_16 = arith.constant dense<0.000000e+00> : vector<8x384xf32>
    %20 = tpu.matmul %19, %10, %cst_16 {dimension_numbers = #tpu.dot_dimension_numbers<[1], [0], [0], [1], [0, 0, 1, 1], [], []>} : vector<8x128xbf16>, vector<128x384xbf16>, vector<8x384xf32> -> vector<8x384xf32>
    %21 = vector.extract_strided_slice %18 {offsets = [0, 0], sizes = [8, 128], strides = [1, 1]} : vector<8x384xf32> to vector<8x128xf32>
    %22 = vector.extract_strided_slice %20 {offsets = [0, 0], sizes = [8, 128], strides = [1, 1]} : vector<8x384xf32> to vector<8x128xf32>
    %23 = arith.addf %21, %22 : vector<8x128xf32>
    %24 = arith.negf %23 : vector<8x128xf32>
    %25 = math.exp %24 : vector<8x128xf32>
    %cst_17 = arith.constant 1.000000e+00 : f32
    %26 = vector.broadcast %cst_17 : f32 to vector<8x128xf32>
    %27 = arith.addf %26, %25 : vector<8x128xf32>
    %28 = arith.divf %26, %27 : vector<8x128xf32>
    %29 = vector.extract_strided_slice %18 {offsets = [0, 128], sizes = [8, 128], strides = [1, 1]} : vector<8x384xf32> to vector<8x128xf32>
    %30 = vector.extract_strided_slice %20 {offsets = [0, 128], sizes = [8, 128], strides = [1, 1]} : vector<8x384xf32> to vector<8x128xf32>
    %31 = arith.addf %29, %30 : vector<8x128xf32>
    %32 = arith.negf %31 : vector<8x128xf32>
    %33 = math.exp %32 : vector<8x128xf32>
    %cst_18 = arith.constant 1.000000e+00 : f32
    %34 = vector.broadcast %cst_18 : f32 to vector<8x128xf32>
    %35 = arith.addf %34, %33 : vector<8x128xf32>
    %36 = arith.divf %34, %35 : vector<8x128xf32>
    %37 = vector.extract_strided_slice %18 {offsets = [0, 256], sizes = [8, 128], strides = [1, 1]} : vector<8x384xf32> to vector<8x128xf32>
    %38 = vector.extract_strided_slice %20 {offsets = [0, 256], sizes = [8, 128], strides = [1, 1]} : vector<8x384xf32> to vector<8x128xf32>
    %39 = arith.addf %38, %13 : vector<8x128xf32>
    %40 = arith.mulf %28, %39 : vector<8x128xf32>
    %41 = arith.addf %37, %40 : vector<8x128xf32>
    %42 = math.tanh %41 : vector<8x128xf32>
    %43 = arith.subf %14, %42 : vector<8x128xf32>
    %44 = arith.mulf %36, %43 : vector<8x128xf32>
    %45 = arith.addf %42, %44 : vector<8x128xf32>
    %c1_i32 = arith.constant 1 : i32
    %c8_i32_19 = arith.constant 8 : i32
    %46 = arith.muli %c1_i32, %c8_i32_19 : i32
    %47 = tpu.assume_multiple %46, 8 : i32
    %48 = arith.index_cast %47 : i32 to index
    %c0_20 = arith.constant 0 : index
    %49 = vector.load %arg8[%48, %c0_20] : memref<64x384xf32, #tpu.memory_space<vmem>>, vector<8x384xf32>
    %50 = arith.truncf %45 : vector<8x128xf32> to vector<8x128xbf16>
    %cst_21 = arith.constant dense<0.000000e+00> : vector<8x384xf32>
    %51 = tpu.matmul %50, %10, %cst_21 {dimension_numbers = #tpu.dot_dimension_numbers<[1], [0], [0], [1], [0, 0, 1, 1], [], []>} : vector<8x128xbf16>, vector<128x384xbf16>, vector<8x384xf32> -> vector<8x384xf32>
    %52 = vector.extract_strided_slice %49 {offsets = [0, 0], sizes = [8, 128], strides = [1, 1]} : vector<8x384xf32> to vector<8x128xf32>
    %53 = vector.extract_strided_slice %51 {offsets = [0, 0], sizes = [8, 128], strides = [1, 1]} : vector<8x384xf32> to vector<8x128xf32>
    %54 = arith.addf %52, %53 : vector<8x128xf32>
    %55 = arith.negf %54 : vector<8x128xf32>
    %56 = math.exp %55 : vector<8x128xf32>
    %cst_22 = arith.constant 1.000000e+00 : f32
    %57 = vector.broadcast %cst_22 : f32 to vector<8x128xf32>
    %58 = arith.addf %57, %56 : vector<8x128xf32>
    %59 = arith.divf %57, %58 : vector<8x128xf32>
    %60 = vector.extract_strided_slice %49 {offsets = [0, 128], sizes = [8, 128], strides = [1, 1]} : vector<8x384xf32> to vector<8x128xf32>
    %61 = vector.extract_strided_slice %51 {offsets = [0, 128], sizes = [8, 128], strides = [1, 1]} : vector<8x384xf32> to vector<8x128xf32>
    %62 = arith.addf %60, %61 : vector<8x128xf32>
    %63 = arith.negf %62 : vector<8x128xf32>
    %64 = math.exp %63 : vector<8x128xf32>
    %cst_23 = arith.constant 1.000000e+00 : f32
    %65 = vector.broadcast %cst_23 : f32 to vector<8x128xf32>
    %66 = arith.addf %65, %64 : vector<8x128xf32>
    %67 = arith.divf %65, %66 : vector<8x128xf32>
    %68 = vector.extract_strided_slice %49 {offsets = [0, 256], sizes = [8, 128], strides = [1, 1]} : vector<8x384xf32> to vector<8x128xf32>
    %69 = vector.extract_strided_slice %51 {offsets = [0, 256], sizes = [8, 128], strides = [1, 1]} : vector<8x384xf32> to vector<8x128xf32>
    %70 = arith.addf %69, %13 : vector<8x128xf32>
    %71 = arith.mulf %59, %70 : vector<8x128xf32>
    %72 = arith.addf %68, %71 : vector<8x128xf32>
    %73 = math.tanh %72 : vector<8x128xf32>
    %74 = arith.subf %45, %73 : vector<8x128xf32>
    %75 = arith.mulf %67, %74 : vector<8x128xf32>
    %76 = arith.addf %73, %75 : vector<8x128xf32>
    %c2_i32 = arith.constant 2 : i32
    %c8_i32_24 = arith.constant 8 : i32
    %77 = arith.muli %c2_i32, %c8_i32_24 : i32
    %78 = tpu.assume_multiple %77, 8 : i32
    %79 = arith.index_cast %78 : i32 to index
    %c0_25 = arith.constant 0 : index
    %80 = vector.load %arg8[%79, %c0_25] : memref<64x384xf32, #tpu.memory_space<vmem>>, vector<8x384xf32>
    %81 = arith.truncf %76 : vector<8x128xf32> to vector<8x128xbf16>
    %cst_26 = arith.constant dense<0.000000e+00> : vector<8x384xf32>
    %82 = tpu.matmul %81, %10, %cst_26 {dimension_numbers = #tpu.dot_dimension_numbers<[1], [0], [0], [1], [0, 0, 1, 1], [], []>} : vector<8x128xbf16>, vector<128x384xbf16>, vector<8x384xf32> -> vector<8x384xf32>
    %83 = vector.extract_strided_slice %80 {offsets = [0, 0], sizes = [8, 128], strides = [1, 1]} : vector<8x384xf32> to vector<8x128xf32>
    %84 = vector.extract_strided_slice %82 {offsets = [0, 0], sizes = [8, 128], strides = [1, 1]} : vector<8x384xf32> to vector<8x128xf32>
    %85 = arith.addf %83, %84 : vector<8x128xf32>
    %86 = arith.negf %85 : vector<8x128xf32>
    %87 = math.exp %86 : vector<8x128xf32>
    %cst_27 = arith.constant 1.000000e+00 : f32
    %88 = vector.broadcast %cst_27 : f32 to vector<8x128xf32>
    %89 = arith.addf %88, %87 : vector<8x128xf32>
    %90 = arith.divf %88, %89 : vector<8x128xf32>
    %91 = vector.extract_strided_slice %80 {offsets = [0, 128], sizes = [8, 128], strides = [1, 1]} : vector<8x384xf32> to vector<8x128xf32>
    %92 = vector.extract_strided_slice %82 {offsets = [0, 128], sizes = [8, 128], strides = [1, 1]} : vector<8x384xf32> to vector<8x128xf32>
    %93 = arith.addf %91, %92 : vector<8x128xf32>
    %94 = arith.negf %93 : vector<8x128xf32>
    %95 = math.exp %94 : vector<8x128xf32>
    %cst_28 = arith.constant 1.000000e+00 : f32
    %96 = vector.broadcast %cst_28 : f32 to vector<8x128xf32>
    %97 = arith.addf %96, %95 : vector<8x128xf32>
    %98 = arith.divf %96, %97 : vector<8x128xf32>
    %99 = vector.extract_strided_slice %80 {offsets = [0, 256], sizes = [8, 128], strides = [1, 1]} : vector<8x384xf32> to vector<8x128xf32>
    %100 = vector.extract_strided_slice %82 {offsets = [0, 256], sizes = [8, 128], strides = [1, 1]} : vector<8x384xf32> to vector<8x128xf32>
    %101 = arith.addf %100, %13 : vector<8x128xf32>
    %102 = arith.mulf %90, %101 : vector<8x128xf32>
    %103 = arith.addf %99, %102 : vector<8x128xf32>
    %104 = math.tanh %103 : vector<8x128xf32>
    %105 = arith.subf %76, %104 : vector<8x128xf32>
    %106 = arith.mulf %98, %105 : vector<8x128xf32>
    %107 = arith.addf %104, %106 : vector<8x128xf32>
    %c3_i32 = arith.constant 3 : i32
    %c8_i32_29 = arith.constant 8 : i32
    %108 = arith.muli %c3_i32, %c8_i32_29 : i32
    %109 = tpu.assume_multiple %108, 8 : i32
    %110 = arith.index_cast %109 : i32 to index
    %c0_30 = arith.constant 0 : index
    %111 = vector.load %arg8[%110, %c0_30] : memref<64x384xf32, #tpu.memory_space<vmem>>, vector<8x384xf32>
    %112 = arith.truncf %107 : vector<8x128xf32> to vector<8x128xbf16>
    %cst_31 = arith.constant dense<0.000000e+00> : vector<8x384xf32>
    %113 = tpu.matmul %112, %10, %cst_31 {dimension_numbers = #tpu.dot_dimension_numbers<[1], [0], [0], [1], [0, 0, 1, 1], [], []>} : vector<8x128xbf16>, vector<128x384xbf16>, vector<8x384xf32> -> vector<8x384xf32>
    %114 = vector.extract_strided_slice %111 {offsets = [0, 0], sizes = [8, 128], strides = [1, 1]} : vector<8x384xf32> to vector<8x128xf32>
    %115 = vector.extract_strided_slice %113 {offsets = [0, 0], sizes = [8, 128], strides = [1, 1]} : vector<8x384xf32> to vector<8x128xf32>
    %116 = arith.addf %114, %115 : vector<8x128xf32>
    %117 = arith.negf %116 : vector<8x128xf32>
    %118 = math.exp %117 : vector<8x128xf32>
    %cst_32 = arith.constant 1.000000e+00 : f32
    %119 = vector.broadcast %cst_32 : f32 to vector<8x128xf32>
    %120 = arith.addf %119, %118 : vector<8x128xf32>
    %121 = arith.divf %119, %120 : vector<8x128xf32>
    %122 = vector.extract_strided_slice %111 {offsets = [0, 128], sizes = [8, 128], strides = [1, 1]} : vector<8x384xf32> to vector<8x128xf32>
    %123 = vector.extract_strided_slice %113 {offsets = [0, 128], sizes = [8, 128], strides = [1, 1]} : vector<8x384xf32> to vector<8x128xf32>
    %124 = arith.addf %122, %123 : vector<8x128xf32>
    %125 = arith.negf %124 : vector<8x128xf32>
    %126 = math.exp %125 : vector<8x128xf32>
    %cst_33 = arith.constant 1.000000e+00 : f32
    %127 = vector.broadcast %cst_33 : f32 to vector<8x128xf32>
    %128 = arith.addf %127, %126 : vector<8x128xf32>
    %129 = arith.divf %127, %128 : vector<8x128xf32>
    %130 = vector.extract_strided_slice %111 {offsets = [0, 256], sizes = [8, 128], strides = [1, 1]} : vector<8x384xf32> to vector<8x128xf32>
    %131 = vector.extract_strided_slice %113 {offsets = [0, 256], sizes = [8, 128], strides = [1, 1]} : vector<8x384xf32> to vector<8x128xf32>
    %132 = arith.addf %131, %13 : vector<8x128xf32>
    %133 = arith.mulf %121, %132 : vector<8x128xf32>
    %134 = arith.addf %130, %133 : vector<8x128xf32>
    %135 = math.tanh %134 : vector<8x128xf32>
    %136 = arith.subf %107, %135 : vector<8x128xf32>
    %137 = arith.mulf %129, %136 : vector<8x128xf32>
    %138 = arith.addf %135, %137 : vector<8x128xf32>
    %c4_i32 = arith.constant 4 : i32
    %c8_i32_34 = arith.constant 8 : i32
    %139 = arith.muli %c4_i32, %c8_i32_34 : i32
    %140 = tpu.assume_multiple %139, 8 : i32
    %141 = arith.index_cast %140 : i32 to index
    %c0_35 = arith.constant 0 : index
    %142 = vector.load %arg8[%141, %c0_35] : memref<64x384xf32, #tpu.memory_space<vmem>>, vector<8x384xf32>
    %143 = arith.truncf %138 : vector<8x128xf32> to vector<8x128xbf16>
    %cst_36 = arith.constant dense<0.000000e+00> : vector<8x384xf32>
    %144 = tpu.matmul %143, %10, %cst_36 {dimension_numbers = #tpu.dot_dimension_numbers<[1], [0], [0], [1], [0, 0, 1, 1], [], []>} : vector<8x128xbf16>, vector<128x384xbf16>, vector<8x384xf32> -> vector<8x384xf32>
    %145 = vector.extract_strided_slice %142 {offsets = [0, 0], sizes = [8, 128], strides = [1, 1]} : vector<8x384xf32> to vector<8x128xf32>
    %146 = vector.extract_strided_slice %144 {offsets = [0, 0], sizes = [8, 128], strides = [1, 1]} : vector<8x384xf32> to vector<8x128xf32>
    %147 = arith.addf %145, %146 : vector<8x128xf32>
    %148 = arith.negf %147 : vector<8x128xf32>
    %149 = math.exp %148 : vector<8x128xf32>
    %cst_37 = arith.constant 1.000000e+00 : f32
    %150 = vector.broadcast %cst_37 : f32 to vector<8x128xf32>
    %151 = arith.addf %150, %149 : vector<8x128xf32>
    %152 = arith.divf %150, %151 : vector<8x128xf32>
    %153 = vector.extract_strided_slice %142 {offsets = [0, 128], sizes = [8, 128], strides = [1, 1]} : vector<8x384xf32> to vector<8x128xf32>
    %154 = vector.extract_strided_slice %144 {offsets = [0, 128], sizes = [8, 128], strides = [1, 1]} : vector<8x384xf32> to vector<8x128xf32>
    %155 = arith.addf %153, %154 : vector<8x128xf32>
    %156 = arith.negf %155 : vector<8x128xf32>
    %157 = math.exp %156 : vector<8x128xf32>
    %cst_38 = arith.constant 1.000000e+00 : f32
    %158 = vector.broadcast %cst_38 : f32 to vector<8x128xf32>
    %159 = arith.addf %158, %157 : vector<8x128xf32>
    %160 = arith.divf %158, %159 : vector<8x128xf32>
    %161 = vector.extract_strided_slice %142 {offsets = [0, 256], sizes = [8, 128], strides = [1, 1]} : vector<8x384xf32> to vector<8x128xf32>
    %162 = vector.extract_strided_slice %144 {offsets = [0, 256], sizes = [8, 128], strides = [1, 1]} : vector<8x384xf32> to vector<8x128xf32>
    %163 = arith.addf %162, %13 : vector<8x128xf32>
    %164 = arith.mulf %152, %163 : vector<8x128xf32>
    %165 = arith.addf %161, %164 : vector<8x128xf32>
    %166 = math.tanh %165 : vector<8x128xf32>
    %167 = arith.subf %138, %166 : vector<8x128xf32>
    %168 = arith.mulf %160, %167 : vector<8x128xf32>
    %169 = arith.addf %166, %168 : vector<8x128xf32>
    %c5_i32 = arith.constant 5 : i32
    %c8_i32_39 = arith.constant 8 : i32
    %170 = arith.muli %c5_i32, %c8_i32_39 : i32
    %171 = tpu.assume_multiple %170, 8 : i32
    %172 = arith.index_cast %171 : i32 to index
    %c0_40 = arith.constant 0 : index
    %173 = vector.load %arg8[%172, %c0_40] : memref<64x384xf32, #tpu.memory_space<vmem>>, vector<8x384xf32>
    %174 = arith.truncf %169 : vector<8x128xf32> to vector<8x128xbf16>
    %cst_41 = arith.constant dense<0.000000e+00> : vector<8x384xf32>
    %175 = tpu.matmul %174, %10, %cst_41 {dimension_numbers = #tpu.dot_dimension_numbers<[1], [0], [0], [1], [0, 0, 1, 1], [], []>} : vector<8x128xbf16>, vector<128x384xbf16>, vector<8x384xf32> -> vector<8x384xf32>
    %176 = vector.extract_strided_slice %173 {offsets = [0, 0], sizes = [8, 128], strides = [1, 1]} : vector<8x384xf32> to vector<8x128xf32>
    %177 = vector.extract_strided_slice %175 {offsets = [0, 0], sizes = [8, 128], strides = [1, 1]} : vector<8x384xf32> to vector<8x128xf32>
    %178 = arith.addf %176, %177 : vector<8x128xf32>
    %179 = arith.negf %178 : vector<8x128xf32>
    %180 = math.exp %179 : vector<8x128xf32>
    %cst_42 = arith.constant 1.000000e+00 : f32
    %181 = vector.broadcast %cst_42 : f32 to vector<8x128xf32>
    %182 = arith.addf %181, %180 : vector<8x128xf32>
    %183 = arith.divf %181, %182 : vector<8x128xf32>
    %184 = vector.extract_strided_slice %173 {offsets = [0, 128], sizes = [8, 128], strides = [1, 1]} : vector<8x384xf32> to vector<8x128xf32>
    %185 = vector.extract_strided_slice %175 {offsets = [0, 128], sizes = [8, 128], strides = [1, 1]} : vector<8x384xf32> to vector<8x128xf32>
    %186 = arith.addf %184, %185 : vector<8x128xf32>
    %187 = arith.negf %186 : vector<8x128xf32>
    %188 = math.exp %187 : vector<8x128xf32>
    %cst_43 = arith.constant 1.000000e+00 : f32
    %189 = vector.broadcast %cst_43 : f32 to vector<8x128xf32>
    %190 = arith.addf %189, %188 : vector<8x128xf32>
    %191 = arith.divf %189, %190 : vector<8x128xf32>
    %192 = vector.extract_strided_slice %173 {offsets = [0, 256], sizes = [8, 128], strides = [1, 1]} : vector<8x384xf32> to vector<8x128xf32>
    %193 = vector.extract_strided_slice %175 {offsets = [0, 256], sizes = [8, 128], strides = [1, 1]} : vector<8x384xf32> to vector<8x128xf32>
    %194 = arith.addf %193, %13 : vector<8x128xf32>
    %195 = arith.mulf %183, %194 : vector<8x128xf32>
    %196 = arith.addf %192, %195 : vector<8x128xf32>
    %197 = math.tanh %196 : vector<8x128xf32>
    %198 = arith.subf %169, %197 : vector<8x128xf32>
    %199 = arith.mulf %191, %198 : vector<8x128xf32>
    %200 = arith.addf %197, %199 : vector<8x128xf32>
    %c6_i32 = arith.constant 6 : i32
    %c8_i32_44 = arith.constant 8 : i32
    %201 = arith.muli %c6_i32, %c8_i32_44 : i32
    %202 = tpu.assume_multiple %201, 8 : i32
    %203 = arith.index_cast %202 : i32 to index
    %c0_45 = arith.constant 0 : index
    %204 = vector.load %arg8[%203, %c0_45] : memref<64x384xf32, #tpu.memory_space<vmem>>, vector<8x384xf32>
    %205 = arith.truncf %200 : vector<8x128xf32> to vector<8x128xbf16>
    %cst_46 = arith.constant dense<0.000000e+00> : vector<8x384xf32>
    %206 = tpu.matmul %205, %10, %cst_46 {dimension_numbers = #tpu.dot_dimension_numbers<[1], [0], [0], [1], [0, 0, 1, 1], [], []>} : vector<8x128xbf16>, vector<128x384xbf16>, vector<8x384xf32> -> vector<8x384xf32>
    %207 = vector.extract_strided_slice %204 {offsets = [0, 0], sizes = [8, 128], strides = [1, 1]} : vector<8x384xf32> to vector<8x128xf32>
    %208 = vector.extract_strided_slice %206 {offsets = [0, 0], sizes = [8, 128], strides = [1, 1]} : vector<8x384xf32> to vector<8x128xf32>
    %209 = arith.addf %207, %208 : vector<8x128xf32>
    %210 = arith.negf %209 : vector<8x128xf32>
    %211 = math.exp %210 : vector<8x128xf32>
    %cst_47 = arith.constant 1.000000e+00 : f32
    %212 = vector.broadcast %cst_47 : f32 to vector<8x128xf32>
    %213 = arith.addf %212, %211 : vector<8x128xf32>
    %214 = arith.divf %212, %213 : vector<8x128xf32>
    %215 = vector.extract_strided_slice %204 {offsets = [0, 128], sizes = [8, 128], strides = [1, 1]} : vector<8x384xf32> to vector<8x128xf32>
    %216 = vector.extract_strided_slice %206 {offsets = [0, 128], sizes = [8, 128], strides = [1, 1]} : vector<8x384xf32> to vector<8x128xf32>
    %217 = arith.addf %215, %216 : vector<8x128xf32>
    %218 = arith.negf %217 : vector<8x128xf32>
    %219 = math.exp %218 : vector<8x128xf32>
    %cst_48 = arith.constant 1.000000e+00 : f32
    %220 = vector.broadcast %cst_48 : f32 to vector<8x128xf32>
    %221 = arith.addf %220, %219 : vector<8x128xf32>
    %222 = arith.divf %220, %221 : vector<8x128xf32>
    %223 = vector.extract_strided_slice %204 {offsets = [0, 256], sizes = [8, 128], strides = [1, 1]} : vector<8x384xf32> to vector<8x128xf32>
    %224 = vector.extract_strided_slice %206 {offsets = [0, 256], sizes = [8, 128], strides = [1, 1]} : vector<8x384xf32> to vector<8x128xf32>
    %225 = arith.addf %224, %13 : vector<8x128xf32>
    %226 = arith.mulf %214, %225 : vector<8x128xf32>
    %227 = arith.addf %223, %226 : vector<8x128xf32>
    %228 = math.tanh %227 : vector<8x128xf32>
    %229 = arith.subf %200, %228 : vector<8x128xf32>
    %230 = arith.mulf %222, %229 : vector<8x128xf32>
    %231 = arith.addf %228, %230 : vector<8x128xf32>
    %c7_i32 = arith.constant 7 : i32
    %c8_i32_49 = arith.constant 8 : i32
    %232 = arith.muli %c7_i32, %c8_i32_49 : i32
    %233 = tpu.assume_multiple %232, 8 : i32
    %234 = arith.index_cast %233 : i32 to index
    %c0_50 = arith.constant 0 : index
    %235 = vector.load %arg8[%234, %c0_50] : memref<64x384xf32, #tpu.memory_space<vmem>>, vector<8x384xf32>
    %236 = arith.truncf %231 : vector<8x128xf32> to vector<8x128xbf16>
    %cst_51 = arith.constant dense<0.000000e+00> : vector<8x384xf32>
    %237 = tpu.matmul %236, %10, %cst_51 {dimension_numbers = #tpu.dot_dimension_numbers<[1], [0], [0], [1], [0, 0, 1, 1], [], []>} : vector<8x128xbf16>, vector<128x384xbf16>, vector<8x384xf32> -> vector<8x384xf32>
    %238 = vector.extract_strided_slice %235 {offsets = [0, 0], sizes = [8, 128], strides = [1, 1]} : vector<8x384xf32> to vector<8x128xf32>
    %239 = vector.extract_strided_slice %237 {offsets = [0, 0], sizes = [8, 128], strides = [1, 1]} : vector<8x384xf32> to vector<8x128xf32>
    %240 = arith.addf %238, %239 : vector<8x128xf32>
    %241 = arith.negf %240 : vector<8x128xf32>
    %242 = math.exp %241 : vector<8x128xf32>
    %cst_52 = arith.constant 1.000000e+00 : f32
    %243 = vector.broadcast %cst_52 : f32 to vector<8x128xf32>
    %244 = arith.addf %243, %242 : vector<8x128xf32>
    %245 = arith.divf %243, %244 : vector<8x128xf32>
    %246 = vector.extract_strided_slice %235 {offsets = [0, 128], sizes = [8, 128], strides = [1, 1]} : vector<8x384xf32> to vector<8x128xf32>
    %247 = vector.extract_strided_slice %237 {offsets = [0, 128], sizes = [8, 128], strides = [1, 1]} : vector<8x384xf32> to vector<8x128xf32>
    %248 = arith.addf %246, %247 : vector<8x128xf32>
    %249 = arith.negf %248 : vector<8x128xf32>
    %250 = math.exp %249 : vector<8x128xf32>
    %cst_53 = arith.constant 1.000000e+00 : f32
    %251 = vector.broadcast %cst_53 : f32 to vector<8x128xf32>
    %252 = arith.addf %251, %250 : vector<8x128xf32>
    %253 = arith.divf %251, %252 : vector<8x128xf32>
    %254 = vector.extract_strided_slice %235 {offsets = [0, 256], sizes = [8, 128], strides = [1, 1]} : vector<8x384xf32> to vector<8x128xf32>
    %255 = vector.extract_strided_slice %237 {offsets = [0, 256], sizes = [8, 128], strides = [1, 1]} : vector<8x384xf32> to vector<8x128xf32>
    %256 = arith.addf %255, %13 : vector<8x128xf32>
    %257 = arith.mulf %245, %256 : vector<8x128xf32>
    %258 = arith.addf %254, %257 : vector<8x128xf32>
    %259 = math.tanh %258 : vector<8x128xf32>
    %260 = arith.subf %231, %259 : vector<8x128xf32>
    %261 = arith.mulf %253, %260 : vector<8x128xf32>
    %262 = arith.addf %259, %261 : vector<8x128xf32>
    %c8_i32_54 = arith.constant 8 : i32
    %c0_55 = arith.constant 0 : index
    %c0_56 = arith.constant 0 : index
    %263 = vector.load %arg7[%c0_55, %c0_56] : memref<8x128xf32, #tpu.memory_space<vmem>>, vector<8x128xf32>
    tpu.vector_store %arg7[%c0_55, %c0_56], %262 {strides = array<i32>} : memref<8x128xf32, #tpu.memory_space<vmem>>, vector<8x128xf32>,
    %c0_57 = arith.constant 0 : index
    %c0_58 = arith.constant 0 : index
    %264 = vector.load %arg6[%c0_57, %c0_58] : memref<8x128xf32, #tpu.memory_space<vmem>>, vector<8x128xf32>
    tpu.vector_store %arg6[%c0_57, %c0_58], %262 {strides = array<i32>} : memref<8x128xf32, #tpu.memory_space<vmem>>, vector<8x128xf32>,
    return
  }
  func.func @transform_0(%arg0: i32) -> (i32, i32) {
    %c0_i32 = arith.constant 0 : i32
    %c0_i32_0 = arith.constant 0 : i32
    return %arg0, %c0_i32 : i32, i32
  }
  func.func @transform_1(%arg0: i32) -> (i32, i32) {
    %c0_i32 = arith.constant 0 : i32
    %c0_i32_0 = arith.constant 0 : i32
    %c0_i32_1 = arith.constant 0 : i32
    return %c0_i32, %c0_i32_0 : i32, i32
  }
  func.func @transform_2(%arg0: i32) -> (i32, i32) {
    %c0_i32 = arith.constant 0 : i32
    %c0_i32_0 = arith.constant 0 : i32
    %c0_i32_1 = arith.constant 0 : i32
    return %c0_i32, %c0_i32_0 : i32, i32
  }
  func.func @transform_3(%arg0: i32) -> (i32, i32) {
    %c0_i32 = arith.constant 0 : i32
    %c0_i32_0 = arith.constant 0 : i32
    %c0_i32_1 = arith.constant 0 : i32
    return %c0_i32, %c0_i32_0 : i32, i32
  }
  func.func @transform_4(%arg0: i32) -> (i32, i32) {
    %c0_i32 = arith.constant 0 : i32
    %c0_i32_0 = arith.constant 0 : i32
    %c0_i32_1 = arith.constant 0 : i32
    return %c0_i32, %c0_i32_0 : i32, i32
  }
  func.func @transform_5(%arg0: i32) -> (i32, i32) {
    %c0_i32 = arith.constant 0 : i32
    %c0_i32_0 = arith.constant 0 : i32
    %c0_i32_1 = arith.constant 0 : i32
    return %c0_i32, %c0_i32_0 : i32, i32
  }
}

</mosaic_0001>

<bundles_post_ra>
// kernel: gru_forward.5
= control target key start
LH: loop header
LB: loop body
LE: loop exit
PB: predicated region body
PF: predicated region fallthrough
CT: control target
= control target key end

     0   :  { %v181_v0 = vmov 0.0   ;;  %vm182_vm0 = vmmov 0   ;;  %s236_s1 = inlined_call_operand.vmem [shape: bf16[128,128], index: 1, kind: input, shape index: {}]   ;;  %s237_s0 = inlined_call_operand.vmem [shape: f32[8,128], index: 0, kind: input, shape index: {}]   ;;  %s238_s2 = inlined_call_operand.vmem [shape: f32[1,128], index: 2, kind: input, shape index: {}]   ;;  %s239_s3 = inlined_call_operand.vmem [shape: f32[8,128], index: 3, kind: output, shape index: {}]  }
   0x1   :  { %151 = vmatprep.subr.bf16.mxu0 %v181_v0  ;;  %v173_v1 = vld [vmem:[%s236_s1 + $0x38] sm:$0xff]   ;;  %167 = vmatprep.mubr.msk.bf16.mxu0 %vm182_vm0, %v181_v0  ;;  %v174_v2 = vld [vmem:[%s236_s1 + $0x30] sm:$0xff]   ;;  %v175_v3 = vld [vmem:[%s236_s1 + $0x28] sm:$0xff]  }
   0x2   :  { %152 = vmatpush3.bf16.msra.mxu0 %v173_v1  ;;  %v176_v4 = vld [vmem:[%s236_s1 + $0x20] sm:$0xff]   ;;  %v177_v5 = vld [vmem:[%s236_s1 + $0x18] sm:$0xff]   ;;  %v178_v6 = vld [vmem:[%s236_s1 + $0x10] sm:$0xff]  }
   0x3   :  { %153 = vmatprep.subr.bf16.mxu0 %v181_v0  ;;  %v179_v7 = vld [vmem:[%s236_s1 + $0x8] sm:$0xff]   ;;  %v180_v8 = vld [vmem:[%s236_s1] sm:$0xff]  }
   0x4   :  { %v15_v9 = vld [vmem:[%s237_s0] sm:$0xff] }
   0x5   :  { %v16_v10 = vpack.c.bf16 %v15_v9, %v15_v9  ;;  %v133_v11 = vld [vmem:[%s238_s2] ss:$0 sm:$0xff] }
   0x6   :  { %154 = vmatpush3.bf16.msra.mxu0 %v174_v2 }
   0x7   :  { %155 = vmatprep.subr.bf16.mxu0 %v181_v0 }
   0xa   :  { %156 = vmatpush3.bf16.msra.mxu0 %v175_v3 }
   0xb   :  { %157 = vmatprep.subr.bf16.mxu0 %v181_v0 }
   0xe   :  { %158 = vmatpush3.bf16.msra.mxu0 %v176_v4 }
   0xf   :  { %159 = vmatprep.subr.bf16.mxu0 %v181_v0 }
  0x12   :  { %160 = vmatpush3.bf16.msra.mxu0 %v177_v5 }
  0x13   :  { %161 = vmatprep.subr.bf16.mxu0 %v181_v0 }
  0x16   :  { %162 = vmatpush3.bf16.msra.mxu0 %v178_v6 }
  0x17   :  { %163 = vmatprep.subr.bf16.mxu0 %v181_v0 }
  0x1a   :  { %164 = vmatpush3.bf16.msra.mxu0 %v179_v7 }
  0x1b   :  { %165 = vmatprep.subr.bf16.mxu0 %v181_v0 }
  0x1e   :  { %166 = vmatpush3.bf16.msra.mxu0 %v180_v8 }
  0x21   :  { %168 = vmatmul.mubr.bf16.vlgmr.msra.gmra.mxu0 %v16_v10 }
  0xe1   :  { %v122_v12 = vpop.f32.mrf.mxu0 }
  0xe2   :  { %v123_v13 = vadd.f32 %v133_v11, %v122_v12 }
  0xe3   :  { %v169_v14 = vpop.f32.mrf.mxu0 }
  0xe4   :  { %128 = vst [vmem:[%s239_s3] sm:$0xff] %v123_v13 }
  0xe5   :  { %v125_v15 = vpop.f32.mrf.mxu0 }
  0xe7   :  { %v170_v16 = vpop.f32.mrf.mxu0 }

// kernel: gru_forward.3
= control target key start
LH: loop header
LB: loop body
LE: loop exit
PB: predicated region body
PF: predicated region fallthrough
CT: control target
= control target key end

     0   :  { %10 = vsyncpa [#allocation5], 0  ;;  %s2468_s0 = inlined_call_operand.vmem [shape: bf16[64,4], index: 0, kind: input, shape index: {}]   ;;  %s2469_s1 = inlined_call_operand.hbm [shape: bf16[4,384], index: 1, kind: input, shape index: {}]   ;;  %s2470_s2 = inlined_call_operand.hbm [shape: bf16[128,384], index: 2, kind: input, shape index: {}]   ;;  %s2471_s3 = inlined_call_operand.hbm [shape: f32[1,384], index: 3, kind: input, shape index: {}]   ;;  %s2472_s4 = inlined_call_operand.hbm [shape: f32[1,128], index: 4, kind: input, shape index: {}]   ;;  %s2473_s5 = inlined_call_operand.vmem [shape: bf16[64,128], index: 5, kind: output, shape index: {}]  }
   0x1   :  { %11 = vsyncpa [#allocation7], 0 }
   0x2   :  { %12 = vsyncpa [#allocation10], 0  ;;  %s1936_s18 = smov [#allocation6]  }
   0x3   :  { %s30_s19 = sshll.u32 %s1936_s18, 4  ;;  %s31_s19 = int_to_ptr.vmem [resolvable:$true] %s30_s19 }
   0x4   :  { %s1858_s20 = scalar_lea.vmem %s31_s19, 3072  ;;  %p1863_p1 = scmp.lt.s32.totalorder %s31_s19, %s31_s19 }
   0x5   :  { %p1859_p0 = scmp.ne.s32.totalorder %s31_s19, %s1858_s20  ;;  %p1864_p2 = scmp.lt.s32.totalorder %s1858_s20, %s1858_s20 }
   0x7   :  { %p1865_p3 = por %p1864_p2, %p1863_p1 }
   0x9   :  { %p1866_p4 = pnand %p1865_p3, %p1859_p0 }
   0xb   :  { %1869 = shalt.err (!%p1866_p4)
}
   0xc   :  { %s1937_s21 = smov 192   ;;  %s1938_s22 = smov 12  }
   0xd   :  { %36 = dma.hbm_to_vmem [thread:$0]  %s2470_s2, 3072, %s31_s19, [#allocation7], %s1937_s21, %s1937_s21, %s1938_s22  }
   0xe   :  { %s1939_s25 = smov [#allocation4]   ;;  %s1940_s27 = smov [#allocation8]  }
   0xf   :  { %s21_s26 = sshll.u32 %s1939_s25, 4  ;;  %s43_s28 = sshll.u32 %s1940_s27, 4  ;;  %s22_s26 = int_to_ptr.vmem [resolvable:$true] %s21_s26  ;;  %s44_s28 = int_to_ptr.vmem [resolvable:$true] %s43_s28 }
  0x10   :  { %s1878_s29 = scalar_lea.vmem %s22_s26, 96  ;;  %p1883_p6 = scmp.lt.s32.totalorder %s22_s26, %s22_s26 }
  0x11   :  { %p1879_p5 = scmp.ne.s32.totalorder %s22_s26, %s1878_s29  ;;  %p1884_p7 = scmp.lt.s32.totalorder %s1878_s29, %s1878_s29 }
  0x13   :  { %p1885_p8 = por %p1884_p7, %p1883_p6 }
  0x15   :  { %p1886_p9 = pnand %p1885_p8, %p1879_p5 }
  0x17   :  { %1889 = shalt.err (!%p1886_p9)
}
  0x18   :  { %24 = dma.hbm_to_vmem [thread:$0]  %s2469_s1, 96, %s22_s26, [#allocation5]  }
  0x19   :  { %s1898_s7 = scalar_lea.vmem %s44_s28, 48  ;;  %s1902_s2 = scalar_lea.vmem %s44_s28, 64 }
  0x1a   :  { %p1899_p10 = scmp.ne.s32.totalorder %s44_s28, %s1898_s7  ;;  %p1903_p11 = scmp.lt.s32.totalorder %s44_s28, %s44_s28 }
  0x1b   :  { %p1904_p12 = scmp.lt.s32.totalorder %s1902_s2, %s1898_s7 }
  0x1d   :  { %p1905_p13 = por %p1904_p12, %p1903_p11 }
  0x1f   :  { %p1906_p0 = pnand %p1905_p13, %p1899_p10 }
  0x21   :  { %1909 = shalt.err (!%p1906_p0)
}
  0x22   :  { %46 = dma.hbm_to_vmem [thread:$0]  %s2471_s3, 48, %s44_s28, [#allocation7]  }
  0x23   :  { %s1941_s10 = smov [#allocation9]  }
  0x24   :  { %s53_s11 = sshll.u32 %s1941_s10, 4  ;;  %s54_s11 = int_to_ptr.vmem [resolvable:$true] %s53_s11 }
  0x25   :  { %s1918_s12 = scalar_lea.vmem %s54_s11, 16  ;;  %s1922_s13 = scalar_lea.vmem %s54_s11, 32 }
  0x26   :  { %p1919_p1 = scmp.ne.s32.totalorder %s54_s11, %s1918_s12  ;;  %p1923_p2 = scmp.lt.s32.totalorder %s54_s11, %s54_s11 }
  0x27   :  { %p1924_p3 = scmp.lt.s32.totalorder %s1922_s13, %s1918_s12 }
  0x29   :  { %p1925_p4 = por %p1924_p3, %p1923_p2 }
  0x2b   :  { %p1926_p5 = pnand %p1925_p4, %p1919_p1 }
  0x2d   :  { %1929 = shalt.err (!%p1926_p5)
}
  0x2e   :  { %56 = dma.hbm_to_vmem [thread:$0]  %s2472_s4, 16, %s54_s11, [#allocation10]  }
  0x2f   :  { %1930 = dma.done.wait [#allocation5], 96  }
  0x30   :  { %1931 = vsyncadd [#allocation5], 4294967200 }
  0x31   :  { %1932 = dma.done.wait [#allocation7], 3120  }
  0x32   :  { %1933 = vsyncadd [#allocation7], 4294964176 }
  0x33   :  { %1934 = dma.done.wait [#allocation10], 16  }
  0x34   :  { %1935 = vsyncadd [#allocation10], 4294967280  ;;  %v86_v0 = vlaneseq  ;;  %v1942_v1 = vmov 1983009808   ;;  %v2474_v3 = vmov 0   ;;  %vm151_vm0 = vcmask 1041408  }
  0x35   :  { %v124_v2 = vunpack.c.l.s4 %v1942_v1  ;;  %193 = vmatprep.mubr.bf16.mxu0 %v2474_v3  ;;  %v83_v7 = vld [vmem:[#allocation4] sm:$0x3f]  ;;  %vm138_vm1 = vcmask 31744   ;;  %v1999_v15 = vld [vmem:[#allocation6 + $0xa8] ss:$12 sps:$4 sm:$0xff]   ;;  %v2476_v19 = vmov 0.0  }
  0x36   :  { %v1990_v4 = vshrl.u32 %v86_v0, 7  ;;  %v1714_v9 = vld [vmem:[%s2468_s0] sm:$0xff]   ;;  %v122_v10 = vcombine.high %v83_v7, %v83_v7  ;;  %v1721_v20 = vld [vmem:[%s2468_s0 + $0x8] sm:$0xff]   ;;  %v1728_v21 = vld [vmem:[%s2468_s0 + $0x10] sm:$0xff]   ;;  %vm1945_vm2 = vmmov 0   ;;  %v1946_v42 = vmov 0.0|0.0  }
  0x37   :  { %v125_v5 = vunpack.c.0.s8 %v124_v2  ;;  %v1996_v13 = vld [vmem:[#allocation6 + $0xac] ss:$12 sps:$4 sm:$0xff]   ;;  %1534 = vmatprep.mubr.msk.bf16.mxu1 %vm138_vm1, %v1714_v9  ;;  %v2002_v17 = vld [vmem:[#allocation6 + $0x94] ss:$12 sps:$4 sm:$0xff]   ;;  %v2004_v18 = vld [vmem:[#allocation6 + $0x90] ss:$12 sps:$4 sm:$0xff]  }
  0x38   :  { %v2017_v22 = vld [vmem:[#allocation6 + $0x7c] ss:$12 sps:$4 sm:$0xff]   ;;  %v2021_v23 = vld [vmem:[#allocation6 + $0x78] ss:$12 sps:$4 sm:$0xff]   ;;  %v2029_v26 = vld [vmem:[#allocation6 + $0x60] ss:$12 sps:$4 sm:$0xff]  }
  0x39   :  { %v128_v6 = vsub.s32 %v125_v5, %v1990_v4  ;;  %v2024_v24 = vld [vmem:[#allocation6 + $0x64] ss:$12 sps:$4 sm:$0xff]   ;;  %v2041_v29 = vld [vmem:[#allocation6 + $0x4c] ss:$12 sps:$4 sm:$0xff]   ;;  %v2051_v31 = vld [vmem:[#allocation6 + $0x48] ss:$12 sps:$4 sm:$0xff]  }
  0x3a   :  { %v2027_v25 = vld [vmem:[#allocation6 + $0xb0] ss:$12 sps:$4 sm:$0xff]   ;;  %v2033_v27 = vld [vmem:[#allocation6 + $0x98] ss:$12 sps:$4 sm:$0xff]   ;;  %v2046_v30 = vld [vmem:[#allocation6 + $0x80] ss:$12 sps:$4 sm:$0xff]  }
  0x3b   :  { %v129_v8 = vrot.slane %v83_v7, %v128_v6  ;;  %v136_v14 = vrot.slane %v122_v10, %v128_v6  ;;  %v1736_v28 = vld [vmem:[%s2468_s0 + $0x18] sm:$0xff]   ;;  %v2066_v35 = vld [vmem:[#allocation6 + $0x1c] ss:$12 sps:$4 sm:$0xff]   ;;  %v2084_v40 = vld [vmem:[#allocation6] ss:$12 sps:$4 sm:$0xff]   ;;  %v96_v44 = vsub.s32 2, %v1990_v4 }
  0x3c   :  { %v2055_v32 = vld [vmem:[#allocation6 + $0x34] ss:$12 sps:$4 sm:$0xff]   ;;  %v2062_v34 = vld [vmem:[#allocation6 + $0x30] ss:$12 sps:$4 sm:$0xff]   ;;  %v2073_v37 = vld [vmem:[#allocation6 + $0x18] ss:$12 sps:$4 sm:$0xff]  }
  0x3d   :  { %v137_v11 = vcombine.high %v129_v8, %v129_v8  ;;  %v153_v12 = vsel %vm151_vm0, %v129_v8, 0  ;;  %1702 = vmatprep.subr.msk.bf16.mxu1 %vm151_vm0, %v136_v14  ;;  %v159_v16 = vsel %vm151_vm0, %v136_v14, 0  ;;  %v2059_v33 = vld [vmem:[#allocation6 + $0x68] ss:$12 sps:$4 sm:$0xff]   ;;  %v2070_v36 = vld [vmem:[#allocation6 + $0x50] ss:$12 sps:$4 sm:$0xff]  }
  0x3e   :  { %1533 = vmatpush3.bf16.msra.mxu1 %v159_v16  ;;  %v2077_v38 = vld [vmem:[#allocation6 + $0x4] ss:$12 sps:$4 sm:$0xff]   ;;  %v2090_v41 = vld [vmem:[#allocation6 + $0x20] ss:$12 sps:$4 sm:$0xff]   ;;  %v2096_v43 = vld [vmem:[#allocation6 + $0x8] ss:$12 sps:$4 sm:$0xff]  }
  0x3f   :  { %1398 = vmatprep.subr.msk.bf16.mxu0 %vm151_vm0, %v137_v11  ;;  %1542 = vmatprep.subr.bf16.mxu1 %v2476_v19  ;;  %v2081_v39 = vld [vmem:[#allocation6 + $0x38] ss:$12 sps:$4 sm:$0xff]   ;;  %v84_v45 = vld [vmem:[#allocation8] sm:$0x7]  ;;  %v88_v46 = vsub.s32 0, %v1990_v4  ;;  %v92_v49 = vsub.s32 1, %v1990_v4 }
  0x40   :  { %176 = vmatpush1.bf16.msra.mxu0 %v153_v12  ;;  %v2138_v47 = vrot.slane %v84_v45, %v96_v44 }
  0x41   :  { %498 = vmatprep.subr.bf16.mxu0 %v1996_v13  ;;  %1535 = vmatmul.mubr.msk.bf16.vlgmr.msra.gmra.mxu1 %vm138_vm1, %v1721_v20  ;;  %v89_v52 = vrot.slane %v84_v45, %v88_v46  ;;  %v93_v56 = vrot.slane %v84_v45, %v92_v49 }
  0x42   :  { %1538 = vmatprep.mubr.msk.bf16.mxu1 %vm138_vm1, %v1728_v21  ;;  %1543 = vmatpush3.bf16.msra.mxu1 %v2027_v25 }
  0x43   :  { %1399 = vmatmul.mubr.msk.bf16.vlgmr.msra.gmra.mxu0 %vm138_vm1, %v1714_v9  ;;  %1544 = vmatprep.subr.bf16.mxu1 %v2476_v19 }
  0x44   :  { %499 = vmatpush1.bf16.msra.mxu0 %v1999_v15  ;;  %203 = vmatprep.mubr.bf16.mxu0 %v2474_v3 }
  0x45   :  { %500 = vmatprep.subr.bf16.mxu0 %v2002_v17 }
  0x46   :  { %1545 = vmatpush3.bf16.msra.mxu1 %v2033_v27 }
  0x47   :  { %1546 = vmatprep.subr.bf16.mxu1 %v2476_v19 }
  0x48   :  { %501 = vmatpush1.bf16.msra.mxu0 %v2004_v18 }
  0x49   :  { %502 = vmatprep.subr.bf16.mxu0 %v2017_v22  ;;  %1539 = vmatmul.mubr.msk.bf16.gmra.mxu1 %vm138_vm1, %v1736_v28 }
  0x4a   :  { %1558 = vmatprep.mubr.msk.bf16.mxu1 %vm1945_vm2, %v2476_v19  ;;  %1547 = vmatpush3.bf16.msra.mxu1 %v2046_v30 }
  0x4b   :  { %1400 = vmatmul.mubr.msk.bf16.gmra.mxu0 %vm138_vm1, %v1721_v20  ;;  %1548 = vmatprep.subr.bf16.mxu1 %v2476_v19 }
  0x4c   :  { %503 = vmatpush1.bf16.msra.mxu0 %v2021_v23  ;;  %213 = vmatprep.mubr.bf16.mxu0 %v2474_v3 }
  0x4d   :  { %504 = vmatprep.subr.bf16.mxu0 %v2024_v24 }
  0x4e   :  { %1549 = vmatpush3.bf16.msra.mxu1 %v2059_v33 }
  0x4f   :  { %1550 = vmatprep.subr.bf16.mxu1 %v2476_v19 }
  0x50   :  { %505 = vmatpush1.bf16.msra.mxu0 %v2029_v26 }
  0x51   :  { %506 = vmatprep.subr.bf16.mxu0 %v2041_v29 }
  0x52   :  { %1551 = vmatpush3.bf16.msra.mxu1 %v2070_v36 }
  0x53   :  { %1401 = vmatmul.mubr.msk.bf16.gmra.mxu0 %vm138_vm1, %v1728_v21  ;;  %1552 = vmatprep.subr.bf16.mxu1 %v2476_v19 }
  0x54   :  { %507 = vmatpush1.bf16.msra.mxu0 %v2051_v31  ;;  %223 = vmatprep.mubr.bf16.mxu0 %v2474_v3 }
  0x55   :  { %508 = vmatprep.subr.bf16.mxu0 %v2055_v32 }
  0x56   :  { %1553 = vmatpush3.bf16.msra.mxu1 %v2081_v39 }
  0x57   :  { %1554 = vmatprep.subr.bf16.mxu1 %v2476_v19 }
  0x58   :  { %509 = vmatpush1.bf16.msra.mxu0 %v2062_v34 }
  0x59   :  { %510 = vmatprep.subr.bf16.mxu0 %v2066_v35 }
  0x5a   :  { %1555 = vmatpush3.bf16.msra.mxu1 %v2090_v41 }
  0x5b   :  { %1402 = vmatmul.mubr.msk.bf16.gmra.mxu0 %vm138_vm1, %v1736_v28  ;;  %1556 = vmatprep.subr.bf16.mxu1 %v2476_v19 }
  0x5c   :  { %511 = vmatpush1.bf16.msra.mxu0 %v2073_v37  ;;  %530 = vmatprep.mubr.bf16.mxu0 %v2474_v3 }
  0x5d   :  { %512 = vmatprep.subr.bf16.mxu0 %v2077_v38 }
  0x5e   :  { %1557 = vmatpush3.bf16.msra.mxu1 %v2096_v43 }
  0x5f   :  { %1562 = vmatprep.subr.bf16.mxu1 %v2476_v19 }
  0x60   :  { %513 = vmatpush1.bf16.msra.mxu0 %v2084_v40 }
  0x61   :  { %608 = vmatprep.subr.bf16.mxu0 %v1996_v13  ;;  %1559 = vmatmul.mubr.bf16.vlgmr.msra.gmra.mxu1 %v1946_v42 }
  0x62   :  { %1563 = vmatpush3.bf16.msra.mxu1 %v2027_v25  ;;  %1578 = vmatprep.mubr.msk.bf16.mxu1 %vm1945_vm2, %v2476_v19 }
  0x63   :  { %531 = vmatmul.mubr.bf16.vlgmr.msra.gmra.mxu0 %v1946_v42  ;;  %1564 = vmatprep.subr.bf16.mxu1 %v2476_v19 }
  0x64   :  { %609 = vmatpush1.bf16.msra.mxu0 %v1999_v15  ;;  %640 = vmatprep.mubr.bf16.mxu0 %v2474_v3 }
  0x65   :  { %610 = vmatprep.subr.bf16.mxu0 %v2002_v17 }
  0x66   :  { %1565 = vmatpush3.bf16.msra.mxu1 %v2033_v27 }
  0x67   :  { %1566 = vmatprep.subr.bf16.mxu1 %v2476_v19 }
  0x68   :  { %611 = vmatpush1.bf16.msra.mxu0 %v2004_v18 }
  0x69   :  { %612 = vmatprep.subr.bf16.mxu0 %v2017_v22 }
  0x6a   :  { %1567 = vmatpush3.bf16.msra.mxu1 %v2046_v30 }
  0x6b   :  { %1568 = vmatprep.subr.bf16.mxu1 %v2476_v19 }
  0x6c   :  { %613 = vmatpush1.bf16.msra.mxu0 %v2021_v23 }
  0x6d   :  { %614 = vmatprep.subr.bf16.mxu0 %v2024_v24 }
  0x6e   :  { %1569 = vmatpush3.bf16.msra.mxu1 %v2059_v33 }
  0x6f   :  { %1570 = vmatprep.subr.bf16.mxu1 %v2476_v19 }
  0x70   :  { %615 = vmatpush1.bf16.msra.mxu0 %v2029_v26 }
  0x71   :  { %616 = vmatprep.subr.bf16.mxu0 %v2041_v29 }
  0x72   :  { %1571 = vmatpush3.bf16.msra.mxu1 %v2070_v36 }
  0x73   :  { %1572 = vmatprep.subr.bf16.mxu1 %v2476_v19 }
  0x74   :  { %617 = vmatpush1.bf16.msra.mxu0 %v2051_v31 }
  0x75   :  { %618 = vmatprep.subr.bf16.mxu0 %v2055_v32 }
  0x76   :  { %1573 = vmatpush3.bf16.msra.mxu1 %v2081_v39 }
  0x77   :  { %1574 = vmatprep.subr.bf16.mxu1 %v2476_v19 }
  0x78   :  { %619 = vmatpush1.bf16.msra.mxu0 %v2062_v34 }
  0x79   :  { %620 = vmatprep.subr.bf16.mxu0 %v2066_v35 }
  0x7a   :  { %1575 = vmatpush3.bf16.msra.mxu1 %v2090_v41 }
  0x7b   :  { %1576 = vmatprep.subr.bf16.mxu1 %v2476_v19 }
  0x7c   :  { %621 = vmatpush1.bf16.msra.mxu0 %v2073_v37 }
  0x7d   :  { %622 = vmatprep.subr.bf16.mxu0 %v2077_v38 }
  0x7e   :  { %1577 = vmatpush3.bf16.msra.mxu1 %v2096_v43 }
  0x7f   :  { %1582 = vmatprep.subr.bf16.mxu1 %v2476_v19 }
  0x80   :  { %623 = vmatpush1.bf16.msra.mxu0 %v2084_v40 }
  0x81   :  { %719 = vmatprep.subr.bf16.mxu0 %v1996_v13 }
 0x101   :  { %v1536_v51 = vpop.f32.mrf.mxu1 }
 0x102   :  { %v2142_v53 = vadd.f32 %v1536_v51, %v2138_v47 }
 0x103   :  { %v195_v48 = vpop.f32.mrf.mxu0  ;;  %v2144_v55 = vpop.f32.mrf.mxu1 }
 0x105   :  { %v197_v50 = vpop.f32.mrf.mxu0  ;;  %v1537_v59 = vpop.f32.mrf.mxu1 }
 0x106   :  { %v2151_v61 = vadd.f32 %v1537_v59, %v2138_v47  ;;  %v198_v19 = vadd.f32 %v197_v50, %v93_v56 }
 0x107   :  { %v199_v54 = vpop.f32.mrf.mxu0  ;;  %v271_v63 = vpop.f32.mrf.mxu1 }
 0x108   :  { %v2146_v57 = vadd.f32 %v199_v54, %v89_v52  ;;  %v2156_v1 = vadd.f32 %v271_v63, %v2138_v47 }
 0x109   :  { %v201_v58 = vpop.f32.mrf.mxu0  ;;  %v1540_v5 = vpop.f32.mrf.mxu1 }
 0x10a   :  { %v2148_v60 = vadd.f32 %v201_v58, %v93_v56  ;;  %v2161_v7 = vadd.f32 %v1540_v5, %v2138_v47 }
 0x10b   :  { %v205_v62 = vpop.f32.mrf.mxu0  ;;  %v284_v9 = vpop.f32.mrf.mxu1 }
 0x10c   :  { %v2153_v0 = vadd.f32 %v205_v62, %v89_v52  ;;  %2478 = vst [vmem:[#allocation14_spill] sm:$0xff] %v2161_v7  ;;  %v2166_v11 = vadd.f32 %v284_v9, %v2138_v47  ;;  %v196_v9 = vadd.f32 %v195_v48, %v89_v52  ;;  %v2192_v48 = vld [vmem:[#allocation9] ss:$0 sm:$0xff] }
 0x10d   :  { %v207_v2 = vpop.f32.mrf.mxu0  ;;  %v1541_v14 = vpop.f32.mrf.mxu1 }
 0x10e   :  { %v2158_v4 = vadd.f32 %v207_v2, %v93_v56  ;;  %v2171_v20 = vadd.f32 %v1541_v14, %v2138_v47 }
 0x10f   :  { %v209_v6 = vpop.f32.mrf.mxu0  ;;  %v287_v28 = vpop.f32.mrf.mxu1 }
 0x110   :  { %v2163_v8 = vadd.f32 %v209_v6, %v89_v52  ;;  %2479 = vst [vmem:[#allocation15_spill] sm:$0xff] %v2171_v20  ;;  %v2176_v44 = vadd.f32 %v287_v28, %v2138_v47 }
 0x111   :  { %v211_v10 = vpop.f32.mrf.mxu0 }
 0x112   :  { %v2168_v12 = vadd.f32 %v211_v10, %v93_v56 }
 0x113   :  { %v215_v16 = vpop.f32.mrf.mxu0 }
 0x114   :  { %v2173_v21 = vadd.f32 %v215_v16, %v89_v52 }
 0x115   :  { %v217_v42 = vpop.f32.mrf.mxu0 }
 0x116   :  { %v2178_v45 = vadd.f32 %v217_v42, %v93_v56 }
 0x117   :  { %v219_v46 = vpop.f32.mrf.mxu0 }
 0x118   :  { %v2180_v49 = vadd.f32 %v219_v46, %v89_v52 }
 0x119   :  { %v221_v51 = vpop.f32.mrf.mxu0 }
 0x11a   :  { %v2182_v54 = vadd.f32 %v221_v51, %v93_v56 }
 0x11b   :  { %v225_v58 = vpop.f32.mrf.mxu0 }
 0x11c   :  { %v2184_v59 = vadd.f32 %v225_v58, %v89_v52 }
 0x11d   :  { %v227_v62 = vpop.f32.mrf.mxu0 }
 0x11e   :  { %v2186_v63 = vadd.f32 %v227_v62, %v93_v56 }
 0x11f   :  { %v229_v2 = vpop.f32.mrf.mxu0 }
 0x120   :  { %2480 = vst [vmem:[#allocation16_spill] sm:$0xff] %v2186_v63  ;;  %v2188_v5 = vadd.f32 %v229_v2, %v89_v52 }
 0x121   :  { %v231_v6 = vpop.f32.mrf.mxu0  ;;  %v573_v3 = vpop.f32.mrf.mxu1 }
 0x122   :  { %2481 = vst [vmem:[#allocation17_spill] sm:$0xff] %v2188_v5  ;;  %v2190_v10 = vadd.f32 %v231_v6, %v93_v56  ;;  %v593_v52 = vadd.f32 %v2192_v48, %v573_v3  ;;  %v2482_v3 = vmov 0.0  }
 0x123   :  { %v532_v14 = vpop.f32.mrf.mxu0  ;;  %v1560_v58 = vpop.f32.mrf.mxu1 }
 0x124   :  { %v579_v16 = vadd.f32 %v532_v14, %v196_v9  ;;  %v269_v14 = vadd.f32 %v2144_v55, %v2138_v47  ;;  %v2483_v47 = vmov 0  }
 0x125   :  { %v534_v28 = vpop.f32.mrf.mxu0  ;;  %v576_v20 = vpop.f32.mrf.mxu1 }
 0x126   :  { %v1432_v42 = vmul.f32 -1.442695, %v579_v16  ;;  %v586_v62 = vadd.f32 %v534_v28, %v198_v19 }
 0x127   :  { %v536_v46 = vpop.f32.mrf.mxu0  ;;  %v1561_v7 = vpop.f32.mrf.mxu1 }
 0x128   :  { %1751 = vpow2.f32 %v1432_v42  ;;  %v1433_v63 = vmul.f32 -1.442695, %v586_v62 }
 0x129   :  { %v537_v51 = vpop.f32.mrf.mxu0 }
 0x12a   :  { %1753 = vpow2.f32 %v1433_v63 }
 0x135   :  { %v1752_v2 = vpop.eup %1751 }
 0x136   :  { %v583_v5 = vadd.f32 1.0, %v1752_v2 }
 0x137   :  { %v1754_v6 = vpop.eup %1753 }
 0x138   :  { %1755 = vrcp.f32 %v583_v5  ;;  %v590_v42 = vadd.f32 1.0, %v1754_v6 }
 0x145   :  { %v1756_v9 = vpop.eup %1755 }
 0x146   :  { %v594_v16 = vmul.f32 %v1756_v9, %v593_v52 }
 0x148   :  { %v595_v50 = vadd.f32 %v594_v16, %v269_v14 }
 0x14a   :  { %1757 = vtanh.f32 %v595_v50 }
 0x14b   :  { %1759 = vrcp.f32 %v590_v42 }
 0x157   :  { %v1758_v19 = vpop.eup %1757 }
 0x158   :  { %v597_v56 = vsub.f32 0.0, %v1758_v19  ;;  %v1760_v7 = vpop.eup %1759 }
 0x15a   :  { %v598_v20 = vmul.f32 %v1760_v7, %v597_v56 }
 0x15c   :  { %v2197_v63 = vadd.f32 %v1758_v19, %v598_v20 }
 0x15e   :  { %v600_v5 = vpack.c.bf16 %v2197_v63, %v2197_v63 }
 0x160   :  { %601 = vst [vmem:[%s2473_s5] sm:$0xf] %v600_v5  ;;  %641 = vmatmul.mubr.bf16.vlgmr.msra.gmra.mxu0 %v600_v5  ;;  %1579 = vmatmul.mubr.bf16.vlgmr.msra.gmra.mxu1 %v600_v5 }
 0x161   :  { %720 = vmatpush1.bf16.msra.mxu0 %v1999_v15  ;;  %1583 = vmatpush3.bf16.msra.mxu1 %v2027_v25 }
 0x162   :  { %721 = vmatprep.subr.bf16.mxu0 %v2002_v17  ;;  %1584 = vmatprep.subr.bf16.mxu1 %v2482_v3 }
 0x163   :  { %751 = vmatprep.mubr.bf16.mxu0 %v2483_v47  ;;  %1598 = vmatprep.mubr.msk.bf16.mxu1 %vm1945_vm2, %v2482_v3 }
 0x165   :  { %722 = vmatpush1.bf16.msra.mxu0 %v2004_v18  ;;  %1585 = vmatpush3.bf16.msra.mxu1 %v2033_v27 }
 0x166   :  { %723 = vmatprep.subr.bf16.mxu0 %v2017_v22  ;;  %1586 = vmatprep.subr.bf16.mxu1 %v2482_v3 }
 0x169   :  { %724 = vmatpush1.bf16.msra.mxu0 %v2021_v23  ;;  %1587 = vmatpush3.bf16.msra.mxu1 %v2046_v30 }
 0x16a   :  { %725 = vmatprep.subr.bf16.mxu0 %v2024_v24  ;;  %1588 = vmatprep.subr.bf16.mxu1 %v2482_v3 }
 0x16d   :  { %726 = vmatpush1.bf16.msra.mxu0 %v2029_v26  ;;  %1589 = vmatpush3.bf16.msra.mxu1 %v2059_v33 }
 0x16e   :  { %727 = vmatprep.subr.bf16.mxu0 %v2041_v29  ;;  %1590 = vmatprep.subr.bf16.mxu1 %v2482_v3 }
 0x171   :  { %728 = vmatpush1.bf16.msra.mxu0 %v2051_v31  ;;  %1591 = vmatpush3.bf16.msra.mxu1 %v2070_v36 }
 0x172   :  { %729 = vmatprep.subr.bf16.mxu0 %v2055_v32  ;;  %1592 = vmatprep.subr.bf16.mxu1 %v2482_v3 }
 0x175   :  { %730 = vmatpush1.bf16.msra.mxu0 %v2062_v34  ;;  %1593 = vmatpush3.bf16.msra.mxu1 %v2081_v39 }
 0x176   :  { %731 = vmatprep.subr.bf16.mxu0 %v2066_v35  ;;  %1594 = vmatprep.subr.bf16.mxu1 %v2482_v3 }
 0x179   :  { %732 = vmatpush1.bf16.msra.mxu0 %v2073_v37  ;;  %1595 = vmatpush3.bf16.msra.mxu1 %v2090_v41 }
 0x17a   :  { %733 = vmatprep.subr.bf16.mxu0 %v2077_v38  ;;  %1596 = vmatprep.subr.bf16.mxu1 %v2482_v3 }
 0x17d   :  { %734 = vmatpush1.bf16.msra.mxu0 %v2084_v40  ;;  %1597 = vmatpush3.bf16.msra.mxu1 %v2096_v43 }
 0x17e   :  { %830 = vmatprep.subr.bf16.mxu0 %v1996_v13  ;;  %1602 = vmatprep.subr.bf16.mxu1 %v2482_v3 }
 0x220   :  { %v642_v55 = vpop.f32.mrf.mxu0  ;;  %v683_v28 = vpop.f32.mrf.mxu1 }
 0x221   :  { %v689_v46 = vadd.f32 %v642_v55, %v2146_v57  ;;  %v703_v56 = vadd.f32 %v2192_v48, %v683_v28 }
 0x222   :  { %v644_v51 = vpop.f32.mrf.mxu0  ;;  %v1580_v58 = vpop.f32.mrf.mxu1 }
 0x223   :  { %v1434_v62 = vmul.f32 -1.442695, %v689_v46  ;;  %v696_v14 = vadd.f32 %v644_v51, %v2148_v60 }
 0x224   :  { %v646_v2 = vpop.f32.mrf.mxu0  ;;  %v686_v52 = vpop.f32.mrf.mxu1 }
 0x225   :  { %1761 = vpow2.f32 %v1434_v62  ;;  %v1435_v16 = vmul.f32 -1.442695, %v696_v14 }
 0x226   :  { %v647_v6 = vpop.f32.mrf.mxu0  ;;  %v1581_v9 = vpop.f32.mrf.mxu1 }
 0x227   :  { %1763 = vpow2.f32 %v1435_v16 }
 0x232   :  { %v1762_v42 = vpop.eup %1761 }
 0x233   :  { %v693_v50 = vadd.f32 1.0, %v1762_v42 }
 0x234   :  { %v1764_v19 = vpop.eup %1763 }
 0x235   :  { %1765 = vrcp.f32 %v693_v50  ;;  %v700_v5 = vadd.f32 1.0, %v1764_v19 }
 0x242   :  { %v1766_v7 = vpop.eup %1765 }
 0x243   :  { %v704_v57 = vmul.f32 %v1766_v7, %v703_v56 }
 0x245   :  { %v705_v20 = vadd.f32 %v704_v57, %v2156_v1 }
 0x247   :  { %1767 = vtanh.f32 %v705_v20 }
 0x248   :  { %1769 = vrcp.f32 %v700_v5 }
 0x254   :  { %v1768_v55 = vpop.eup %1767 }
 0x255   :  { %v707_v46 = vsub.f32 %v2197_v63, %v1768_v55  ;;  %v1770_v58 = vpop.eup %1769 }
 0x257   :  { %v708_v60 = vmul.f32 %v1770_v58, %v707_v46 }
 0x259   :  { %v2244_v51 = vadd.f32 %v1768_v55, %v708_v60 }
 0x25b   :  { %v710_v62 = vpack.c.bf16 %v2244_v51, %v2244_v51 }
 0x25d   :  { %1436 = vst [vmem:[%s2473_s5 + $0x4] sm:$0xf] %v710_v62  ;;  %752 = vmatmul.mubr.bf16.vlgmr.msra.gmra.mxu0 %v710_v62  ;;  %1599 = vmatmul.mubr.bf16.vlgmr.msra.gmra.mxu1 %v710_v62 }
 0x25e   :  { %831 = vmatpush1.bf16.msra.mxu0 %v1999_v15  ;;  %1603 = vmatpush3.bf16.msra.mxu1 %v2027_v25 }
 0x25f   :  { %832 = vmatprep.subr.bf16.mxu0 %v2002_v17  ;;  %1604 = vmatprep.subr.bf16.mxu1 %v2482_v3 }
 0x260   :  { %862 = vmatprep.mubr.bf16.mxu0 %v2483_v47  ;;  %1618 = vmatprep.mubr.msk.bf16.mxu1 %vm1945_vm2, %v2482_v3 }
 0x262   :  { %833 = vmatpush1.bf16.msra.mxu0 %v2004_v18  ;;  %1605 = vmatpush3.bf16.msra.mxu1 %v2033_v27 }
 0x263   :  { %834 = vmatprep.subr.bf16.mxu0 %v2017_v22  ;;  %1606 = vmatprep.subr.bf16.mxu1 %v2482_v3 }
 0x266   :  { %835 = vmatpush1.bf16.msra.mxu0 %v2021_v23  ;;  %1607 = vmatpush3.bf16.msra.mxu1 %v2046_v30 }
 0x267   :  { %836 = vmatprep.subr.bf16.mxu0 %v2024_v24  ;;  %1608 = vmatprep.subr.bf16.mxu1 %v2482_v3 }
 0x26a   :  { %837 = vmatpush1.bf16.msra.mxu0 %v2029_v26  ;;  %1609 = vmatpush3.bf16.msra.mxu1 %v2059_v33 }
 0x26b   :  { %838 = vmatprep.subr.bf16.mxu0 %v2041_v29  ;;  %1610 = vmatprep.subr.bf16.mxu1 %v2482_v3 }
 0x26e   :  { %839 = vmatpush1.bf16.msra.mxu0 %v2051_v31  ;;  %1611 = vmatpush3.bf16.msra.mxu1 %v2070_v36 }
 0x26f   :  { %840 = vmatprep.subr.bf16.mxu0 %v2055_v32  ;;  %1612 = vmatprep.subr.bf16.mxu1 %v2482_v3 }
 0x272   :  { %841 = vmatpush1.bf16.msra.mxu0 %v2062_v34  ;;  %1613 = vmatpush3.bf16.msra.mxu1 %v2081_v39 }
 0x273   :  { %842 = vmatprep.subr.bf16.mxu0 %v2066_v35  ;;  %1614 = vmatprep.subr.bf16.mxu1 %v2482_v3 }
 0x276   :  { %843 = vmatpush1.bf16.msra.mxu0 %v2073_v37  ;;  %1615 = vmatpush3.bf16.msra.mxu1 %v2090_v41 }
 0x277   :  { %844 = vmatprep.subr.bf16.mxu0 %v2077_v38  ;;  %1616 = vmatprep.subr.bf16.mxu1 %v2482_v3 }
 0x27a   :  { %845 = vmatpush1.bf16.msra.mxu0 %v2084_v40  ;;  %1617 = vmatpush3.bf16.msra.mxu1 %v2096_v43 }
 0x27b   :  { %941 = vmatprep.subr.bf16.mxu0 %v1996_v13  ;;  %1622 = vmatprep.subr.bf16.mxu1 %v2482_v3 }
 0x31d   :  { %v753_v1 = vpop.f32.mrf.mxu0  ;;  %v794_v63 = vpop.f32.mrf.mxu1 }
 0x31e   :  { %v800_v28 = vadd.f32 %v753_v1, %v2153_v0  ;;  %v814_v20 = vadd.f32 %v2192_v48, %v794_v63 }
 0x31f   :  { %v755_v2 = vpop.f32.mrf.mxu0  ;;  %v1600_v52 = vpop.f32.mrf.mxu1 }
 0x320   :  { %v1437_v6 = vmul.f32 -1.442695, %v800_v28  ;;  %v807_v50 = vadd.f32 %v755_v2, %v2158_v4 }
 0x321   :  { %v757_v9 = vpop.f32.mrf.mxu0  ;;  %v797_v14 = vpop.f32.mrf.mxu1 }
 0x322   :  { %1771 = vpow2.f32 %v1437_v6  ;;  %v1438_v19 = vmul.f32 -1.442695, %v807_v50 }
 0x323   :  { %v758_v16 = vpop.f32.mrf.mxu0  ;;  %v1601_v42 = vpop.f32.mrf.mxu1 }
 0x324   :  { %1773 = vpow2.f32 %v1438_v19 }
 0x32f   :  { %v1772_v56 = vpop.eup %1771 }
 0x330   :  { %v804_v7 = vadd.f32 1.0, %v1772_v56 }
 0x331   :  { %v1774_v57 = vpop.eup %1773 }
 0x332   :  { %1775 = vrcp.f32 %v804_v7  ;;  %v811_v46 = vadd.f32 1.0, %v1774_v57 }
 0x33f   :  { %v1776_v5 = vpop.eup %1775 }
 0x340   :  { %v815_v0 = vmul.f32 %v1776_v5, %v814_v20 }
 0x342   :  { %v816_v55 = vadd.f32 %v815_v0, %v2142_v53 }
 0x344   :  { %1777 = vtanh.f32 %v816_v55 }
 0x345   :  { %1779 = vrcp.f32 %v811_v46 }
 0x351   :  { %v1778_v58 = vpop.eup %1777 }
 0x352   :  { %v818_v60 = vsub.f32 %v2244_v51, %v1778_v58  ;;  %v1780_v62 = vpop.eup %1779 }
 0x354   :  { %v819_v4 = vmul.f32 %v1780_v62, %v818_v60 }
 0x356   :  { %v2291_v1 = vadd.f32 %v1778_v58, %v819_v4 }
 0x358   :  { %v821_v28 = vpack.c.bf16 %v2291_v1, %v2291_v1 }
 0x35a   :  { %1439 = vst [vmem:[%s2473_s5 + $0x8] sm:$0xf] %v821_v28  ;;  %863 = vmatmul.mubr.bf16.vlgmr.msra.gmra.mxu0 %v821_v28  ;;  %1619 = vmatmul.mubr.bf16.vlgmr.msra.gmra.mxu1 %v821_v28 }
 0x35b   :  { %942 = vmatpush1.bf16.msra.mxu0 %v1999_v15  ;;  %1623 = vmatpush3.bf16.msra.mxu1 %v2027_v25 }
 0x35c   :  { %943 = vmatprep.subr.bf16.mxu0 %v2002_v17  ;;  %1624 = vmatprep.subr.bf16.mxu1 %v2482_v3 }
 0x35d   :  { %973 = vmatprep.mubr.bf16.mxu0 %v2483_v47  ;;  %1638 = vmatprep.mubr.msk.bf16.mxu1 %vm1945_vm2, %v2482_v3 }
 0x35f   :  { %944 = vmatpush1.bf16.msra.mxu0 %v2004_v18  ;;  %1625 = vmatpush3.bf16.msra.mxu1 %v2033_v27 }
 0x360   :  { %945 = vmatprep.subr.bf16.mxu0 %v2017_v22  ;;  %1626 = vmatprep.subr.bf16.mxu1 %v2482_v3 }
 0x363   :  { %946 = vmatpush1.bf16.msra.mxu0 %v2021_v23  ;;  %1627 = vmatpush3.bf16.msra.mxu1 %v2046_v30 }
 0x364   :  { %947 = vmatprep.subr.bf16.mxu0 %v2024_v24  ;;  %1628 = vmatprep.subr.bf16.mxu1 %v2482_v3 }
 0x367   :  { %948 = vmatpush1.bf16.msra.mxu0 %v2029_v26  ;;  %1629 = vmatpush3.bf16.msra.mxu1 %v2059_v33 }
 0x368   :  { %949 = vmatprep.subr.bf16.mxu0 %v2041_v29  ;;  %1630 = vmatprep.subr.bf16.mxu1 %v2482_v3 }
 0x36b   :  { %950 = vmatpush1.bf16.msra.mxu0 %v2051_v31  ;;  %1631 = vmatpush3.bf16.msra.mxu1 %v2070_v36 }
 0x36c   :  { %951 = vmatprep.subr.bf16.mxu0 %v2055_v32  ;;  %1632 = vmatprep.subr.bf16.mxu1 %v2482_v3 }
 0x36f   :  { %952 = vmatpush1.bf16.msra.mxu0 %v2062_v34  ;;  %1633 = vmatpush3.bf16.msra.mxu1 %v2081_v39 }
 0x370   :  { %953 = vmatprep.subr.bf16.mxu0 %v2066_v35  ;;  %1634 = vmatprep.subr.bf16.mxu1 %v2482_v3 }
 0x373   :  { %954 = vmatpush1.bf16.msra.mxu0 %v2073_v37  ;;  %1635 = vmatpush3.bf16.msra.mxu1 %v2090_v41 }
 0x374   :  { %955 = vmatprep.subr.bf16.mxu0 %v2077_v38  ;;  %1636 = vmatprep.subr.bf16.mxu1 %v2482_v3 }
 0x377   :  { %956 = vmatpush1.bf16.msra.mxu0 %v2084_v40  ;;  %1637 = vmatpush3.bf16.msra.mxu1 %v2096_v43 }
 0x378   :  { %1052 = vmatprep.subr.bf16.mxu0 %v1996_v13  ;;  %1642 = vmatprep.subr.bf16.mxu1 %v2482_v3 }
 0x41a   :  { %v864_v53 = vpop.f32.mrf.mxu0  ;;  %v905_v51 = vpop.f32.mrf.mxu1 }
 0x41b   :  { %v911_v63 = vadd.f32 %v864_v53, %v2163_v8  ;;  %v925_v20 = vadd.f32 %v2192_v48, %v905_v51 }
 0x41c   :  { %v866_v2 = vpop.f32.mrf.mxu0  ;;  %v1620_v52 = vpop.f32.mrf.mxu1 }
 0x41d   :  { %v1440_v6 = vmul.f32 -1.442695, %v911_v63  ;;  %v918_v50 = vadd.f32 %v866_v2, %v2168_v12 }
 0x41e   :  { %v868_v9 = vpop.f32.mrf.mxu0  ;;  %v908_v14 = vpop.f32.mrf.mxu1 }
 0x41f   :  { %1781 = vpow2.f32 %v1440_v6  ;;  %v1441_v19 = vmul.f32 -1.442695, %v918_v50 }
 0x420   :  { %v869_v16 = vpop.f32.mrf.mxu0  ;;  %v1621_v42 = vpop.f32.mrf.mxu1 }
 0x421   :  { %1783 = vpow2.f32 %v1441_v19 }
 0x42c   :  { %v1782_v56 = vpop.eup %1781 }
 0x42d   :  { %v915_v7 = vadd.f32 1.0, %v1782_v56 }
 0x42e   :  { %v1784_v57 = vpop.eup %1783 }
 0x42f   :  { %1785 = vrcp.f32 %v915_v7  ;;  %v922_v55 = vadd.f32 1.0, %v1784_v57 }
 0x43c   :  { %v1786_v5 = vpop.eup %1785 }
 0x43d   :  { %v926_v8 = vmul.f32 %v1786_v5, %v925_v20 }
 0x43f   :  { %v927_v0 = vadd.f32 %v926_v8, %v2151_v61 }
 0x441   :  { %1787 = vtanh.f32 %v927_v0 }
 0x442   :  { %1789 = vrcp.f32 %v922_v55 }
 0x44e   :  { %v1788_v46 = vpop.eup %1787 }
 0x44f   :  { %v929_v58 = vsub.f32 %v2291_v1, %v1788_v46  ;;  %v1790_v60 = vpop.eup %1789 }
 0x451   :  { %v930_v12 = vmul.f32 %v1790_v60, %v929_v58 }
 0x453   :  { %v2338_v62 = vadd.f32 %v1788_v46, %v930_v12 }
 0x455   :  { %v932_v4 = vpack.c.bf16 %v2338_v62, %v2338_v62 }
 0x457   :  { %1442 = vst [vmem:[%s2473_s5 + $0xc] sm:$0xf] %v932_v4  ;;  %974 = vmatmul.mubr.bf16.vlgmr.msra.gmra.mxu0 %v932_v4  ;;  %1639 = vmatmul.mubr.bf16.vlgmr.msra.gmra.mxu1 %v932_v4 }
 0x458   :  { %1053 = vmatpush1.bf16.msra.mxu0 %v1999_v15  ;;  %1643 = vmatpush3.bf16.msra.mxu1 %v2027_v25 }
 0x459   :  { %1054 = vmatprep.subr.bf16.mxu0 %v2002_v17  ;;  %1644 = vmatprep.subr.bf16.mxu1 %v2482_v3 }
 0x45a   :  { %1084 = vmatprep.mubr.bf16.mxu0 %v2483_v47  ;;  %1658 = vmatprep.mubr.msk.bf16.mxu1 %vm1945_vm2, %v2482_v3 }
 0x45c   :  { %1055 = vmatpush1.bf16.msra.mxu0 %v2004_v18  ;;  %1645 = vmatpush3.bf16.msra.mxu1 %v2033_v27 }
 0x45d   :  { %1056 = vmatprep.subr.bf16.mxu0 %v2017_v22  ;;  %1646 = vmatprep.subr.bf16.mxu1 %v2482_v3 }
 0x460   :  { %1057 = vmatpush1.bf16.msra.mxu0 %v2021_v23  ;;  %1647 = vmatpush3.bf16.msra.mxu1 %v2046_v30 }
 0x461   :  { %1058 = vmatprep.subr.bf16.mxu0 %v2024_v24  ;;  %1648 = vmatprep.subr.bf16.mxu1 %v2482_v3 }
 0x464   :  { %1059 = vmatpush1.bf16.msra.mxu0 %v2029_v26  ;;  %1649 = vmatpush3.bf16.msra.mxu1 %v2059_v33 }
 0x465   :  { %1060 = vmatprep.subr.bf16.mxu0 %v2041_v29  ;;  %1650 = vmatprep.subr.bf16.mxu1 %v2482_v3 }
 0x468   :  { %1061 = vmatpush1.bf16.msra.mxu0 %v2051_v31  ;;  %1651 = vmatpush3.bf16.msra.mxu1 %v2070_v36 }
 0x469   :  { %1062 = vmatprep.subr.bf16.mxu0 %v2055_v32  ;;  %1652 = vmatprep.subr.bf16.mxu1 %v2482_v3 }
 0x46c   :  { %1063 = vmatpush1.bf16.msra.mxu0 %v2062_v34  ;;  %1653 = vmatpush3.bf16.msra.mxu1 %v2081_v39 }
 0x46d   :  { %1064 = vmatprep.subr.bf16.mxu0 %v2066_v35  ;;  %1654 = vmatprep.subr.bf16.mxu1 %v2482_v3 }
 0x470   :  { %1065 = vmatpush1.bf16.msra.mxu0 %v2073_v37  ;;  %1655 = vmatpush3.bf16.msra.mxu1 %v2090_v41 }
 0x471   :  { %1066 = vmatprep.subr.bf16.mxu0 %v2077_v38  ;;  %1656 = vmatprep.subr.bf16.mxu1 %v2482_v3 }
 0x474   :  { %1067 = vmatpush1.bf16.msra.mxu0 %v2084_v40  ;;  %1657 = vmatpush3.bf16.msra.mxu1 %v2096_v43 }
 0x475   :  { %1163 = vmatprep.subr.bf16.mxu0 %v1996_v13  ;;  %1662 = vmatprep.subr.bf16.mxu1 %v2482_v3 }
 0x517   :  { %v975_v61 = vpop.f32.mrf.mxu0  ;;  %v1016_v1 = vpop.f32.mrf.mxu1 }
 0x518   :  { %v1022_v28 = vadd.f32 %v975_v61, %v2173_v21  ;;  %v1036_v19 = vadd.f32 %v2192_v48, %v1016_v1  ;;  %v1833_v61 = vld [vmem:[#allocation6 + $0xb0] ss:$12 sps:$4 sm:$0xff]   ;;  %v1834_v1 = vld [vmem:[#allocation6 + $0x94] ss:$12 sps:$4 sm:$0xff]  }
 0x519   :  { %v977_v53 = vpop.f32.mrf.mxu0  ;;  %v1640_v51 = vpop.f32.mrf.mxu1 }
 0x51a   :  { %v1443_v63 = vmul.f32 -1.442695, %v1022_v28  ;;  %v1029_v14 = vadd.f32 %v977_v53, %v2178_v45  ;;  %v1835_v28 = vld [vmem:[#allocation6 + $0x90] ss:$12 sps:$4 sm:$0xff]   ;;  %v1836_v53 = vld [vmem:[#allocation6 + $0x98] ss:$12 sps:$4 sm:$0xff]  }
 0x51b   :  { %v979_v2 = vpop.f32.mrf.mxu0  ;;  %v1019_v52 = vpop.f32.mrf.mxu1  ;;  %v1837_v51 = vld [vmem:[#allocation6 + $0x7c] ss:$12 sps:$4 sm:$0xff]  }
 0x51c   :  { %1791 = vpow2.f32 %v1443_v63  ;;  %v1444_v16 = vmul.f32 -1.442695, %v1029_v14  ;;  %v1838_v63 = vld [vmem:[#allocation6 + $0x78] ss:$12 sps:$4 sm:$0xff]   ;;  %v1839_v2 = vld [vmem:[#allocation6 + $0x80] ss:$12 sps:$4 sm:$0xff]  }
 0x51d   :  { %v980_v6 = vpop.f32.mrf.mxu0  ;;  %v1641_v9 = vpop.f32.mrf.mxu1  ;;  %v1840_v52 = vld [vmem:[#allocation6 + $0x64] ss:$12 sps:$4 sm:$0xff]   ;;  %v1844_v14 = vld [vmem:[#allocation6 + $0x48] ss:$12 sps:$4 sm:$0xff]  }
 0x51e   :  { %1793 = vpow2.f32 %v1444_v16  ;;  %v1842_v6 = vld [vmem:[#allocation6 + $0x68] ss:$12 sps:$4 sm:$0xff]   ;;  %v1843_v9 = vld [vmem:[#allocation6 + $0x4c] ss:$12 sps:$4 sm:$0xff]  }
 0x51f   :  { %v1845_v16 = vld [vmem:[#allocation6 + $0x34] ss:$12 sps:$4 sm:$0xff]  }
 0x529   :  { %v1792_v42 = vpop.eup %1791 }
 0x52a   :  { %v1026_v50 = vadd.f32 1.0, %v1792_v42  ;;  %v1846_v42 = vld [vmem:[#allocation6 + $0x30] ss:$12 sps:$4 sm:$0xff]  }
 0x52b   :  { %v1794_v13 = vpop.eup %1793 }
 0x52c   :  { %1795 = vrcp.f32 %v1026_v50  ;;  %v1033_v57 = vadd.f32 1.0, %v1794_v13  ;;  %v1847_v50 = vld [vmem:[#allocation6 + $0x1c] ss:$12 sps:$4 sm:$0xff]   ;;  %v1848_v13 = vld [vmem:[#allocation6 + $0x18] ss:$12 sps:$4 sm:$0xff]  }
 0x539   :  { %v1796_v56 = vpop.eup %1795 }
 0x53a   :  { %v1037_v21 = vmul.f32 %v1796_v56, %v1036_v19  ;;  %v1849_v19 = vld [vmem:[#allocation6 + $0x4] ss:$12 sps:$4 sm:$0xff]  }
 0x53c   :  { %v1038_v7 = vadd.f32 %v1037_v21, %v2166_v11 }
 0x53e   :  { %1797 = vtanh.f32 %v1038_v7 }
 0x53f   :  { %1799 = vrcp.f32 %v1033_v57 }
 0x54b   :  { %v1798_v20 = vpop.eup %1797 }
 0x54c   :  { %v1040_v5 = vsub.f32 %v2338_v62, %v1798_v20  ;;  %v1800_v8 = vpop.eup %1799 }
 0x54e   :  { %v1041_v45 = vmul.f32 %v1800_v8, %v1040_v5 }
 0x550   :  { %v2385_v0 = vadd.f32 %v1798_v20, %v1041_v45  ;;  %v2484_v45 = vld [vmem:[#allocation16_spill] sm:$0xff] }
 0x552   :  { %v1043_v55 = vpack.c.bf16 %v2385_v0, %v2385_v0 }
 0x554   :  { %1445 = vst [vmem:[%s2473_s5 + $0x10] sm:$0xf] %v1043_v55  ;;  %1085 = vmatmul.mubr.bf16.vlgmr.msra.gmra.mxu0 %v1043_v55  ;;  %1659 = vmatmul.mubr.bf16.vlgmr.msra.gmra.mxu1 %v1043_v55 }
 0x555   :  { %1164 = vmatpush1.bf16.msra.mxu0 %v1999_v15  ;;  %1663 = vmatpush3.bf16.msra.mxu1 %v2027_v25  ;;  %v1831_v15 = vld [vmem:[#allocation6 + $0xac] ss:$12 sps:$4 sm:$0xff]  }
 0x556   :  { %1165 = vmatprep.subr.bf16.mxu0 %v2002_v17  ;;  %1664 = vmatprep.subr.bf16.mxu1 %v2482_v3 }
 0x557   :  { %1195 = vmatprep.mubr.bf16.mxu0 %v2483_v47  ;;  %1678 = vmatprep.mubr.msk.bf16.mxu1 %vm1945_vm2, %v2482_v3 }
 0x559   :  { %1166 = vmatpush1.bf16.msra.mxu0 %v2004_v18  ;;  %1665 = vmatpush3.bf16.msra.mxu1 %v2033_v27 }
 0x55a   :  { %1167 = vmatprep.subr.bf16.mxu0 %v2017_v22  ;;  %1666 = vmatprep.subr.bf16.mxu1 %v2482_v3 }
 0x55d   :  { %1168 = vmatpush1.bf16.msra.mxu0 %v2021_v23  ;;  %1667 = vmatpush3.bf16.msra.mxu1 %v2046_v30 }
 0x55e   :  { %1169 = vmatprep.subr.bf16.mxu0 %v2024_v24  ;;  %1668 = vmatprep.subr.bf16.mxu1 %v2482_v3 }
 0x561   :  { %1170 = vmatpush1.bf16.msra.mxu0 %v2029_v26  ;;  %1669 = vmatpush3.bf16.msra.mxu1 %v2059_v33 }
 0x562   :  { %1171 = vmatprep.subr.bf16.mxu0 %v2041_v29  ;;  %1670 = vmatprep.subr.bf16.mxu1 %v2482_v3 }
 0x565   :  { %1172 = vmatpush1.bf16.msra.mxu0 %v2051_v31  ;;  %1671 = vmatpush3.bf16.msra.mxu1 %v2070_v36 }
 0x566   :  { %1173 = vmatprep.subr.bf16.mxu0 %v2055_v32  ;;  %1672 = vmatprep.subr.bf16.mxu1 %v2482_v3 }
 0x569   :  { %1174 = vmatpush1.bf16.msra.mxu0 %v2062_v34  ;;  %1673 = vmatpush3.bf16.msra.mxu1 %v2081_v39 }
 0x56a   :  { %1175 = vmatprep.subr.bf16.mxu0 %v2066_v35  ;;  %1674 = vmatprep.subr.bf16.mxu1 %v2482_v3 }
 0x56d   :  { %1176 = vmatpush1.bf16.msra.mxu0 %v2073_v37  ;;  %1675 = vmatpush3.bf16.msra.mxu1 %v2090_v41 }
 0x56e   :  { %1177 = vmatprep.subr.bf16.mxu0 %v2077_v38  ;;  %1676 = vmatprep.subr.bf16.mxu1 %v2482_v3 }
 0x571   :  { %1178 = vmatpush1.bf16.msra.mxu0 %v2084_v40  ;;  %1677 = vmatpush3.bf16.msra.mxu1 %v2096_v43 }
 0x572   :  { %1274 = vmatprep.subr.bf16.mxu0 %v1831_v15  ;;  %1682 = vmatprep.subr.bf16.mxu1 %v2482_v3 }
 0x614   :  { %v1086_v17 = vpop.f32.mrf.mxu0  ;;  %v1127_v18 = vpop.f32.mrf.mxu1 }
 0x615   :  { %v1133_v22 = vadd.f32 %v1086_v17, %v2180_v49  ;;  %v1147_v37 = vadd.f32 %v2192_v48, %v1127_v18  ;;  %v2485_v18 = vld [vmem:[#allocation14_spill] sm:$0xff] }
 0x616   :  { %v1088_v23 = vpop.f32.mrf.mxu0  ;;  %v1660_v24 = vpop.f32.mrf.mxu1 }
 0x617   :  { %v1446_v25 = vmul.f32 -1.442695, %v1133_v22  ;;  %v1140_v31 = vadd.f32 %v1088_v23, %v2182_v54 }
 0x618   :  { %v1090_v26 = vpop.f32.mrf.mxu0  ;;  %v1130_v27 = vpop.f32.mrf.mxu1 }
 0x619   :  { %1801 = vpow2.f32 %v1446_v25  ;;  %v1447_v32 = vmul.f32 -1.442695, %v1140_v31 }
 0x61a   :  { %v1091_v29 = vpop.f32.mrf.mxu0  ;;  %v1661_v30 = vpop.f32.mrf.mxu1 }
 0x61b   :  { %1803 = vpow2.f32 %v1447_v32 }
 0x626   :  { %v1802_v33 = vpop.eup %1801 }
 0x627   :  { %v1137_v34 = vadd.f32 1.0, %v1802_v33  ;;  %v2486_v33 = vld [vmem:[#allocation17_spill] sm:$0xff] }
 0x628   :  { %v1804_v35 = vpop.eup %1803 }
 0x629   :  { %1805 = vrcp.f32 %v1137_v34  ;;  %v1144_v46 = vadd.f32 1.0, %v1804_v35 }
 0x636   :  { %v1806_v38 = vpop.eup %1805 }
 0x637   :  { %v1148_v11 = vmul.f32 %v1806_v38, %v1147_v37 }
 0x639   :  { %v1149_v49 = vadd.f32 %v1148_v11, %v2176_v44  ;;  %v1832_v44 = vld [vmem:[#allocation6 + $0xa8] ss:$12 sps:$4 sm:$0xff]  }
 0x63b   :  { %1807 = vtanh.f32 %v1149_v49 }
 0x63c   :  { %1809 = vrcp.f32 %v1144_v46 }
 0x648   :  { %v1808_v58 = vpop.eup %1807 }
 0x649   :  { %v1151_v60 = vsub.f32 %v2385_v0, %v1808_v58  ;;  %v1810_v12 = vpop.eup %1809 }
 0x64b   :  { %v1152_v54 = vmul.f32 %v1810_v12, %v1151_v60 }
 0x64d   :  { %v2431_v62 = vadd.f32 %v1808_v58, %v1152_v54 }
 0x64f   :  { %v1154_v4 = vpack.c.bf16 %v2431_v62, %v2431_v62 }
 0x651   :  { %1448 = vst [vmem:[%s2473_s5 + $0x14] sm:$0xf] %v1154_v4  ;;  %1196 = vmatmul.mubr.bf16.vlgmr.msra.gmra.mxu0 %v1154_v4  ;;  %1679 = vmatmul.mubr.bf16.vlgmr.msra.gmra.mxu1 %v1154_v4 }
 0x652   :  { %1275 = vmatpush1.bf16.msra.mxu0 %v1832_v44  ;;  %1683 = vmatpush3.bf16.msra.mxu1 %v1833_v61 }
 0x653   :  { %1276 = vmatprep.subr.bf16.mxu0 %v1834_v1  ;;  %1684 = vmatprep.subr.bf16.mxu1 %v2482_v3 }
 0x654   :  { %1306 = vmatprep.mubr.bf16.mxu0 %v2483_v47  ;;  %1698 = vmatprep.mubr.msk.bf16.mxu1 %vm1945_vm2, %v2482_v3  ;;  %v1841_v47 = vld [vmem:[#allocation6 + $0x60] ss:$12 sps:$4 sm:$0xff]  }
 0x656   :  { %1277 = vmatpush1.bf16.msra.mxu0 %v1835_v28  ;;  %1685 = vmatpush3.bf16.msra.mxu1 %v1836_v53  ;;  %v2487_v28 = vld [vmem:[#allocation15_spill] sm:$0xff] }
 0x657   :  { %1278 = vmatprep.subr.bf16.mxu0 %v1837_v51  ;;  %1686 = vmatprep.subr.bf16.mxu1 %v2482_v3 }
 0x65a   :  { %1279 = vmatpush1.bf16.msra.mxu0 %v1838_v63  ;;  %1687 = vmatpush3.bf16.msra.mxu1 %v1839_v2 }
 0x65b   :  { %1280 = vmatprep.subr.bf16.mxu0 %v1840_v52  ;;  %1688 = vmatprep.subr.bf16.mxu1 %v2482_v3 }
 0x65e   :  { %1281 = vmatpush1.bf16.msra.mxu0 %v1841_v47  ;;  %1689 = vmatpush3.bf16.msra.mxu1 %v1842_v6 }
 0x65f   :  { %1282 = vmatprep.subr.bf16.mxu0 %v1843_v9  ;;  %1690 = vmatprep.subr.bf16.mxu1 %v2482_v3 }
 0x662   :  { %1283 = vmatpush1.bf16.msra.mxu0 %v1844_v14  ;;  %1691 = vmatpush3.bf16.msra.mxu1 %v2070_v36 }
 0x663   :  { %1284 = vmatprep.subr.bf16.mxu0 %v1845_v16  ;;  %1692 = vmatprep.subr.bf16.mxu1 %v2482_v3 }
 0x666   :  { %1285 = vmatpush1.bf16.msra.mxu0 %v1846_v42  ;;  %1693 = vmatpush3.bf16.msra.mxu1 %v2081_v39 }
 0x667   :  { %1286 = vmatprep.subr.bf16.mxu0 %v1847_v50  ;;  %1694 = vmatprep.subr.bf16.mxu1 %v2482_v3 }
 0x66a   :  { %1287 = vmatpush1.bf16.msra.mxu0 %v1848_v13  ;;  %1695 = vmatpush3.bf16.msra.mxu1 %v2090_v41 }
 0x66b   :  { %1288 = vmatprep.subr.bf16.mxu0 %v1849_v19  ;;  %1696 = vmatprep.subr.bf16.mxu1 %v2482_v3 }
 0x66e   :  { %1289 = vmatpush1.bf16.msra.mxu0 %v2084_v40  ;;  %1697 = vmatpush3.bf16.msra.mxu1 %v2096_v43 }
 0x711   :  { %v1197_v36 = vpop.f32.mrf.mxu0  ;;  %v1238_v56 = vpop.f32.mrf.mxu1 }
 0x712   :  { %v1244_v39 = vadd.f32 %v1197_v36, %v2184_v59  ;;  %v1258_v43 = vadd.f32 %v2192_v48, %v1238_v56 }
 0x713   :  { %v1199_v21 = vpop.f32.mrf.mxu0  ;;  %v1680_v7 = vpop.f32.mrf.mxu1 }
 0x714   :  { %v1449_v57 = vmul.f32 -1.442695, %v1244_v39  ;;  %v1251_v0 = vadd.f32 %v1199_v21, %v2484_v45 }
 0x715   :  { %v1201_v20 = vpop.f32.mrf.mxu0  ;;  %v1241_v5 = vpop.f32.mrf.mxu1 }
 0x716   :  { %1811 = vpow2.f32 %v1449_v57  ;;  %v1450_v55 = vmul.f32 -1.442695, %v1251_v0 }
 0x717   :  { %v1202_v8 = vpop.f32.mrf.mxu0  ;;  %v1681_v41 = vpop.f32.mrf.mxu1 }
 0x718   :  { %1813 = vpow2.f32 %v1450_v55 }
 0x723   :  { %v1812_v3 = vpop.eup %1811 }
 0x724   :  { %v1248_v15 = vadd.f32 1.0, %v1812_v3 }
 0x725   :  { %v1814_v40 = vpop.eup %1813 }
 0x726   :  { %1815 = vrcp.f32 %v1248_v15  ;;  %v1255_v23 = vadd.f32 1.0, %v1814_v40 }
 0x733   :  { %v1816_v17 = vpop.eup %1815 }
 0x734   :  { %v1259_v59 = vmul.f32 %v1816_v17, %v1258_v43 }
 0x736   :  { %v1260_v22 = vadd.f32 %v1259_v59, %v2485_v18 }
 0x738   :  { %1817 = vtanh.f32 %v1260_v22 }
 0x739   :  { %1819 = vrcp.f32 %v1255_v23 }
 0x745   :  { %v1818_v24 = vpop.eup %1817 }
 0x746   :  { %v1262_v25 = vsub.f32 %v2431_v62, %v1818_v24  ;;  %v1820_v26 = vpop.eup %1819 }
 0x748   :  { %v1263_v27 = vmul.f32 %v1820_v26, %v1262_v25 }
 0x74a   :  { %v1264_v29 = vadd.f32 %v1818_v24, %v1263_v27 }
 0x74c   :  { %v1265_v30 = vpack.c.bf16 %v1264_v29, %v1264_v29 }
 0x74e   :  { %1451 = vst [vmem:[%s2473_s5 + $0x18] sm:$0xf] %v1265_v30  ;;  %1307 = vmatmul.mubr.bf16.vlgmr.msra.gmra.mxu0 %v1265_v30  ;;  %1699 = vmatmul.mubr.bf16.vlgmr.msra.gmra.mxu1 %v1265_v30 }
 0x80e   :  { %v1308_v31 = vpop.f32.mrf.mxu0  ;;  %v1349_v32 = vpop.f32.mrf.mxu1 }
 0x80f   :  { %v1355_v34 = vadd.f32 %v1308_v31, %v2486_v33  ;;  %v1369_v44 = vadd.f32 %v2192_v48, %v1349_v32 }
 0x810   :  { %v1310_v35 = vpop.f32.mrf.mxu0  ;;  %v1700_v37 = vpop.f32.mrf.mxu1 }
 0x811   :  { %v1452_v38 = vmul.f32 -1.442695, %v1355_v34  ;;  %v1362_v60 = vadd.f32 %v1310_v35, %v2190_v10 }
 0x812   :  { %v1312_v11 = vpop.f32.mrf.mxu0  ;;  %v1352_v49 = vpop.f32.mrf.mxu1 }
 0x813   :  { %1821 = vpow2.f32 %v1452_v38  ;;  %v1453_v12 = vmul.f32 -1.442695, %v1362_v60 }
 0x814   :  { %v1313_v46 = vpop.f32.mrf.mxu0  ;;  %v1701_v58 = vpop.f32.mrf.mxu1 }
 0x815   :  { %1823 = vpow2.f32 %v1453_v12 }
 0x820   :  { %v1822_v54 = vpop.eup %1821 }
 0x821   :  { %v1359_v62 = vadd.f32 1.0, %v1822_v54 }
 0x822   :  { %v1824_v4 = vpop.eup %1823 }
 0x823   :  { %1825 = vrcp.f32 %v1359_v62  ;;  %v1366_v51 = vadd.f32 1.0, %v1824_v4 }
 0x830   :  { %v1826_v61 = vpop.eup %1825 }
 0x831   :  { %v1370_v1 = vmul.f32 %v1826_v61, %v1369_v44 }
 0x833   :  { %v1371_v53 = vadd.f32 %v1370_v1, %v2487_v28 }
 0x835   :  { %1827 = vtanh.f32 %v1371_v53 }
 0x836   :  { %1829 = vrcp.f32 %v1366_v51 }
 0x842   :  { %v1828_v63 = vpop.eup %1827 }
 0x843   :  { %v1373_v2 = vsub.f32 %v1264_v29, %v1828_v63  ;;  %v1830_v52 = vpop.eup %1829 }
 0x845   :  { %v1374_v47 = vmul.f32 %v1830_v52, %v1373_v2 }
 0x847   :  { %v1375_v10 = vadd.f32 %v1828_v63, %v1374_v47 }
 0x849   :  { %v1376_v6 = vpack.c.bf16 %v1375_v10, %v1375_v10 }
 0x84b   :  { %1454 = vst [vmem:[%s2473_s5 + $0x1c] sm:$0xf] %v1376_v6 }
 0x84c   :  { %1384 = vsyncpa [#allocation5], 1 }
 0x84d   :  { %1385 = vsyncpa [#allocation7], 1 }
 0x84e   :  { %1386 = vsyncpa [#allocation10], 1 }

// kernel: gru_forward.4
= control target key start
LH: loop header
LB: loop body
LE: loop exit
PB: predicated region body
PF: predicated region fallthrough
CT: control target
= control target key end

     0   :  { %10 = vsyncpa [#allocation5], 0  ;;  %s1997_s18 = smov [#allocation4]   ;;  %s2557_s0 = inlined_call_operand.vmem [shape: bf16[64,128], index: 0, kind: input, shape index: {}]   ;;  %s2558_s1 = inlined_call_operand.vmem [shape: bf16[128,384], index: 1, kind: input, shape index: {}]   ;;  %s2559_s2 = inlined_call_operand.hbm [shape: bf16[128,384], index: 2, kind: input, shape index: {}]   ;;  %s2560_s3 = inlined_call_operand.vmem [shape: f32[1,384], index: 3, kind: input, shape index: {}]   ;;  %s2561_s4 = inlined_call_operand.vmem [shape: f32[1,128], index: 4, kind: input, shape index: {}]   ;;  %s2562_s5 = inlined_call_operand.vmem [shape: f32[8,128], index: 5, kind: output, shape index: {}]  }
   0x1   :  { %s20_s19 = sshll.u32 %s1997_s18, 4  ;;  %s21_s19 = int_to_ptr.vmem [resolvable:$true] %s20_s19 }
   0x2   :  { %s1983_s20 = scalar_lea.vmem %s21_s19, 3072  ;;  %p1988_p1 = scmp.lt.s32.totalorder %s21_s19, %s21_s19 }
   0x3   :  { %p1984_p0 = scmp.ne.s32.totalorder %s21_s19, %s1983_s20  ;;  %p1989_p2 = scmp.lt.s32.totalorder %s1983_s20, %s1983_s20 }
   0x5   :  { %p1990_p3 = por %p1989_p2, %p1988_p1 }
   0x7   :  { %p1991_p4 = pnand %p1990_p3, %p1984_p0 }
   0x9   :  { %1994 = shalt.err (!%p1991_p4)
}
   0xa   :  { %s1998_s21 = smov 192   ;;  %s1999_s22 = smov 12  }
   0xb   :  { %26 = dma.hbm_to_vmem [thread:$0]  %s2559_s2, 3072, %s21_s19, [#allocation5], %s1998_s21, %s1998_s21, %s1999_s22  }
   0xc   :  { %1995 = dma.done.wait [#allocation5], 3072  }
   0xd   :  { %1996 = vsyncadd [#allocation5], 4294964224  ;;  %v2563_v0 = vmov 0   ;;  %v1809_v1 = vld [vmem:[%s2558_s1 + $0xac] ss:$12 sps:$4 sm:$0xff]   ;;  %v1835_v12 = vld [vmem:[%s2557_s0] sm:$0xff]   ;;  %v82_v55 = vlaneseq }
   0xe   :  { %281 = vmatprep.mubr.bf16.mxu0 %v2563_v0  ;;  %v1811_v2 = vld [vmem:[%s2558_s1 + $0xa8] ss:$12 sps:$4 sm:$0xff]   ;;  %249 = vmatprep.subr.bf16.mxu0 %v1809_v1  ;;  %v1814_v4 = vld [vmem:[%s2558_s1 + $0x90] ss:$12 sps:$4 sm:$0xff]   ;;  %v1817_v6 = vld [vmem:[%s2558_s1 + $0x78] ss:$12 sps:$4 sm:$0xff]  }
   0xf   :  { %v1812_v3 = vld [vmem:[%s2558_s1 + $0x94] ss:$12 sps:$4 sm:$0xff]   ;;  %250 = vmatpush1.bf16.msra.mxu0 %v1811_v2  ;;  %v1815_v5 = vld [vmem:[%s2558_s1 + $0x7c] ss:$12 sps:$4 sm:$0xff]   ;;  %v1818_v7 = vld [vmem:[%s2558_s1 + $0x64] ss:$12 sps:$4 sm:$0xff]   ;;  %1634 = vmatprep.mubr.bf16.mxu1 %v1835_v12 }
  0x10   :  { %251 = vmatprep.subr.bf16.mxu0 %v1812_v3  ;;  %v1830_v8 = vld [vmem:[%s2558_s1 + $0xb0] ss:$12 sps:$4 sm:$0xff]   ;;  %v1820_v9 = vld [vmem:[%s2558_s1 + $0x60] ss:$12 sps:$4 sm:$0xff]   ;;  %v1834_v11 = vld [vmem:[%s2558_s1 + $0x98] ss:$12 sps:$4 sm:$0xff]  }
  0x11   :  { %v1821_v10 = vld [vmem:[%s2558_s1 + $0x4c] ss:$12 sps:$4 sm:$0xff]   ;;  %1618 = vmatprep.subr.bf16.mxu1 %v1830_v8  ;;  %v1823_v13 = vld [vmem:[%s2558_s1 + $0x48] ss:$12 sps:$4 sm:$0xff]   ;;  %v1826_v17 = vld [vmem:[%s2558_s1 + $0x30] ss:$12 sps:$4 sm:$0xff]  }
  0x12   :  { %1619 = vmatpush3.bf16.msra.mxu1 %v1830_v8  ;;  %v1839_v14 = vld [vmem:[%s2558_s1 + $0x80] ss:$12 sps:$4 sm:$0xff]   ;;  %v1843_v16 = vld [vmem:[%s2558_s1 + $0x68] ss:$12 sps:$4 sm:$0xff]   ;;  %v1848_v19 = vld [vmem:[%s2558_s1 + $0x50] ss:$12 sps:$4 sm:$0xff]  }
  0x13   :  { %252 = vmatpush1.bf16.msra.mxu0 %v1814_v4  ;;  %1620 = vmatprep.subr.bf16.mxu1 %v1834_v11  ;;  %v1824_v15 = vld [vmem:[%s2558_s1 + $0x34] ss:$12 sps:$4 sm:$0xff]   ;;  %v1827_v18 = vld [vmem:[%s2558_s1 + $0x1c] ss:$12 sps:$4 sm:$0xff]   ;;  %v1829_v20 = vld [vmem:[%s2558_s1 + $0x18] ss:$12 sps:$4 sm:$0xff]  }
  0x14   :  { %253 = vmatprep.subr.bf16.mxu0 %v1815_v5  ;;  %v1831_v21 = vld [vmem:[%s2558_s1 + $0x4] ss:$12 sps:$4 sm:$0xff]   ;;  %v1833_v23 = vld [vmem:[%s2558_s1] ss:$12 sps:$4 sm:$0xff]   ;;  %v2112_v26 = vld [vmem:[#allocation4 + $0xa8] ss:$12 sps:$4 sm:$0xff]  }
  0x15   :  { %v1852_v22 = vld [vmem:[%s2558_s1 + $0x38] ss:$12 sps:$4 sm:$0xff]   ;;  %v1857_v25 = vld [vmem:[%s2558_s1 + $0x20] ss:$12 sps:$4 sm:$0xff]   ;;  %v1861_v28 = vld [vmem:[%s2558_s1 + $0x8] ss:$12 sps:$4 sm:$0xff]  }
  0x16   :  { %1621 = vmatpush3.bf16.msra.mxu1 %v1834_v11  ;;  %v2107_v24 = vld [vmem:[#allocation4 + $0xac] ss:$12 sps:$4 sm:$0xff]   ;;  %v2115_v27 = vld [vmem:[#allocation4 + $0x94] ss:$12 sps:$4 sm:$0xff]   ;;  %v2121_v29 = vld [vmem:[#allocation4 + $0x90] ss:$12 sps:$4 sm:$0xff]  }
  0x17   :  { %254 = vmatpush1.bf16.msra.mxu0 %v1817_v6  ;;  %1622 = vmatprep.subr.bf16.mxu1 %v1839_v14  ;;  %v2125_v30 = vld [vmem:[#allocation4 + $0x7c] ss:$12 sps:$4 sm:$0xff]   ;;  %v2131_v32 = vld [vmem:[#allocation4 + $0x78] ss:$12 sps:$4 sm:$0xff]   ;;  %v2565_v35 = vmov 0.0   ;;  %v1853_v37 = vld [vmem:[%s2557_s0 + $0x10] sm:$0xff]  }
  0x18   :  { %255 = vmatprep.subr.bf16.mxu0 %v1818_v7  ;;  %v1844_v31 = vld [vmem:[%s2557_s0 + $0x8] sm:$0xff]   ;;  %v2134_v33 = vld [vmem:[#allocation4 + $0x64] ss:$12 sps:$4 sm:$0xff]   ;;  %v2157_v41 = vld [vmem:[#allocation4 + $0x34] ss:$12 sps:$4 sm:$0xff]   ;;  %vm2002_vm0 = vmmov 0  }
  0x19   :  { %v2136_v34 = vld [vmem:[#allocation4 + $0xb0] ss:$12 sps:$4 sm:$0xff]   ;;  %v2140_v36 = vld [vmem:[#allocation4 + $0x60] ss:$12 sps:$4 sm:$0xff]   ;;  %v2150_v39 = vld [vmem:[#allocation4 + $0x98] ss:$12 sps:$4 sm:$0xff]  }
  0x1a   :  { %1623 = vmatpush3.bf16.msra.mxu1 %v1839_v14  ;;  %v2147_v38 = vld [vmem:[#allocation4 + $0x4c] ss:$12 sps:$4 sm:$0xff]   ;;  %v2154_v40 = vld [vmem:[#allocation4 + $0x48] ss:$12 sps:$4 sm:$0xff]   ;;  %v2167_v44 = vld [vmem:[#allocation4 + $0x30] ss:$12 sps:$4 sm:$0xff]  }
  0x1b   :  { %256 = vmatpush1.bf16.msra.mxu0 %v1820_v9  ;;  %1624 = vmatprep.subr.bf16.mxu1 %v1843_v16  ;;  %v2160_v42 = vld [vmem:[#allocation4 + $0x80] ss:$12 sps:$4 sm:$0xff]   ;;  %v1862_v43 = vld [vmem:[%s2557_s0 + $0x18] sm:$0xff]   ;;  %v2174_v46 = vld [vmem:[#allocation4 + $0x68] ss:$12 sps:$4 sm:$0xff]   ;;  %v2003_v53 = vmov 0.0|0.0  }
  0x1c   :  { %257 = vmatprep.subr.bf16.mxu0 %v1821_v10  ;;  %v2171_v45 = vld [vmem:[#allocation4 + $0x1c] ss:$12 sps:$4 sm:$0xff]   ;;  %v2180_v47 = vld [vmem:[#allocation4 + $0x18] ss:$12 sps:$4 sm:$0xff]   ;;  %v2190_v50 = vld [vmem:[#allocation4] ss:$12 sps:$4 sm:$0xff]  }
  0x1d   :  { %v2183_v48 = vld [vmem:[#allocation4 + $0x4] ss:$12 sps:$4 sm:$0xff]   ;;  %v2201_v52 = vld [vmem:[#allocation4 + $0x20] ss:$12 sps:$4 sm:$0xff]   ;;  %v2208_v54 = vld [vmem:[#allocation4 + $0x8] ss:$12 sps:$4 sm:$0xff]  }
  0x1e   :  { %1625 = vmatpush3.bf16.msra.mxu1 %v1843_v16  ;;  %v2186_v49 = vld [vmem:[#allocation4 + $0x50] ss:$12 sps:$4 sm:$0xff]   ;;  %v2195_v51 = vld [vmem:[#allocation4 + $0x38] ss:$12 sps:$4 sm:$0xff]   ;;  %v83_v56 = vshrl.u32 %v82_v55, 7 }
  0x1f   :  { %258 = vmatpush1.bf16.msra.mxu0 %v1823_v13  ;;  %1626 = vmatprep.subr.bf16.mxu1 %v1848_v19  ;;  %v80_v58 = vld [vmem:[%s2560_s3] sm:$0x7] }
  0x20   :  { %259 = vmatprep.subr.bf16.mxu0 %v1824_v15  ;;  %v84_v57 = vsub.s32 0, %v83_v56  ;;  %v88_v60 = vsub.s32 1, %v83_v56  ;;  %v92_v63 = vsub.s32 2, %v83_v56 }
  0x22   :  { %1627 = vmatpush3.bf16.msra.mxu1 %v1848_v19  ;;  %v85_v62 = vrot.slane %v80_v58, %v84_v57  ;;  %v89_v2 = vrot.slane %v80_v58, %v88_v60  ;;  %v2252_v6 = vrot.slane %v80_v58, %v92_v63 }
  0x23   :  { %260 = vmatpush1.bf16.msra.mxu0 %v1826_v17  ;;  %1628 = vmatprep.subr.bf16.mxu1 %v1852_v22 }
  0x24   :  { %261 = vmatprep.subr.bf16.mxu0 %v1827_v18 }
  0x26   :  { %1629 = vmatpush3.bf16.msra.mxu1 %v1852_v22 }
  0x27   :  { %262 = vmatpush1.bf16.msra.mxu0 %v1829_v20  ;;  %1630 = vmatprep.subr.bf16.mxu1 %v1857_v25 }
  0x28   :  { %263 = vmatprep.subr.bf16.mxu0 %v1831_v21 }
  0x2a   :  { %1631 = vmatpush3.bf16.msra.mxu1 %v1857_v25 }
  0x2b   :  { %264 = vmatpush1.bf16.msra.mxu0 %v1833_v23  ;;  %1632 = vmatprep.subr.bf16.mxu1 %v1861_v28 }
  0x2c   :  { %586 = vmatprep.subr.bf16.mxu0 %v2107_v24 }
  0x2e   :  { %282 = vmatmul.mubr.bf16.vlgmr.msra.gmra.mxu0 %v1835_v12  ;;  %1633 = vmatpush3.bf16.msra.mxu1 %v1861_v28 }
  0x2f   :  { %587 = vmatpush1.bf16.msra.mxu0 %v2112_v26  ;;  %291 = vmatprep.mubr.bf16.mxu0 %v2563_v0 }
  0x30   :  { %588 = vmatprep.subr.bf16.mxu0 %v2115_v27  ;;  %1642 = vmatprep.subr.bf16.mxu1 %v2565_v35 }
  0x31   :  { %1635 = vmatmul.mubr.bf16.vlgmr.msra.gmra.mxu1 %v1844_v31 }
  0x32   :  { %1643 = vmatpush3.bf16.msra.mxu1 %v2136_v34  ;;  %1638 = vmatprep.mubr.bf16.mxu1 %v1853_v37 }
  0x33   :  { %589 = vmatpush1.bf16.msra.mxu0 %v2121_v29  ;;  %1644 = vmatprep.subr.bf16.mxu1 %v2565_v35 }
  0x34   :  { %590 = vmatprep.subr.bf16.mxu0 %v2125_v30 }
  0x36   :  { %292 = vmatmul.mubr.bf16.gmra.mxu0 %v1844_v31  ;;  %1645 = vmatpush3.bf16.msra.mxu1 %v2150_v39 }
  0x37   :  { %591 = vmatpush1.bf16.msra.mxu0 %v2131_v32  ;;  %301 = vmatprep.mubr.bf16.mxu0 %v2563_v0 }
  0x38   :  { %592 = vmatprep.subr.bf16.mxu0 %v2134_v33  ;;  %1646 = vmatprep.subr.bf16.mxu1 %v2565_v35 }
  0x39   :  { %1639 = vmatmul.mubr.bf16.gmra.mxu1 %v1862_v43 }
  0x3a   :  { %1647 = vmatpush3.bf16.msra.mxu1 %v2160_v42  ;;  %1658 = vmatprep.mubr.msk.bf16.mxu1 %vm2002_vm0, %v2565_v35 }
  0x3b   :  { %593 = vmatpush1.bf16.msra.mxu0 %v2140_v36  ;;  %1648 = vmatprep.subr.bf16.mxu1 %v2565_v35 }
  0x3c   :  { %594 = vmatprep.subr.bf16.mxu0 %v2147_v38 }
  0x3e   :  { %302 = vmatmul.mubr.bf16.gmra.mxu0 %v1853_v37  ;;  %1649 = vmatpush3.bf16.msra.mxu1 %v2174_v46 }
  0x3f   :  { %595 = vmatpush1.bf16.msra.mxu0 %v2154_v40  ;;  %311 = vmatprep.mubr.bf16.mxu0 %v2563_v0 }
  0x40   :  { %596 = vmatprep.subr.bf16.mxu0 %v2157_v41  ;;  %1650 = vmatprep.subr.bf16.mxu1 %v2565_v35 }
  0x42   :  { %1651 = vmatpush3.bf16.msra.mxu1 %v2186_v49 }
  0x43   :  { %597 = vmatpush1.bf16.msra.mxu0 %v2167_v44  ;;  %1652 = vmatprep.subr.bf16.mxu1 %v2565_v35 }
  0x44   :  { %598 = vmatprep.subr.bf16.mxu0 %v2171_v45 }
  0x46   :  { %312 = vmatmul.mubr.bf16.gmra.mxu0 %v1862_v43  ;;  %1653 = vmatpush3.bf16.msra.mxu1 %v2195_v51 }
  0x47   :  { %599 = vmatpush1.bf16.msra.mxu0 %v2180_v47  ;;  %618 = vmatprep.mubr.bf16.mxu0 %v2563_v0 }
  0x48   :  { %600 = vmatprep.subr.bf16.mxu0 %v2183_v48  ;;  %1654 = vmatprep.subr.bf16.mxu1 %v2565_v35 }
  0x4a   :  { %1655 = vmatpush3.bf16.msra.mxu1 %v2201_v52 }
  0x4b   :  { %601 = vmatpush1.bf16.msra.mxu0 %v2190_v50  ;;  %1656 = vmatprep.subr.bf16.mxu1 %v2565_v35 }
  0x4c   :  { %695 = vmatprep.subr.bf16.mxu0 %v2107_v24 }
  0x4e   :  { %619 = vmatmul.mubr.bf16.vlgmr.msra.gmra.mxu0 %v2003_v53  ;;  %1657 = vmatpush3.bf16.msra.mxu1 %v2208_v54 }
  0x4f   :  { %696 = vmatpush1.bf16.msra.mxu0 %v2112_v26  ;;  %727 = vmatprep.mubr.bf16.mxu0 %v2563_v0 }
  0x50   :  { %697 = vmatprep.subr.bf16.mxu0 %v2115_v27  ;;  %1662 = vmatprep.subr.bf16.mxu1 %v2565_v35 }
  0x51   :  { %1659 = vmatmul.mubr.bf16.vlgmr.msra.gmra.mxu1 %v2003_v53 }
  0x52   :  { %1663 = vmatpush3.bf16.msra.mxu1 %v2136_v34  ;;  %1678 = vmatprep.mubr.msk.bf16.mxu1 %vm2002_vm0, %v2565_v35 }
  0x53   :  { %698 = vmatpush1.bf16.msra.mxu0 %v2121_v29  ;;  %1664 = vmatprep.subr.bf16.mxu1 %v2565_v35 }
  0x54   :  { %699 = vmatprep.subr.bf16.mxu0 %v2125_v30 }
  0x56   :  { %1665 = vmatpush3.bf16.msra.mxu1 %v2150_v39 }
  0x57   :  { %700 = vmatpush1.bf16.msra.mxu0 %v2131_v32  ;;  %1666 = vmatprep.subr.bf16.mxu1 %v2565_v35 }
  0x58   :  { %701 = vmatprep.subr.bf16.mxu0 %v2134_v33 }
  0x5a   :  { %1667 = vmatpush3.bf16.msra.mxu1 %v2160_v42 }
  0x5b   :  { %702 = vmatpush1.bf16.msra.mxu0 %v2140_v36  ;;  %1668 = vmatprep.subr.bf16.mxu1 %v2565_v35 }
  0x5c   :  { %703 = vmatprep.subr.bf16.mxu0 %v2147_v38 }
  0x5e   :  { %1669 = vmatpush3.bf16.msra.mxu1 %v2174_v46 }
  0x5f   :  { %704 = vmatpush1.bf16.msra.mxu0 %v2154_v40  ;;  %1670 = vmatprep.subr.bf16.mxu1 %v2565_v35 }
  0x60   :  { %705 = vmatprep.subr.bf16.mxu0 %v2157_v41 }
  0x62   :  { %1671 = vmatpush3.bf16.msra.mxu1 %v2186_v49 }
  0x63   :  { %706 = vmatpush1.bf16.msra.mxu0 %v2167_v44  ;;  %1672 = vmatprep.subr.bf16.mxu1 %v2565_v35 }
  0x64   :  { %707 = vmatprep.subr.bf16.mxu0 %v2171_v45 }
  0x66   :  { %1673 = vmatpush3.bf16.msra.mxu1 %v2195_v51 }
  0x67   :  { %708 = vmatpush1.bf16.msra.mxu0 %v2180_v47  ;;  %1674 = vmatprep.subr.bf16.mxu1 %v2565_v35 }
  0x68   :  { %709 = vmatprep.subr.bf16.mxu0 %v2183_v48 }
  0x6a   :  { %1675 = vmatpush3.bf16.msra.mxu1 %v2201_v52 }
  0x6b   :  { %710 = vmatpush1.bf16.msra.mxu0 %v2190_v50  ;;  %1676 = vmatprep.subr.bf16.mxu1 %v2565_v35 }
  0x6c   :  { %804 = vmatprep.subr.bf16.mxu0 %v2107_v24 }
  0x6e   :  { %1677 = vmatpush3.bf16.msra.mxu1 %v2208_v54 }
  0x6f   :  { %1682 = vmatprep.subr.bf16.mxu1 %v2565_v35 }
  0xee   :  { %v283_v59 = vpop.f32.mrf.mxu0 }
  0xf0   :  { %v285_v61 = vpop.f32.mrf.mxu0 }
  0xf1   :  { %v1636_v10 = vpop.f32.mrf.mxu1  ;;  %v286_v0 = vadd.f32 %v285_v61, %v89_v2 }
  0xf2   :  { %v287_v1 = vpop.f32.mrf.mxu0  ;;  %v2259_v12 = vadd.f32 %v1636_v10, %v2252_v6 }
  0xf3   :  { %v2248_v3 = vadd.f32 %v287_v1, %v85_v62  ;;  %v356_v14 = vpop.f32.mrf.mxu1 }
  0xf4   :  { %v289_v4 = vpop.f32.mrf.mxu0  ;;  %v357_v61 = vadd.f32 %v356_v14, %v2252_v6  ;;  %v2572_v14 = vmov 0  }
  0xf5   :  { %v2250_v5 = vadd.f32 %v289_v4, %v89_v2  ;;  %v1637_v17 = vpop.f32.mrf.mxu1 }
  0xf6   :  { %v293_v7 = vpop.f32.mrf.mxu0  ;;  %v2266_v19 = vadd.f32 %v1637_v17, %v2252_v6 }
  0xf7   :  { %v2254_v8 = vadd.f32 %v293_v7, %v85_v62  ;;  %v359_v21 = vpop.f32.mrf.mxu1 }
  0xf8   :  { %v295_v9 = vpop.f32.mrf.mxu0  ;;  %v2271_v23 = vadd.f32 %v359_v21, %v2252_v6  ;;  %v284_v21 = vadd.f32 %v283_v59, %v85_v62  ;;  %v2302_v59 = vld [vmem:[%s2561_s4] ss:$0 sm:$0xff] }
  0xf9   :  { %v2256_v11 = vadd.f32 %v295_v9, %v89_v2  ;;  %v1640_v28 = vpop.f32.mrf.mxu1 }
  0xfa   :  { %v297_v13 = vpop.f32.mrf.mxu0  ;;  %v2276_v37 = vadd.f32 %v1640_v28, %v2252_v6 }
  0xfb   :  { %v2261_v15 = vadd.f32 %v297_v13, %v85_v62  ;;  %v372_v53 = vpop.f32.mrf.mxu1 }
  0xfc   :  { %v299_v16 = vpop.f32.mrf.mxu0  ;;  %2567 = vst [vmem:[#allocation7_spill] sm:$0xff] %v2276_v37  ;;  %v2281_v56 = vadd.f32 %v372_v53, %v2252_v6 }
  0xfd   :  { %v2263_v18 = vadd.f32 %v299_v16, %v89_v2  ;;  %v1641_v58 = vpop.f32.mrf.mxu1 }
  0xfe   :  { %v303_v20 = vpop.f32.mrf.mxu0  ;;  %v2286_v63 = vadd.f32 %v1641_v58, %v2252_v6 }
  0xff   :  { %v2268_v22 = vadd.f32 %v303_v20, %v85_v62  ;;  %v375_v4 = vpop.f32.mrf.mxu1 }
 0x100   :  { %v305_v25 = vpop.f32.mrf.mxu0  ;;  %2568 = vst [vmem:[#allocation8_spill] sm:$0xff] %v2286_v63  ;;  %v2291_v9 = vadd.f32 %v375_v4, %v2252_v6  ;;  %v2571_v6 = vmov 0.0  }
 0x101   :  { %v2273_v31 = vadd.f32 %v305_v25, %v89_v2 }
 0x102   :  { %v307_v43 = vpop.f32.mrf.mxu0 }
 0x103   :  { %v2278_v55 = vadd.f32 %v307_v43, %v85_v62 }
 0x104   :  { %v309_v57 = vpop.f32.mrf.mxu0 }
 0x105   :  { %v2283_v60 = vadd.f32 %v309_v57, %v89_v2 }
 0x106   :  { %v313_v1 = vpop.f32.mrf.mxu0 }
 0x107   :  { %v2288_v7 = vadd.f32 %v313_v1, %v85_v62 }
 0x108   :  { %v315_v10 = vpop.f32.mrf.mxu0 }
 0x109   :  { %v2293_v13 = vadd.f32 %v315_v10, %v89_v2 }
 0x10a   :  { %v317_v16 = vpop.f32.mrf.mxu0 }
 0x10b   :  { %2569 = vst [vmem:[#allocation9_spill] sm:$0xff] %v2293_v13  ;;  %v2295_v17 = vadd.f32 %v317_v16, %v85_v62 }
 0x10c   :  { %v319_v20 = vpop.f32.mrf.mxu0 }
 0x10d   :  { %2570 = vst [vmem:[#allocation10_spill] sm:$0xff] %v2295_v17  ;;  %v2297_v25 = vadd.f32 %v319_v20, %v89_v2 }
 0x10e   :  { %v620_v28 = vpop.f32.mrf.mxu0 }
 0x10f   :  { %v667_v43 = vadd.f32 %v620_v28, %v284_v21 }
 0x110   :  { %v622_v53 = vpop.f32.mrf.mxu0 }
 0x111   :  { %v1518_v57 = vmul.f32 -1.442695, %v667_v43  ;;  %v661_v4 = vpop.f32.mrf.mxu1  ;;  %v674_v35 = vadd.f32 %v622_v53, %v286_v0 }
 0x112   :  { %v624_v58 = vpop.f32.mrf.mxu0  ;;  %v681_v62 = vadd.f32 %v2302_v59, %v661_v4 }
 0x113   :  { %1877 = vpow2.f32 %v1518_v57  ;;  %v1660_v63 = vpop.f32.mrf.mxu1  ;;  %v1519_v37 = vmul.f32 -1.442695, %v674_v35 }
 0x114   :  { %v625_v1 = vpop.f32.mrf.mxu0 }
 0x115   :  { %v664_v10 = vpop.f32.mrf.mxu1  ;;  %1879 = vpow2.f32 %v1519_v37 }
 0x117   :  { %v1661_v13 = vpop.f32.mrf.mxu1 }
 0x120   :  { %v1878_v16 = vpop.eup %1877 }
 0x121   :  { %v671_v17 = vadd.f32 1.0, %v1878_v16 }
 0x122   :  { %v1880_v20 = vpop.eup %1879 }
 0x123   :  { %1881 = vrcp.f32 %v671_v17  ;;  %v678_v2 = vadd.f32 1.0, %v1880_v20 }
 0x130   :  { %v1882_v21 = vpop.eup %1881 }
 0x131   :  { %v682_v0 = vmul.f32 %v1882_v21, %v681_v62 }
 0x133   :  { %v683_v63 = vadd.f32 %v682_v0, %v357_v61 }
 0x135   :  { %1883 = vtanh.f32 %v683_v63 }
 0x136   :  { %1885 = vrcp.f32 %v678_v2 }
 0x142   :  { %v1884_v35 = vpop.eup %1883 }
 0x143   :  { %v685_v13 = vsub.f32 0.0, %v1884_v35  ;;  %v1886_v37 = vpop.eup %1885 }
 0x145   :  { %v686_v17 = vmul.f32 %v1886_v37, %v685_v13 }
 0x147   :  { %v2306_v28 = vadd.f32 %v1884_v35, %v686_v17 }
 0x149   :  { %v694_v43 = vpack.c.bf16 %v2306_v28, %v2306_v28 }
 0x14b   :  { %728 = vmatmul.mubr.bf16.vlgmr.msra.gmra.mxu0 %v694_v43  ;;  %1679 = vmatmul.mubr.bf16.vlgmr.msra.gmra.mxu1 %v694_v43 }
 0x14c   :  { %805 = vmatpush1.bf16.msra.mxu0 %v2112_v26  ;;  %1683 = vmatpush3.bf16.msra.mxu1 %v2136_v34 }
 0x14d   :  { %806 = vmatprep.subr.bf16.mxu0 %v2115_v27  ;;  %1684 = vmatprep.subr.bf16.mxu1 %v2571_v6 }
 0x14e   :  { %836 = vmatprep.mubr.bf16.mxu0 %v2572_v14  ;;  %1698 = vmatprep.mubr.msk.bf16.mxu1 %vm2002_vm0, %v2571_v6 }
 0x150   :  { %807 = vmatpush1.bf16.msra.mxu0 %v2121_v29  ;;  %1685 = vmatpush3.bf16.msra.mxu1 %v2150_v39 }
 0x151   :  { %808 = vmatprep.subr.bf16.mxu0 %v2125_v30  ;;  %1686 = vmatprep.subr.bf16.mxu1 %v2571_v6 }
 0x154   :  { %809 = vmatpush1.bf16.msra.mxu0 %v2131_v32  ;;  %1687 = vmatpush3.bf16.msra.mxu1 %v2160_v42 }
 0x155   :  { %810 = vmatprep.subr.bf16.mxu0 %v2134_v33  ;;  %1688 = vmatprep.subr.bf16.mxu1 %v2571_v6 }
 0x158   :  { %811 = vmatpush1.bf16.msra.mxu0 %v2140_v36  ;;  %1689 = vmatpush3.bf16.msra.mxu1 %v2174_v46 }
 0x159   :  { %812 = vmatprep.subr.bf16.mxu0 %v2147_v38  ;;  %1690 = vmatprep.subr.bf16.mxu1 %v2571_v6 }
 0x15c   :  { %813 = vmatpush1.bf16.msra.mxu0 %v2154_v40  ;;  %1691 = vmatpush3.bf16.msra.mxu1 %v2186_v49 }
 0x15d   :  { %814 = vmatprep.subr.bf16.mxu0 %v2157_v41  ;;  %1692 = vmatprep.subr.bf16.mxu1 %v2571_v6 }
 0x160   :  { %815 = vmatpush1.bf16.msra.mxu0 %v2167_v44  ;;  %1693 = vmatpush3.bf16.msra.mxu1 %v2195_v51 }
 0x161   :  { %816 = vmatprep.subr.bf16.mxu0 %v2171_v45  ;;  %1694 = vmatprep.subr.bf16.mxu1 %v2571_v6 }
 0x164   :  { %817 = vmatpush1.bf16.msra.mxu0 %v2180_v47  ;;  %1695 = vmatpush3.bf16.msra.mxu1 %v2201_v52 }
 0x165   :  { %818 = vmatprep.subr.bf16.mxu0 %v2183_v48  ;;  %1696 = vmatprep.subr.bf16.mxu1 %v2571_v6 }
 0x168   :  { %819 = vmatpush1.bf16.msra.mxu0 %v2190_v50  ;;  %1697 = vmatpush3.bf16.msra.mxu1 %v2208_v54 }
 0x169   :  { %913 = vmatprep.subr.bf16.mxu0 %v2107_v24  ;;  %1702 = vmatprep.subr.bf16.mxu1 %v2571_v6 }
 0x20b   :  { %v729_v53 = vpop.f32.mrf.mxu0  ;;  %v770_v57 = vpop.f32.mrf.mxu1 }
 0x20c   :  { %v776_v58 = vadd.f32 %v729_v53, %v2248_v3  ;;  %v790_v13 = vadd.f32 %v2302_v59, %v770_v57 }
 0x20d   :  { %v731_v1 = vpop.f32.mrf.mxu0  ;;  %v1680_v4 = vpop.f32.mrf.mxu1 }
 0x20e   :  { %v1520_v10 = vmul.f32 -1.442695, %v776_v58  ;;  %v783_v61 = vadd.f32 %v731_v1, %v2250_v5 }
 0x20f   :  { %v733_v16 = vpop.f32.mrf.mxu0  ;;  %v773_v62 = vpop.f32.mrf.mxu1 }
 0x210   :  { %1887 = vpow2.f32 %v1520_v10  ;;  %v1521_v0 = vmul.f32 -1.442695, %v783_v61 }
 0x211   :  { %v734_v20 = vpop.f32.mrf.mxu0  ;;  %v1681_v21 = vpop.f32.mrf.mxu1 }
 0x212   :  { %1889 = vpow2.f32 %v1521_v0 }
 0x21d   :  { %v1888_v2 = vpop.eup %1887 }
 0x21e   :  { %v780_v63 = vadd.f32 1.0, %v1888_v2 }
 0x21f   :  { %v1890_v35 = vpop.eup %1889 }
 0x220   :  { %1891 = vrcp.f32 %v780_v63  ;;  %v787_v43 = vadd.f32 1.0, %v1890_v35 }
 0x22d   :  { %v1892_v37 = vpop.eup %1891 }
 0x22e   :  { %v791_v3 = vmul.f32 %v1892_v37, %v790_v13 }
 0x230   :  { %v792_v17 = vadd.f32 %v791_v3, %v2271_v23 }
 0x232   :  { %1893 = vtanh.f32 %v792_v17 }
 0x233   :  { %1895 = vrcp.f32 %v787_v43 }
 0x23f   :  { %v1894_v53 = vpop.eup %1893 }
 0x240   :  { %v794_v58 = vsub.f32 %v2306_v28, %v1894_v53  ;;  %v1896_v4 = vpop.eup %1895 }
 0x242   :  { %v795_v5 = vmul.f32 %v1896_v4, %v794_v58 }
 0x244   :  { %v2350_v1 = vadd.f32 %v1894_v53, %v795_v5 }
 0x246   :  { %v803_v10 = vpack.c.bf16 %v2350_v1, %v2350_v1 }
 0x248   :  { %837 = vmatmul.mubr.bf16.vlgmr.msra.gmra.mxu0 %v803_v10  ;;  %1699 = vmatmul.mubr.bf16.vlgmr.msra.gmra.mxu1 %v803_v10 }
 0x249   :  { %914 = vmatpush1.bf16.msra.mxu0 %v2112_v26  ;;  %1703 = vmatpush3.bf16.msra.mxu1 %v2136_v34 }
 0x24a   :  { %915 = vmatprep.subr.bf16.mxu0 %v2115_v27  ;;  %1704 = vmatprep.subr.bf16.mxu1 %v2571_v6 }
 0x24b   :  { %945 = vmatprep.mubr.bf16.mxu0 %v2572_v14  ;;  %1718 = vmatprep.mubr.msk.bf16.mxu1 %vm2002_vm0, %v2571_v6 }
 0x24d   :  { %916 = vmatpush1.bf16.msra.mxu0 %v2121_v29  ;;  %1705 = vmatpush3.bf16.msra.mxu1 %v2150_v39 }
 0x24e   :  { %917 = vmatprep.subr.bf16.mxu0 %v2125_v30  ;;  %1706 = vmatprep.subr.bf16.mxu1 %v2571_v6 }
 0x251   :  { %918 = vmatpush1.bf16.msra.mxu0 %v2131_v32  ;;  %1707 = vmatpush3.bf16.msra.mxu1 %v2160_v42 }
 0x252   :  { %919 = vmatprep.subr.bf16.mxu0 %v2134_v33  ;;  %1708 = vmatprep.subr.bf16.mxu1 %v2571_v6 }
 0x255   :  { %920 = vmatpush1.bf16.msra.mxu0 %v2140_v36  ;;  %1709 = vmatpush3.bf16.msra.mxu1 %v2174_v46 }
 0x256   :  { %921 = vmatprep.subr.bf16.mxu0 %v2147_v38  ;;  %1710 = vmatprep.subr.bf16.mxu1 %v2571_v6 }
 0x259   :  { %922 = vmatpush1.bf16.msra.mxu0 %v2154_v40  ;;  %1711 = vmatpush3.bf16.msra.mxu1 %v2186_v49 }
 0x25a   :  { %923 = vmatprep.subr.bf16.mxu0 %v2157_v41  ;;  %1712 = vmatprep.subr.bf16.mxu1 %v2571_v6 }
 0x25d   :  { %924 = vmatpush1.bf16.msra.mxu0 %v2167_v44  ;;  %1713 = vmatpush3.bf16.msra.mxu1 %v2195_v51 }
 0x25e   :  { %925 = vmatprep.subr.bf16.mxu0 %v2171_v45  ;;  %1714 = vmatprep.subr.bf16.mxu1 %v2571_v6 }
 0x261   :  { %926 = vmatpush1.bf16.msra.mxu0 %v2180_v47  ;;  %1715 = vmatpush3.bf16.msra.mxu1 %v2201_v52 }
 0x262   :  { %927 = vmatprep.subr.bf16.mxu0 %v2183_v48  ;;  %1716 = vmatprep.subr.bf16.mxu1 %v2571_v6 }
 0x265   :  { %928 = vmatpush1.bf16.msra.mxu0 %v2190_v50  ;;  %1717 = vmatpush3.bf16.msra.mxu1 %v2208_v54 }
 0x266   :  { %1022 = vmatprep.subr.bf16.mxu0 %v2107_v24  ;;  %1722 = vmatprep.subr.bf16.mxu1 %v2571_v6 }
 0x308   :  { %v838_v23 = vpop.f32.mrf.mxu0  ;;  %v879_v28 = vpop.f32.mrf.mxu1 }
 0x309   :  { %v885_v57 = vadd.f32 %v838_v23, %v2254_v8  ;;  %v899_v17 = vadd.f32 %v2302_v59, %v879_v28 }
 0x30a   :  { %v840_v16 = vpop.f32.mrf.mxu0  ;;  %v1700_v62 = vpop.f32.mrf.mxu1 }
 0x30b   :  { %v1522_v20 = vmul.f32 -1.442695, %v885_v57  ;;  %v892_v63 = vadd.f32 %v840_v16, %v2256_v11 }
 0x30c   :  { %v842_v21 = vpop.f32.mrf.mxu0  ;;  %v882_v61 = vpop.f32.mrf.mxu1 }
 0x30d   :  { %1897 = vpow2.f32 %v1522_v20  ;;  %v1523_v35 = vmul.f32 -1.442695, %v892_v63 }
 0x30e   :  { %v843_v0 = vpop.f32.mrf.mxu0  ;;  %v1701_v2 = vpop.f32.mrf.mxu1 }
 0x30f   :  { %1899 = vpow2.f32 %v1523_v35 }
 0x31a   :  { %v1898_v13 = vpop.eup %1897 }
 0x31b   :  { %v889_v37 = vadd.f32 1.0, %v1898_v13 }
 0x31c   :  { %v1900_v3 = vpop.eup %1899 }
 0x31d   :  { %1901 = vrcp.f32 %v889_v37  ;;  %v896_v58 = vadd.f32 1.0, %v1900_v3 }
 0x32a   :  { %v1902_v43 = vpop.eup %1901 }
 0x32b   :  { %v900_v8 = vmul.f32 %v1902_v43, %v899_v17 }
 0x32d   :  { %v901_v53 = vadd.f32 %v900_v8, %v2259_v12 }
 0x32f   :  { %1903 = vtanh.f32 %v901_v53 }
 0x330   :  { %1905 = vrcp.f32 %v896_v58 }
 0x33c   :  { %v1904_v4 = vpop.eup %1903 }
 0x33d   :  { %v903_v5 = vsub.f32 %v2350_v1, %v1904_v4  ;;  %v1906_v10 = vpop.eup %1905 }
 0x33f   :  { %v904_v11 = vmul.f32 %v1906_v10, %v903_v5 }
 0x341   :  { %v2394_v23 = vadd.f32 %v1904_v4, %v904_v11 }
 0x343   :  { %v912_v57 = vpack.c.bf16 %v2394_v23, %v2394_v23 }
 0x345   :  { %946 = vmatmul.mubr.bf16.vlgmr.msra.gmra.mxu0 %v912_v57  ;;  %1719 = vmatmul.mubr.bf16.vlgmr.msra.gmra.mxu1 %v912_v57 }
 0x346   :  { %1023 = vmatpush1.bf16.msra.mxu0 %v2112_v26  ;;  %1723 = vmatpush3.bf16.msra.mxu1 %v2136_v34 }
 0x347   :  { %1024 = vmatprep.subr.bf16.mxu0 %v2115_v27  ;;  %1724 = vmatprep.subr.bf16.mxu1 %v2571_v6 }
 0x348   :  { %1054 = vmatprep.mubr.bf16.mxu0 %v2572_v14  ;;  %1738 = vmatprep.mubr.msk.bf16.mxu1 %vm2002_vm0, %v2571_v6 }
 0x34a   :  { %1025 = vmatpush1.bf16.msra.mxu0 %v2121_v29  ;;  %1725 = vmatpush3.bf16.msra.mxu1 %v2150_v39 }
 0x34b   :  { %1026 = vmatprep.subr.bf16.mxu0 %v2125_v30  ;;  %1726 = vmatprep.subr.bf16.mxu1 %v2571_v6 }
 0x34e   :  { %1027 = vmatpush1.bf16.msra.mxu0 %v2131_v32  ;;  %1727 = vmatpush3.bf16.msra.mxu1 %v2160_v42 }
 0x34f   :  { %1028 = vmatprep.subr.bf16.mxu0 %v2134_v33  ;;  %1728 = vmatprep.subr.bf16.mxu1 %v2571_v6 }
 0x352   :  { %1029 = vmatpush1.bf16.msra.mxu0 %v2140_v36  ;;  %1729 = vmatpush3.bf16.msra.mxu1 %v2174_v46 }
 0x353   :  { %1030 = vmatprep.subr.bf16.mxu0 %v2147_v38  ;;  %1730 = vmatprep.subr.bf16.mxu1 %v2571_v6 }
 0x356   :  { %1031 = vmatpush1.bf16.msra.mxu0 %v2154_v40  ;;  %1731 = vmatpush3.bf16.msra.mxu1 %v2186_v49 }
 0x357   :  { %1032 = vmatprep.subr.bf16.mxu0 %v2157_v41  ;;  %1732 = vmatprep.subr.bf16.mxu1 %v2571_v6 }
 0x35a   :  { %1033 = vmatpush1.bf16.msra.mxu0 %v2167_v44  ;;  %1733 = vmatpush3.bf16.msra.mxu1 %v2195_v51 }
 0x35b   :  { %1034 = vmatprep.subr.bf16.mxu0 %v2171_v45  ;;  %1734 = vmatprep.subr.bf16.mxu1 %v2571_v6 }
 0x35e   :  { %1035 = vmatpush1.bf16.msra.mxu0 %v2180_v47  ;;  %1735 = vmatpush3.bf16.msra.mxu1 %v2201_v52 }
 0x35f   :  { %1036 = vmatprep.subr.bf16.mxu0 %v2183_v48  ;;  %1736 = vmatprep.subr.bf16.mxu1 %v2571_v6 }
 0x362   :  { %1037 = vmatpush1.bf16.msra.mxu0 %v2190_v50  ;;  %1737 = vmatpush3.bf16.msra.mxu1 %v2208_v54 }
 0x363   :  { %1131 = vmatprep.subr.bf16.mxu0 %v2107_v24  ;;  %1742 = vmatprep.subr.bf16.mxu1 %v2571_v6 }
 0x405   :  { %v947_v12 = vpop.f32.mrf.mxu0  ;;  %v988_v1 = vpop.f32.mrf.mxu1 }
 0x406   :  { %v994_v28 = vadd.f32 %v947_v12, %v2261_v15  ;;  %v1008_v17 = vadd.f32 %v2302_v59, %v988_v1 }
 0x407   :  { %v949_v16 = vpop.f32.mrf.mxu0  ;;  %v1720_v62 = vpop.f32.mrf.mxu1 }
 0x408   :  { %v1524_v20 = vmul.f32 -1.442695, %v994_v28  ;;  %v1001_v63 = vadd.f32 %v949_v16, %v2263_v18 }
 0x409   :  { %v951_v21 = vpop.f32.mrf.mxu0  ;;  %v991_v61 = vpop.f32.mrf.mxu1 }
 0x40a   :  { %1907 = vpow2.f32 %v1524_v20  ;;  %v1525_v35 = vmul.f32 -1.442695, %v1001_v63 }
 0x40b   :  { %v952_v0 = vpop.f32.mrf.mxu0  ;;  %v1721_v2 = vpop.f32.mrf.mxu1 }
 0x40c   :  { %1909 = vpow2.f32 %v1525_v35 }
 0x417   :  { %v1908_v13 = vpop.eup %1907 }
 0x418   :  { %v998_v37 = vadd.f32 1.0, %v1908_v13 }
 0x419   :  { %v1910_v3 = vpop.eup %1909 }
 0x41a   :  { %1911 = vrcp.f32 %v998_v37  ;;  %v1005_v53 = vadd.f32 1.0, %v1910_v3 }
 0x427   :  { %v1912_v43 = vpop.eup %1911 }
 0x428   :  { %v1009_v15 = vmul.f32 %v1912_v43, %v1008_v17 }
 0x42a   :  { %v1010_v8 = vadd.f32 %v1009_v15, %v2266_v19 }
 0x42c   :  { %1913 = vtanh.f32 %v1010_v8 }
 0x42d   :  { %1915 = vrcp.f32 %v1005_v53 }
 0x439   :  { %v1914_v58 = vpop.eup %1913 }
 0x43a   :  { %v1012_v4 = vsub.f32 %v2394_v23, %v1914_v58  ;;  %v1916_v5 = vpop.eup %1915 }
 0x43c   :  { %v1013_v18 = vmul.f32 %v1916_v5, %v1012_v4 }
 0x43e   :  { %v2438_v10 = vadd.f32 %v1914_v58, %v1013_v18 }
 0x440   :  { %v1021_v11 = vpack.c.bf16 %v2438_v10, %v2438_v10 }
 0x442   :  { %1055 = vmatmul.mubr.bf16.vlgmr.msra.gmra.mxu0 %v1021_v11  ;;  %1739 = vmatmul.mubr.bf16.vlgmr.msra.gmra.mxu1 %v1021_v11 }
 0x443   :  { %1132 = vmatpush1.bf16.msra.mxu0 %v2112_v26  ;;  %1743 = vmatpush3.bf16.msra.mxu1 %v2136_v34 }
 0x444   :  { %1133 = vmatprep.subr.bf16.mxu0 %v2115_v27  ;;  %1744 = vmatprep.subr.bf16.mxu1 %v2571_v6 }
 0x445   :  { %1163 = vmatprep.mubr.bf16.mxu0 %v2572_v14  ;;  %1758 = vmatprep.mubr.msk.bf16.mxu1 %vm2002_vm0, %v2571_v6 }
 0x447   :  { %1134 = vmatpush1.bf16.msra.mxu0 %v2121_v29  ;;  %1745 = vmatpush3.bf16.msra.mxu1 %v2150_v39 }
 0x448   :  { %1135 = vmatprep.subr.bf16.mxu0 %v2125_v30  ;;  %1746 = vmatprep.subr.bf16.mxu1 %v2571_v6 }
 0x44b   :  { %1136 = vmatpush1.bf16.msra.mxu0 %v2131_v32  ;;  %1747 = vmatpush3.bf16.msra.mxu1 %v2160_v42 }
 0x44c   :  { %1137 = vmatprep.subr.bf16.mxu0 %v2134_v33  ;;  %1748 = vmatprep.subr.bf16.mxu1 %v2571_v6 }
 0x44f   :  { %1138 = vmatpush1.bf16.msra.mxu0 %v2140_v36  ;;  %1749 = vmatpush3.bf16.msra.mxu1 %v2174_v46 }
 0x450   :  { %1139 = vmatprep.subr.bf16.mxu0 %v2147_v38  ;;  %1750 = vmatprep.subr.bf16.mxu1 %v2571_v6 }
 0x453   :  { %1140 = vmatpush1.bf16.msra.mxu0 %v2154_v40  ;;  %1751 = vmatpush3.bf16.msra.mxu1 %v2186_v49 }
 0x454   :  { %1141 = vmatprep.subr.bf16.mxu0 %v2157_v41  ;;  %1752 = vmatprep.subr.bf16.mxu1 %v2571_v6 }
 0x457   :  { %1142 = vmatpush1.bf16.msra.mxu0 %v2167_v44  ;;  %1753 = vmatpush3.bf16.msra.mxu1 %v2195_v51 }
 0x458   :  { %1143 = vmatprep.subr.bf16.mxu0 %v2171_v45  ;;  %1754 = vmatprep.subr.bf16.mxu1 %v2571_v6 }
 0x45b   :  { %1144 = vmatpush1.bf16.msra.mxu0 %v2180_v47  ;;  %1755 = vmatpush3.bf16.msra.mxu1 %v2201_v52 }
 0x45c   :  { %1145 = vmatprep.subr.bf16.mxu0 %v2183_v48  ;;  %1756 = vmatprep.subr.bf16.mxu1 %v2571_v6 }
 0x45f   :  { %1146 = vmatpush1.bf16.msra.mxu0 %v2190_v50  ;;  %1757 = vmatpush3.bf16.msra.mxu1 %v2208_v54 }
 0x460   :  { %1240 = vmatprep.subr.bf16.mxu0 %v2107_v24  ;;  %1762 = vmatprep.subr.bf16.mxu1 %v2571_v6 }
 0x502   :  { %v1056_v19 = vpop.f32.mrf.mxu0  ;;  %v1097_v23 = vpop.f32.mrf.mxu1 }
 0x503   :  { %v1103_v57 = vadd.f32 %v1056_v19, %v2268_v22  ;;  %v1117_v35 = vadd.f32 %v2302_v59, %v1097_v23  ;;  %v1958_v23 = vld [vmem:[#allocation4 + $0xa8] ss:$12 sps:$4 sm:$0xff]  }
 0x504   :  { %v1058_v12 = vpop.f32.mrf.mxu0  ;;  %v1740_v1 = vpop.f32.mrf.mxu1 }
 0x505   :  { %v1526_v28 = vmul.f32 -1.442695, %v1103_v57  ;;  %v1110_v61 = vadd.f32 %v1058_v12, %v2273_v31  ;;  %v1959_v57 = vld [vmem:[#allocation4 + $0xb0] ss:$12 sps:$4 sm:$0xff]   ;;  %v1962_v1 = vld [vmem:[#allocation4 + $0x98] ss:$12 sps:$4 sm:$0xff]  }
 0x506   :  { %v1060_v16 = vpop.f32.mrf.mxu0  ;;  %v1100_v62 = vpop.f32.mrf.mxu1  ;;  %v1961_v12 = vld [vmem:[#allocation4 + $0x90] ss:$12 sps:$4 sm:$0xff]  }
 0x507   :  { %1917 = vpow2.f32 %v1526_v28  ;;  %v1527_v0 = vmul.f32 -1.442695, %v1110_v61  ;;  %v1963_v28 = vld [vmem:[#allocation4 + $0x7c] ss:$12 sps:$4 sm:$0xff]   ;;  %v1964_v16 = vld [vmem:[#allocation4 + $0x78] ss:$12 sps:$4 sm:$0xff]  }
 0x508   :  { %v1061_v20 = vpop.f32.mrf.mxu0  ;;  %v1741_v21 = vpop.f32.mrf.mxu1  ;;  %v1965_v62 = vld [vmem:[#allocation4 + $0x80] ss:$12 sps:$4 sm:$0xff]   ;;  %v1969_v61 = vld [vmem:[#allocation4 + $0x48] ss:$12 sps:$4 sm:$0xff]  }
 0x509   :  { %1919 = vpow2.f32 %v1527_v0  ;;  %v1966_v20 = vld [vmem:[#allocation4 + $0x64] ss:$12 sps:$4 sm:$0xff]   ;;  %v1968_v21 = vld [vmem:[#allocation4 + $0x4c] ss:$12 sps:$4 sm:$0xff]   ;;  %v1970_v0 = vld [vmem:[#allocation4 + $0x34] ss:$12 sps:$4 sm:$0xff]  }
 0x514   :  { %v1918_v2 = vpop.eup %1917 }
 0x515   :  { %v1107_v63 = vadd.f32 1.0, %v1918_v2  ;;  %v1971_v2 = vld [vmem:[#allocation4 + $0x30] ss:$12 sps:$4 sm:$0xff]  }
 0x516   :  { %v1920_v24 = vpop.eup %1919 }
 0x517   :  { %1921 = vrcp.f32 %v1107_v63  ;;  %v1114_v3 = vadd.f32 1.0, %v1920_v24  ;;  %v1972_v63 = vld [vmem:[#allocation4 + $0x1c] ss:$12 sps:$4 sm:$0xff]   ;;  %v1974_v24 = vld [vmem:[#allocation4 + $0x4] ss:$12 sps:$4 sm:$0xff]  }
 0x524   :  { %v1922_v13 = vpop.eup %1921 }
 0x525   :  { %v1118_v22 = vmul.f32 %v1922_v13, %v1117_v35 }
 0x527   :  { %v1119_v37 = vadd.f32 %v1118_v22, %v2281_v56 }
 0x529   :  { %1923 = vtanh.f32 %v1119_v37 }
 0x52a   :  { %1925 = vrcp.f32 %v1114_v3 }
 0x536   :  { %v1924_v17 = vpop.eup %1923 }
 0x537   :  { %v1121_v43 = vsub.f32 %v2438_v10, %v1924_v17  ;;  %v1926_v15 = vpop.eup %1925 }
 0x539   :  { %v1122_v31 = vmul.f32 %v1926_v15, %v1121_v43  ;;  %v2573_v15 = vld [vmem:[#allocation9_spill] sm:$0xff] }
 0x53b   :  { %v2482_v8 = vadd.f32 %v1924_v17, %v1122_v31 }
 0x53d   :  { %v1130_v53 = vpack.c.bf16 %v2482_v8, %v2482_v8 }
 0x53f   :  { %1164 = vmatmul.mubr.bf16.vlgmr.msra.gmra.mxu0 %v1130_v53  ;;  %1759 = vmatmul.mubr.bf16.vlgmr.msra.gmra.mxu1 %v1130_v53 }
 0x540   :  { %1241 = vmatpush1.bf16.msra.mxu0 %v2112_v26  ;;  %1763 = vmatpush3.bf16.msra.mxu1 %v2136_v34  ;;  %v1957_v26 = vld [vmem:[#allocation4 + $0xac] ss:$12 sps:$4 sm:$0xff]  }
 0x541   :  { %1242 = vmatprep.subr.bf16.mxu0 %v2115_v27  ;;  %1764 = vmatprep.subr.bf16.mxu1 %v2571_v6 }
 0x542   :  { %1272 = vmatprep.mubr.bf16.mxu0 %v2572_v14  ;;  %1778 = vmatprep.mubr.msk.bf16.mxu1 %vm2002_vm0, %v2571_v6 }
 0x544   :  { %1243 = vmatpush1.bf16.msra.mxu0 %v2121_v29  ;;  %1765 = vmatpush3.bf16.msra.mxu1 %v2150_v39 }
 0x545   :  { %1244 = vmatprep.subr.bf16.mxu0 %v2125_v30  ;;  %1766 = vmatprep.subr.bf16.mxu1 %v2571_v6 }
 0x548   :  { %1245 = vmatpush1.bf16.msra.mxu0 %v2131_v32  ;;  %1767 = vmatpush3.bf16.msra.mxu1 %v2160_v42 }
 0x549   :  { %1246 = vmatprep.subr.bf16.mxu0 %v2134_v33  ;;  %1768 = vmatprep.subr.bf16.mxu1 %v2571_v6 }
 0x54c   :  { %1247 = vmatpush1.bf16.msra.mxu0 %v2140_v36  ;;  %1769 = vmatpush3.bf16.msra.mxu1 %v2174_v46 }
 0x54d   :  { %1248 = vmatprep.subr.bf16.mxu0 %v2147_v38  ;;  %1770 = vmatprep.subr.bf16.mxu1 %v2571_v6 }
 0x550   :  { %1249 = vmatpush1.bf16.msra.mxu0 %v2154_v40  ;;  %1771 = vmatpush3.bf16.msra.mxu1 %v2186_v49 }
 0x551   :  { %1250 = vmatprep.subr.bf16.mxu0 %v2157_v41  ;;  %1772 = vmatprep.subr.bf16.mxu1 %v2571_v6 }
 0x554   :  { %1251 = vmatpush1.bf16.msra.mxu0 %v2167_v44  ;;  %1773 = vmatpush3.bf16.msra.mxu1 %v2195_v51 }
 0x555   :  { %1252 = vmatprep.subr.bf16.mxu0 %v2171_v45  ;;  %1774 = vmatprep.subr.bf16.mxu1 %v2571_v6 }
 0x558   :  { %1253 = vmatpush1.bf16.msra.mxu0 %v2180_v47  ;;  %1775 = vmatpush3.bf16.msra.mxu1 %v2201_v52 }
 0x559   :  { %1254 = vmatprep.subr.bf16.mxu0 %v2183_v48  ;;  %1776 = vmatprep.subr.bf16.mxu1 %v2571_v6 }
 0x55c   :  { %1255 = vmatpush1.bf16.msra.mxu0 %v2190_v50  ;;  %1777 = vmatpush3.bf16.msra.mxu1 %v2208_v54 }
 0x55d   :  { %1349 = vmatprep.subr.bf16.mxu0 %v1957_v26  ;;  %1782 = vmatprep.subr.bf16.mxu1 %v2571_v6 }
 0x5ff   :  { %v1165_v27 = vpop.f32.mrf.mxu0  ;;  %v1206_v29 = vpop.f32.mrf.mxu1 }
 0x600   :  { %v1212_v30 = vadd.f32 %v1165_v27, %v2278_v55  ;;  %v1226_v48 = vadd.f32 %v2302_v59, %v1206_v29  ;;  %v2574_v27 = vld [vmem:[#allocation7_spill] sm:$0xff] }
 0x601   :  { %v1167_v32 = vpop.f32.mrf.mxu0  ;;  %v1760_v33 = vpop.f32.mrf.mxu1 }
 0x602   :  { %v1528_v34 = vmul.f32 -1.442695, %v1212_v30  ;;  %v1219_v41 = vadd.f32 %v1167_v32, %v2283_v60 }
 0x603   :  { %v1169_v36 = vpop.f32.mrf.mxu0  ;;  %v1209_v38 = vpop.f32.mrf.mxu1 }
 0x604   :  { %1927 = vpow2.f32 %v1528_v34  ;;  %v1529_v42 = vmul.f32 -1.442695, %v1219_v41 }
 0x605   :  { %v1170_v39 = vpop.f32.mrf.mxu0  ;;  %v1761_v40 = vpop.f32.mrf.mxu1 }
 0x606   :  { %1929 = vpow2.f32 %v1529_v42  ;;  %v2575_v42 = vld [vmem:[#allocation10_spill] sm:$0xff] }
 0x611   :  { %v1928_v44 = vpop.eup %1927 }
 0x612   :  { %v1216_v45 = vadd.f32 1.0, %v1928_v44 }
 0x613   :  { %v1930_v47 = vpop.eup %1929 }
 0x614   :  { %1931 = vrcp.f32 %v1216_v45  ;;  %v1223_v4 = vadd.f32 1.0, %v1930_v47 }
 0x621   :  { %v1932_v56 = vpop.eup %1931 }
 0x622   :  { %v1227_v55 = vmul.f32 %v1932_v56, %v1226_v48 }
 0x624   :  { %v1228_v58 = vadd.f32 %v1227_v55, %v2291_v9  ;;  %v1960_v9 = vld [vmem:[#allocation4 + $0x94] ss:$12 sps:$4 sm:$0xff]  }
 0x626   :  { %1933 = vtanh.f32 %v1228_v58 }
 0x627   :  { %1935 = vrcp.f32 %v1223_v4 }
 0x633   :  { %v1934_v5 = vpop.eup %1933 }
 0x634   :  { %v1230_v18 = vsub.f32 %v2482_v8, %v1934_v5  ;;  %v1936_v10 = vpop.eup %1935 }
 0x636   :  { %v1231_v60 = vmul.f32 %v1936_v10, %v1230_v18 }
 0x638   :  { %v2525_v11 = vadd.f32 %v1934_v5, %v1231_v60 }
 0x63a   :  { %v1239_v19 = vpack.c.bf16 %v2525_v11, %v2525_v11 }
 0x63c   :  { %1273 = vmatmul.mubr.bf16.vlgmr.msra.gmra.mxu0 %v1239_v19  ;;  %1779 = vmatmul.mubr.bf16.vlgmr.msra.gmra.mxu1 %v1239_v19 }
 0x63d   :  { %1350 = vmatpush1.bf16.msra.mxu0 %v1958_v23  ;;  %1783 = vmatpush3.bf16.msra.mxu1 %v1959_v57 }
 0x63e   :  { %1351 = vmatprep.subr.bf16.mxu0 %v1960_v9  ;;  %1784 = vmatprep.subr.bf16.mxu1 %v2571_v6  ;;  %v2576_v9 = vld [vmem:[#allocation8_spill] sm:$0xff] }
 0x63f   :  { %1381 = vmatprep.mubr.bf16.mxu0 %v2572_v14  ;;  %1798 = vmatprep.mubr.msk.bf16.mxu1 %vm2002_vm0, %v2571_v6  ;;  %v1967_v14 = vld [vmem:[#allocation4 + $0x60] ss:$12 sps:$4 sm:$0xff]  }
 0x641   :  { %1352 = vmatpush1.bf16.msra.mxu0 %v1961_v12  ;;  %1785 = vmatpush3.bf16.msra.mxu1 %v1962_v1 }
 0x642   :  { %1353 = vmatprep.subr.bf16.mxu0 %v1963_v28  ;;  %1786 = vmatprep.subr.bf16.mxu1 %v2571_v6 }
 0x645   :  { %1354 = vmatpush1.bf16.msra.mxu0 %v1964_v16  ;;  %1787 = vmatpush3.bf16.msra.mxu1 %v1965_v62 }
 0x646   :  { %1355 = vmatprep.subr.bf16.mxu0 %v1966_v20  ;;  %1788 = vmatprep.subr.bf16.mxu1 %v2571_v6 }
 0x649   :  { %1356 = vmatpush1.bf16.msra.mxu0 %v1967_v14  ;;  %1789 = vmatpush3.bf16.msra.mxu1 %v2174_v46  ;;  %v1973_v46 = vld [vmem:[#allocation4 + $0x18] ss:$12 sps:$4 sm:$0xff]  }
 0x64a   :  { %1357 = vmatprep.subr.bf16.mxu0 %v1968_v21  ;;  %1790 = vmatprep.subr.bf16.mxu1 %v2571_v6 }
 0x64d   :  { %1358 = vmatpush1.bf16.msra.mxu0 %v1969_v61  ;;  %1791 = vmatpush3.bf16.msra.mxu1 %v2186_v49 }
 0x64e   :  { %1359 = vmatprep.subr.bf16.mxu0 %v1970_v0  ;;  %1792 = vmatprep.subr.bf16.mxu1 %v2571_v6 }
 0x651   :  { %1360 = vmatpush1.bf16.msra.mxu0 %v1971_v2  ;;  %1793 = vmatpush3.bf16.msra.mxu1 %v2195_v51 }
 0x652   :  { %1361 = vmatprep.subr.bf16.mxu0 %v1972_v63  ;;  %1794 = vmatprep.subr.bf16.mxu1 %v2571_v6 }
 0x655   :  { %1362 = vmatpush1.bf16.msra.mxu0 %v1973_v46  ;;  %1795 = vmatpush3.bf16.msra.mxu1 %v2201_v52 }
 0x656   :  { %1363 = vmatprep.subr.bf16.mxu0 %v1974_v24  ;;  %1796 = vmatprep.subr.bf16.mxu1 %v2571_v6 }
 0x659   :  { %1364 = vmatpush1.bf16.msra.mxu0 %v2190_v50  ;;  %1797 = vmatpush3.bf16.msra.mxu1 %v2208_v54 }
 0x6fc   :  { %v1274_v49 = vpop.f32.mrf.mxu0  ;;  %v1315_v35 = vpop.f32.mrf.mxu1 }
 0x6fd   :  { %v1321_v51 = vadd.f32 %v1274_v49, %v2288_v7  ;;  %v1335_v54 = vadd.f32 %v2302_v59, %v1315_v35 }
 0x6fe   :  { %v1276_v13 = vpop.f32.mrf.mxu0  ;;  %v1780_v22 = vpop.f32.mrf.mxu1 }
 0x6ff   :  { %v1530_v37 = vmul.f32 -1.442695, %v1321_v51  ;;  %v1328_v31 = vadd.f32 %v1276_v13, %v2573_v15 }
 0x700   :  { %v1278_v3 = vpop.f32.mrf.mxu0  ;;  %v1318_v17 = vpop.f32.mrf.mxu1 }
 0x701   :  { %1937 = vpow2.f32 %v1530_v37  ;;  %v1531_v8 = vmul.f32 -1.442695, %v1328_v31 }
 0x702   :  { %v1279_v43 = vpop.f32.mrf.mxu0  ;;  %v1781_v52 = vpop.f32.mrf.mxu1 }
 0x703   :  { %1939 = vpow2.f32 %v1531_v8 }
 0x70e   :  { %v1938_v6 = vpop.eup %1937 }
 0x70f   :  { %v1325_v53 = vadd.f32 1.0, %v1938_v6 }
 0x710   :  { %v1940_v50 = vpop.eup %1939 }
 0x711   :  { %1941 = vrcp.f32 %v1325_v53  ;;  %v1332_v30 = vadd.f32 1.0, %v1940_v50 }
 0x71e   :  { %v1942_v26 = vpop.eup %1941 }
 0x71f   :  { %v1336_v7 = vmul.f32 %v1942_v26, %v1335_v54 }
 0x721   :  { %v1337_v29 = vadd.f32 %v1336_v7, %v2574_v27 }
 0x723   :  { %1943 = vtanh.f32 %v1337_v29 }
 0x724   :  { %1945 = vrcp.f32 %v1332_v30 }
 0x730   :  { %v1944_v32 = vpop.eup %1943 }
 0x731   :  { %v1339_v33 = vsub.f32 %v2525_v11, %v1944_v32  ;;  %v1946_v34 = vpop.eup %1945 }
 0x733   :  { %v1340_v36 = vmul.f32 %v1946_v34, %v1339_v33 }
 0x735   :  { %v1341_v38 = vadd.f32 %v1944_v32, %v1340_v36 }
 0x737   :  { %v1348_v39 = vpack.c.bf16 %v1341_v38, %v1341_v38 }
 0x739   :  { %1382 = vmatmul.mubr.bf16.vlgmr.msra.gmra.mxu0 %v1348_v39  ;;  %1799 = vmatmul.mubr.bf16.vlgmr.msra.gmra.mxu1 %v1348_v39 }
 0x7f9   :  { %v1383_v40 = vpop.f32.mrf.mxu0  ;;  %v1424_v41 = vpop.f32.mrf.mxu1 }
 0x7fa   :  { %v1430_v44 = vadd.f32 %v1383_v40, %v2575_v42  ;;  %v1444_v19 = vadd.f32 %v2302_v59, %v1424_v41 }
 0x7fb   :  { %v1385_v45 = vpop.f32.mrf.mxu0  ;;  %v1800_v47 = vpop.f32.mrf.mxu1 }
 0x7fc   :  { %v1532_v48 = vmul.f32 -1.442695, %v1430_v44  ;;  %v1437_v5 = vadd.f32 %v1385_v45, %v2297_v25 }
 0x7fd   :  { %v1387_v56 = vpop.f32.mrf.mxu0  ;;  %v1427_v55 = vpop.f32.mrf.mxu1 }
 0x7fe   :  { %1947 = vpow2.f32 %v1532_v48  ;;  %v1533_v18 = vmul.f32 -1.442695, %v1437_v5 }
 0x7ff   :  { %v1388_v58 = vpop.f32.mrf.mxu0  ;;  %v1801_v4 = vpop.f32.mrf.mxu1 }
 0x800   :  { %1949 = vpow2.f32 %v1533_v18 }
 0x80b   :  { %v1948_v10 = vpop.eup %1947 }
 0x80c   :  { %v1434_v60 = vadd.f32 1.0, %v1948_v10 }
 0x80d   :  { %v1950_v11 = vpop.eup %1949 }
 0x80e   :  { %1951 = vrcp.f32 %v1434_v60  ;;  %v1441_v1 = vadd.f32 1.0, %v1950_v11 }
 0x81b   :  { %v1952_v23 = vpop.eup %1951 }
 0x81c   :  { %v1445_v57 = vmul.f32 %v1952_v23, %v1444_v19 }
 0x81e   :  { %v1446_v12 = vadd.f32 %v1445_v57, %v2576_v9 }
 0x820   :  { %1953 = vtanh.f32 %v1446_v12 }
 0x821   :  { %1955 = vrcp.f32 %v1441_v1 }
 0x82d   :  { %v1954_v28 = vpop.eup %1953 }
 0x82e   :  { %v1448_v16 = vsub.f32 %v1341_v38, %v1954_v28  ;;  %v1956_v62 = vpop.eup %1955 }
 0x830   :  { %v1449_v20 = vmul.f32 %v1956_v62, %v1448_v16 }
 0x832   :  { %v1450_v25 = vadd.f32 %v1954_v28, %v1449_v20 }
 0x834   :  { %1452 = vst [vmem:[%s2562_s5] sm:$0xff] %v1450_v25 }
 0x835   :  { %1457 = vsyncpa [#allocation5], 1 }

</bundles_post_ra>
